<compile_context>
chip_gen: v7x
topology: tpu7x:2x2x1
jax: 0.10.0
libtpu: 0.0.40
codegen_flags: <defaults>
</compile_context>

<pallas_src>
import functools

import jax
import jax.numpy as jnp
from jax import lax
from jax.experimental import pallas as pl
from jax.experimental.pallas import tpu as pltpu

EPS = 1e-5


def _standard_conv_kernel(x_ref, w_ref, shift_ref, o_ref, *, K, stride, Ho, Wo):
    """One batch block: ReLU -> KxK conv (as K*K accumulated dots) -> +BN shift.

    x_ref:     (Nb, H, W, Cin)        input block (already padded if needed)
    w_ref:     (K*K, Cin, Cout)       BN-scale-folded weights, tap = dh*K + dw
    shift_ref: (1, Cout)              folded BN shift
    o_ref:     (1, Nb*Ho*Wo, Cout)    lane-dense matmul-shaped output block
    """
    xr = jnp.maximum(x_ref[...], 0.0)                       # fused ReLU
    Nb, _, _, Cin = xr.shape
    Cout = o_ref.shape[-1]
    M = Nb * Ho * Wo

    acc = jnp.zeros((M, Cout), jnp.float32)
    for t in range(K * K):
        dh, dw = divmod(t, K)
        if stride == 1:
            patch = xr[:, dh:dh + Ho, dw:dw + Wo, :]        # contiguous slice
        else:
            patch = lax.slice(
                xr,
                (0, dh, dw, 0),
                (Nb, dh + (Ho - 1) * stride + 1, dw + (Wo - 1) * stride + 1, Cin),
                (1, stride, stride, 1))
        # Accumulation-of-dots im2col: no patch concatenation, default precision.
        acc = acc + jnp.dot(patch.reshape(M, Cin), w_ref[t],
                            preferred_element_type=jnp.float32)

    # Folded-BN epilogue: only the per-channel shift remains (scale is in w).
    o_ref[0] = acc + shift_ref[...]


def _choose_batch_block(n, rows_per_image, target_rows=128):
    """Smallest batch block whose flattened matmul M reaches a healthy row
    count — smallest block => most grid steps (keeps both v7x TCs busy)."""
    for nb in range(1, n + 1):
        if n % nb == 0 and nb * rows_per_image >= target_rows:
            return nb
    return n


def standard_conv_forward(x_nhwc, conv_w, gamma, beta, mean, var,
                          *, stride=1, padding=0, batch_block=None):
    """x_nhwc: (N, H, W, Cin) f32.  conv_w: PyTorch layout (Cout, Cin, K, K).
    Returns NHWC output (N, Ho, Wo, Cout)."""
    N, H, W, Cin = x_nhwc.shape
    Cout, Cin_w, KH, KW = conv_w.shape
    assert Cin_w == Cin and KH == KW, (conv_w.shape, Cin)
    K = KH

    if padding:
        # Zero-pad before the kernel: equivalent to conv padding since ReLU(0)=0.
        x_nhwc = jnp.pad(x_nhwc,
                         ((0, 0), (padding, padding), (padding, padding), (0, 0)))
        H += 2 * padding
        W += 2 * padding

    Ho = (H - K) // stride + 1
    Wo = (W - K) // stride + 1

    # Fold inference-mode BN into the conv weights (scale) + a shift vector.
    scale = gamma / jnp.sqrt(var + EPS)                      # (Cout,)
    shift = (beta - mean * scale).reshape(1, Cout)           # (1, Cout)
    # (Cout, Cin, K, K) -> (K, K, Cin, Cout) * scale -> (K*K, Cin, Cout)
    w_folded = (jnp.transpose(conv_w, (2, 3, 1, 0)) * scale).reshape(K * K, Cin, Cout)

    if batch_block is None:
        batch_block = _choose_batch_block(N, Ho * Wo)
    assert N % batch_block == 0, (N, batch_block)
    nblk = N // batch_block
    m_rows = batch_block * Ho * Wo

    kernel = functools.partial(_standard_conv_kernel,
                               K=K, stride=stride, Ho=Ho, Wo=Wo)
    out = pl.pallas_call(
        kernel,
        out_shape=jax.ShapeDtypeStruct((nblk, m_rows, Cout), jnp.float32),
        grid=(nblk,),
        in_specs=[
            pl.BlockSpec((batch_block, H, W, Cin), lambda n: (n, 0, 0, 0)),
            pl.BlockSpec((K * K, Cin, Cout), lambda n: (0, 0, 0)),
            pl.BlockSpec((1, Cout), lambda n: (0, 0)),
        ],
        # Output block is exactly the matmul result shape -> no in-kernel reshape.
        out_specs=pl.BlockSpec((1, m_rows, Cout), lambda n: (n, 0, 0)),
        compiler_params=pltpu.CompilerParams(dimension_semantics=("parallel",)),
    )(x_nhwc, w_folded, shift)

    # Spatial reshape happens here (wrapper), not inside the kernel.
    return out.reshape(N, Ho, Wo, Cout)


def _reference_forward(x_nhwc, conv_w, gamma, beta, mean, var, *, stride=1, padding=0):
    """Pure-JAX reference mirroring the PyTorch module (inference-mode BN)."""
    y = jnp.maximum(x_nhwc, 0.0)
    y = lax.conv_general_dilated(
        y, jnp.transpose(conv_w, (2, 3, 1, 0)), (stride, stride),
        [(padding, padding), (padding, padding)],
        dimension_numbers=('NHWC', 'HWIO', 'NHWC'),
        precision=lax.Precision.HIGHEST)
    y = (y - mean) / jnp.sqrt(var + EPS) * gamma + beta
    return y


if __name__ == "__main__":
    key = jax.random.PRNGKey(0)
    ks = jax.random.split(key, 8)

    # Small shapes implied by the module: batch=2, channels=4, spatial=16,
    # out_channels=32, kernel_size=3, stride=1, padding=0 (the defaults).
    N, Cin, H, W = 2, 4, 16, 16
    Cout, K = 32, 3

    # Input rounded to the bf16 grid so the kernel's default-precision
    # (bf16-pass) MXU matmuls are numerically exact vs. the HIGHEST-precision
    # reference, keeping a tight tolerance meaningful.
    x_nchw = jax.random.normal(ks[0], (N, Cin, H, W), jnp.float32)
    x_nchw = x_nchw.astype(jnp.bfloat16).astype(jnp.float32)
    x_nhwc = jnp.transpose(x_nchw, (0, 2, 3, 1))

    # Deterministic BN parameters (inference-mode running stats).
    g = 1.0 + 0.1 * jax.random.normal(ks[1], (Cout,), jnp.float32)
    b = 0.1 * jax.random.normal(ks[2], (Cout,), jnp.float32)
    m = 0.1 * jax.random.normal(ks[3], (Cout,), jnp.float32)
    v = jax.random.uniform(ks[4], (Cout,), jnp.float32, 0.5, 1.5)
    scale = g / jnp.sqrt(v + EPS)

    # Construct conv weights so the BN-folded weights land on the bf16 grid
    # (same exactness rationale as the input).  PyTorch layout (Cout, Cin, K, K).
    w_folded_torch = 0.2 * jax.random.normal(ks[5], (Cout, Cin, K, K), jnp.float32)
    w_folded_torch = w_folded_torch.astype(jnp.bfloat16).astype(jnp.float32)
    conv_w = w_folded_torch / scale[:, None, None, None]
    # TODO(synk): BatchNorm training-mode (batch statistics) is not reproduced;
    #             inference-mode BN with deterministic running stats is used.

    out = standard_conv_forward(x_nhwc, conv_w, g, b, m, v, stride=1, padding=0)
    out = jax.block_until_ready(out)

    ref = _reference_forward(x_nhwc, conv_w, g, b, m, v, stride=1, padding=0)
    ref = jax.block_until_ready(ref)

    # Back to NCHW like the PyTorch module for the shape check.
    out_nchw = jnp.transpose(out, (0, 3, 1, 2))
    assert out_nchw.shape == (N, Cout, H - K + 1, W - K + 1), out_nchw.shape
    assert out.shape == ref.shape, (out.shape, ref.shape)
    max_err = float(jnp.max(jnp.abs(out - ref)))
    assert jnp.allclose(out, ref, atol=1e-3, rtol=1e-3), max_err
    print("KERNEL_OK")
</pallas_src>

<mosaic_0001>
module attributes {stable_mosaic.version = 11 : i64} {
  func.func @_standard_conv_kernel(%arg0: i32, %arg1: memref<1x16x16x4xf32, #tpu.memory_space<vmem>>, %arg2: memref<9x4x32xf32, #tpu.memory_space<vmem>>, %arg3: memref<1x32xf32, #tpu.memory_space<vmem>>, %arg4: memref<1x196x32xf32, #tpu.memory_space<vmem>>) attributes {dimension_semantics = [#tpu.dimension_semantics<parallel>], iteration_bounds = array<i64: 2>, scalar_prefetch = 0 : i64, scratch_operands = 0 : i64, tpu.core_type = #tpu.core_type<tc>, window_params = [{transform_indices = @transform_0, window_bounds = array<i64: 1, 16, 16, 4>}, {pipeline_mode = #tpu.pipeline_mode<synchronous>, transform_indices = @transform_1, window_bounds = array<i64: 9, 4, 32>}, {pipeline_mode = #tpu.pipeline_mode<synchronous>, transform_indices = @transform_2, window_bounds = array<i64: 1, 32>}, {transform_indices = @transform_3, window_bounds = array<i64: 1, 196, 32>}]} {
    %c0 = arith.constant 0 : index
    %c0_0 = arith.constant 0 : index
    %c0_1 = arith.constant 0 : index
    %c0_2 = arith.constant 0 : index
    %0 = vector.load %arg1[%c0, %c0_0, %c0_1, %c0_2] : memref<1x16x16x4xf32, #tpu.memory_space<vmem>>, vector<1x16x16x4xf32>
    %cst = arith.constant 0.000000e+00 : f32
    %1 = vector.broadcast %cst : f32 to vector<1x16x16x4xf32>
    %2 = arith.maximumf %0, %1 : vector<1x16x16x4xf32>
    %cst_3 = arith.constant 0.000000e+00 : f32
    %3 = vector.broadcast %cst_3 : f32 to vector<196x32xf32>
    %4 = vector.extract_strided_slice %2 {offsets = [0, 0, 0, 0], sizes = [1, 14, 14, 4], strides = [1, 1, 1, 1]} : vector<1x16x16x4xf32> to vector<1x14x14x4xf32>
    %5 = vector.shape_cast %4 : vector<1x14x14x4xf32> to vector<196x4xf32>
    %c0_4 = arith.constant 0 : index
    %c0_5 = arith.constant 0 : index
    %c0_6 = arith.constant 0 : index
    %6 = vector.load %arg2[%c0_4, %c0_5, %c0_6] : memref<9x4x32xf32, #tpu.memory_space<vmem>>, vector<1x4x32xf32>
    %7 = vector.shape_cast %6 : vector<1x4x32xf32> to vector<4x32xf32>
    %cst_7 = arith.constant dense<0.000000e+00> : vector<196x32xf32>
    %8 = tpu.matmul %5, %7, %cst_7 {dimension_numbers = #tpu.dot_dimension_numbers<[1], [0], [0], [1], [0, 0, 1, 1], [], []>} : vector<196x4xf32>, vector<4x32xf32>, vector<196x32xf32> -> vector<196x32xf32>
    %9 = arith.addf %3, %8 : vector<196x32xf32>
    %10 = vector.extract_strided_slice %2 {offsets = [0, 0, 1, 0], sizes = [1, 14, 14, 4], strides = [1, 1, 1, 1]} : vector<1x16x16x4xf32> to vector<1x14x14x4xf32>
    %11 = vector.shape_cast %10 : vector<1x14x14x4xf32> to vector<196x4xf32>
    %c1 = arith.constant 1 : index
    %c0_8 = arith.constant 0 : index
    %c0_9 = arith.constant 0 : index
    %12 = vector.load %arg2[%c1, %c0_8, %c0_9] : memref<9x4x32xf32, #tpu.memory_space<vmem>>, vector<1x4x32xf32>
    %13 = vector.shape_cast %12 : vector<1x4x32xf32> to vector<4x32xf32>
    %cst_10 = arith.constant dense<0.000000e+00> : vector<196x32xf32>
    %14 = tpu.matmul %11, %13, %cst_10 {dimension_numbers = #tpu.dot_dimension_numbers<[1], [0], [0], [1], [0, 0, 1, 1], [], []>} : vector<196x4xf32>, vector<4x32xf32>, vector<196x32xf32> -> vector<196x32xf32>
    %15 = arith.addf %9, %14 : vector<196x32xf32>
    %16 = vector.extract_strided_slice %2 {offsets = [0, 0, 2, 0], sizes = [1, 14, 14, 4], strides = [1, 1, 1, 1]} : vector<1x16x16x4xf32> to vector<1x14x14x4xf32>
    %17 = vector.shape_cast %16 : vector<1x14x14x4xf32> to vector<196x4xf32>
    %c2 = arith.constant 2 : index
    %c0_11 = arith.constant 0 : index
    %c0_12 = arith.constant 0 : index
    %18 = vector.load %arg2[%c2, %c0_11, %c0_12] : memref<9x4x32xf32, #tpu.memory_space<vmem>>, vector<1x4x32xf32>
    %19 = vector.shape_cast %18 : vector<1x4x32xf32> to vector<4x32xf32>
    %cst_13 = arith.constant dense<0.000000e+00> : vector<196x32xf32>
    %20 = tpu.matmul %17, %19, %cst_13 {dimension_numbers = #tpu.dot_dimension_numbers<[1], [0], [0], [1], [0, 0, 1, 1], [], []>} : vector<196x4xf32>, vector<4x32xf32>, vector<196x32xf32> -> vector<196x32xf32>
    %21 = arith.addf %15, %20 : vector<196x32xf32>
    %22 = vector.extract_strided_slice %2 {offsets = [0, 1, 0, 0], sizes = [1, 14, 14, 4], strides = [1, 1, 1, 1]} : vector<1x16x16x4xf32> to vector<1x14x14x4xf32>
    %23 = vector.shape_cast %22 : vector<1x14x14x4xf32> to vector<196x4xf32>
    %c3 = arith.constant 3 : index
    %c0_14 = arith.constant 0 : index
    %c0_15 = arith.constant 0 : index
    %24 = vector.load %arg2[%c3, %c0_14, %c0_15] : memref<9x4x32xf32, #tpu.memory_space<vmem>>, vector<1x4x32xf32>
    %25 = vector.shape_cast %24 : vector<1x4x32xf32> to vector<4x32xf32>
    %cst_16 = arith.constant dense<0.000000e+00> : vector<196x32xf32>
    %26 = tpu.matmul %23, %25, %cst_16 {dimension_numbers = #tpu.dot_dimension_numbers<[1], [0], [0], [1], [0, 0, 1, 1], [], []>} : vector<196x4xf32>, vector<4x32xf32>, vector<196x32xf32> -> vector<196x32xf32>
    %27 = arith.addf %21, %26 : vector<196x32xf32>
    %28 = vector.extract_strided_slice %2 {offsets = [0, 1, 1, 0], sizes = [1, 14, 14, 4], strides = [1, 1, 1, 1]} : vector<1x16x16x4xf32> to vector<1x14x14x4xf32>
    %29 = vector.shape_cast %28 : vector<1x14x14x4xf32> to vector<196x4xf32>
    %c4 = arith.constant 4 : index
    %c0_17 = arith.constant 0 : index
    %c0_18 = arith.constant 0 : index
    %30 = vector.load %arg2[%c4, %c0_17, %c0_18] : memref<9x4x32xf32, #tpu.memory_space<vmem>>, vector<1x4x32xf32>
    %31 = vector.shape_cast %30 : vector<1x4x32xf32> to vector<4x32xf32>
    %cst_19 = arith.constant dense<0.000000e+00> : vector<196x32xf32>
    %32 = tpu.matmul %29, %31, %cst_19 {dimension_numbers = #tpu.dot_dimension_numbers<[1], [0], [0], [1], [0, 0, 1, 1], [], []>} : vector<196x4xf32>, vector<4x32xf32>, vector<196x32xf32> -> vector<196x32xf32>
    %33 = arith.addf %27, %32 : vector<196x32xf32>
    %34 = vector.extract_strided_slice %2 {offsets = [0, 1, 2, 0], sizes = [1, 14, 14, 4], strides = [1, 1, 1, 1]} : vector<1x16x16x4xf32> to vector<1x14x14x4xf32>
    %35 = vector.shape_cast %34 : vector<1x14x14x4xf32> to vector<196x4xf32>
    %c5 = arith.constant 5 : index
    %c0_20 = arith.constant 0 : index
    %c0_21 = arith.constant 0 : index
    %36 = vector.load %arg2[%c5, %c0_20, %c0_21] : memref<9x4x32xf32, #tpu.memory_space<vmem>>, vector<1x4x32xf32>
    %37 = vector.shape_cast %36 : vector<1x4x32xf32> to vector<4x32xf32>
    %cst_22 = arith.constant dense<0.000000e+00> : vector<196x32xf32>
    %38 = tpu.matmul %35, %37, %cst_22 {dimension_numbers = #tpu.dot_dimension_numbers<[1], [0], [0], [1], [0, 0, 1, 1], [], []>} : vector<196x4xf32>, vector<4x32xf32>, vector<196x32xf32> -> vector<196x32xf32>
    %39 = arith.addf %33, %38 : vector<196x32xf32>
    %40 = vector.extract_strided_slice %2 {offsets = [0, 2, 0, 0], sizes = [1, 14, 14, 4], strides = [1, 1, 1, 1]} : vector<1x16x16x4xf32> to vector<1x14x14x4xf32>
    %41 = vector.shape_cast %40 : vector<1x14x14x4xf32> to vector<196x4xf32>
    %c6 = arith.constant 6 : index
    %c0_23 = arith.constant 0 : index
    %c0_24 = arith.constant 0 : index
    %42 = vector.load %arg2[%c6, %c0_23, %c0_24] : memref<9x4x32xf32, #tpu.memory_space<vmem>>, vector<1x4x32xf32>
    %43 = vector.shape_cast %42 : vector<1x4x32xf32> to vector<4x32xf32>
    %cst_25 = arith.constant dense<0.000000e+00> : vector<196x32xf32>
    %44 = tpu.matmul %41, %43, %cst_25 {dimension_numbers = #tpu.dot_dimension_numbers<[1], [0], [0], [1], [0, 0, 1, 1], [], []>} : vector<196x4xf32>, vector<4x32xf32>, vector<196x32xf32> -> vector<196x32xf32>
    %45 = arith.addf %39, %44 : vector<196x32xf32>
    %46 = vector.extract_strided_slice %2 {offsets = [0, 2, 1, 0], sizes = [1, 14, 14, 4], strides = [1, 1, 1, 1]} : vector<1x16x16x4xf32> to vector<1x14x14x4xf32>
    %47 = vector.shape_cast %46 : vector<1x14x14x4xf32> to vector<196x4xf32>
    %c7 = arith.constant 7 : index
    %c0_26 = arith.constant 0 : index
    %c0_27 = arith.constant 0 : index
    %48 = vector.load %arg2[%c7, %c0_26, %c0_27] : memref<9x4x32xf32, #tpu.memory_space<vmem>>, vector<1x4x32xf32>
    %49 = vector.shape_cast %48 : vector<1x4x32xf32> to vector<4x32xf32>
    %cst_28 = arith.constant dense<0.000000e+00> : vector<196x32xf32>
    %50 = tpu.matmul %47, %49, %cst_28 {dimension_numbers = #tpu.dot_dimension_numbers<[1], [0], [0], [1], [0, 0, 1, 1], [], []>} : vector<196x4xf32>, vector<4x32xf32>, vector<196x32xf32> -> vector<196x32xf32>
    %51 = arith.addf %45, %50 : vector<196x32xf32>
    %52 = vector.extract_strided_slice %2 {offsets = [0, 2, 2, 0], sizes = [1, 14, 14, 4], strides = [1, 1, 1, 1]} : vector<1x16x16x4xf32> to vector<1x14x14x4xf32>
    %53 = vector.shape_cast %52 : vector<1x14x14x4xf32> to vector<196x4xf32>
    %c8 = arith.constant 8 : index
    %c0_29 = arith.constant 0 : index
    %c0_30 = arith.constant 0 : index
    %54 = vector.load %arg2[%c8, %c0_29, %c0_30] : memref<9x4x32xf32, #tpu.memory_space<vmem>>, vector<1x4x32xf32>
    %55 = vector.shape_cast %54 : vector<1x4x32xf32> to vector<4x32xf32>
    %cst_31 = arith.constant dense<0.000000e+00> : vector<196x32xf32>
    %56 = tpu.matmul %53, %55, %cst_31 {dimension_numbers = #tpu.dot_dimension_numbers<[1], [0], [0], [1], [0, 0, 1, 1], [], []>} : vector<196x4xf32>, vector<4x32xf32>, vector<196x32xf32> -> vector<196x32xf32>
    %57 = arith.addf %51, %56 : vector<196x32xf32>
    %c0_32 = arith.constant 0 : index
    %c0_33 = arith.constant 0 : index
    %58 = vector.load %arg3[%c0_32, %c0_33] : memref<1x32xf32, #tpu.memory_space<vmem>>, vector<1x32xf32>
    %59 = vector.broadcast %58 : vector<1x32xf32> to vector<196x32xf32>
    %60 = arith.addf %57, %59 : vector<196x32xf32>
    %c0_34 = arith.constant 0 : index
    %c0_35 = arith.constant 0 : index
    %c0_36 = arith.constant 0 : index
    %61 = vector.load %arg4[%c0_34, %c0_35, %c0_36] : memref<1x196x32xf32, #tpu.memory_space<vmem>>, vector<1x196x32xf32>
    %62 = vector.shape_cast %61 : vector<1x196x32xf32> to vector<196x32xf32>
    %63 = vector.shape_cast %60 : vector<196x32xf32> to vector<1x196x32xf32>
    tpu.vector_store %arg4[%c0_34, %c0_35, %c0_36], %63 {strides = array<i32>} : memref<1x196x32xf32, #tpu.memory_space<vmem>>, vector<1x196x32xf32>,
    return
  }
  func.func @transform_0(%arg0: i32) -> (i32, i32, i32, i32) {
    %c0_i32 = arith.constant 0 : i32
    %c0_i32_0 = arith.constant 0 : i32
    %c0_i32_1 = arith.constant 0 : i32
    %c0_i32_2 = arith.constant 0 : i32
    return %arg0, %c0_i32, %c0_i32_0, %c0_i32_1 : i32, i32, i32, i32
  }
  func.func @transform_1(%arg0: i32) -> (i32, i32, i32) {
    %c0_i32 = arith.constant 0 : i32
    %c0_i32_0 = arith.constant 0 : i32
    %c0_i32_1 = arith.constant 0 : i32
    %c0_i32_2 = arith.constant 0 : i32
    return %c0_i32, %c0_i32_0, %c0_i32_1 : i32, i32, i32
  }
  func.func @transform_2(%arg0: i32) -> (i32, i32) {
    %c0_i32 = arith.constant 0 : i32
    %c0_i32_0 = arith.constant 0 : i32
    %c0_i32_1 = arith.constant 0 : i32
    return %c0_i32, %c0_i32_0 : i32, i32
  }
  func.func @transform_3(%arg0: i32) -> (i32, i32, i32) {
    %c0_i32 = arith.constant 0 : i32
    %c0_i32_0 = arith.constant 0 : i32
    %c0_i32_1 = arith.constant 0 : i32
    return %arg0, %c0_i32, %c0_i32_0 : i32, i32, i32
  }
}

</mosaic_0001>

<bundles_post_ra>
// kernel: tpu_custom_call.1
= control target key start
LH: loop header
LB: loop body
LE: loop exit
PB: predicated region body
PF: predicated region fallthrough
CT: control target
= control target key end

     0   :  { %s7038_s12 = smov 0   ;;  %s10604_s0 = inlined_call_operand.vmem [shape: f32[2,16,16,4], index: 0, kind: input, shape index: {}]   ;;  %s10605_s1 = inlined_call_operand.vmem [shape: f32[9,4,32], index: 1, kind: input, shape index: {}]   ;;  %s10606_s2 = inlined_call_operand.vmem [shape: f32[1,32], index: 2, kind: input, shape index: {}]   ;;  %s10607_s3 = inlined_call_operand.vmem [shape: f32[2,196,32], index: 3, kind: output, shape index: {}]  }
   0x1 LB: > { %s5781_s13 = sadd.s32 4294967295, %s7013_s12   ;;  %p5785_p0 = scmp.ge.s32.totalorder %s7013_s12, 1  ;;  %s7013_s12 = sphi %s7038_s12, %s13_s12  }
   0x2   : > { %p137_p1 = scmp.lt.s32.totalorder %s7013_s12, 3 }
   0x4   : > { %p138_p2 = pnand %p5785_p0, %p137_p1 }
   0x6   : > { %141 = sbr.rel (%p138_p2) target bundleno = 794 (0x31a), region = 32 }
   0xd   : > { %v5803_v0 = vld [vmem:[%s10605_s1 + $0x4] sm:$0xf]  ;;  %vm1524_vm0 = vcmask 1043456   ;;  %p161_p3 = scmp.lt.s32.totalorder %s5781_s13, 1  ;;  %v267_v1 = vlaneseq  ;;  %v10609_v2 = vmov 0.0   ;;  %vm740_vm1 = vcmask 1040384  }
   0xe   : > { %6300 = vmatprep.subr.mxu0 %v10609_v2  ;;  %6993 = vmatprep.subr.mxu1 %v10609_v2  ;;  %v7016_v3 = vmov 1983009808   ;;  %vm741_vm2 = vcmask 1042434   ;;  %vm7017_vm3 = vmmov 0   ;;  %vm743_vm5 = vcmask 1044484  }
   0xf   : > { %6301 = vmatpush3.msk.msra.mxu0 %vm1524_vm0, %v5803_v0  ;;  %6994 = vmatpush3.msk.msra.mxu1 %vm1524_vm0, %v5803_v0  ;;  %s11601_s13 = smov (!%p161_p3, %s5781_s13), 1  ;;  %v265_v4 = vunpack.c.l.s4 %v7016_v3  ;;  %v268_v5 = vshrl.u32 %v267_v1, 7  ;;  %vm7067_vm4 = vmor %vm740_vm1, %vm741_vm2  ;;  %vm745_vm6 = vcmask 1046534   ;;  %v10982_v33 = vmov 0 }
  0x10   : > { %6302 = vmatprep.mubr.msk.f32.mxu0 %vm7017_vm3, %v10609_v2  ;;  %6341 = vmatprep.mubr.msk.f32.mxu1 %vm7017_vm3, %v10609_v2  ;;  %s6065_s16 = sshll.u32 %s11601_s13, 8  ;;  %vm744_vm7 = vmor %vm7067_vm4, %vm743_vm5  ;;  %vm1473_vm9 = vcmask 31744   ;;  %s6995_s9 = smul.u32 200, %s11601_s13  ;;  %vm5699_vm10 = vcmask 261120   ;;  %vm5724_vm11 = vcmask 257024  }
  0x11   : > { %6454 = vmatprep.subr.mxu0 %v10609_v2  ;;  %v266_v6 = vunpack.c.0.s8 %v265_v4  ;;  %6377 = vmatprep.subr.mxu1 %v10609_v2  ;;  %s7065_s19 = scalar_lea.vmem %s10604_s0, %s6065_s16  ;;  %vm7113_vm8 = vmor %vm744_vm7, %vm745_vm6 }
  0x12   : > { %v171_v8 = vld [vmem:[%s7065_s19] sm:$0xff]  ;;  %v172_v9 = vld [vmem:[%s7065_s19 + $0x8] sm:$0xff]  ;;  %v185_v11 = vld [vmem:[%s7065_s19 + $0x70] sm:$0xff]  ;;  %v10983_v33 = vsel %vm7113_vm8, 4294967295, %v10982_v33  ;;  %s10503_s16 = scalar_lea.vmem %s10607_s3, %s6995_s9 }
  0x13   : > { %v7073_v10 = vsub.s32 %v266_v6, %v268_v5  ;;  %v203_v12 = vmax.f32 %v171_v8, 0.0  ;;  %v204_v13 = vmax.f32 %v172_v9, 0.0  ;;  %v186_v14 = vld [vmem:[%s7065_s19 + $0x78] sm:$0xff]  ;;  %v7077_v15 = vmax.f32 %v185_v11, 0.0  ;;  %v173_v16 = vld [vmem:[%s7065_s19 + $0x10] sm:$0xff]  ;;  %v187_v17 = vld [vmem:[%s7065_s19 + $0x80] sm:$0xff] }
  0x14   : > { %v218_v18 = vmax.f32 %v186_v14, 0.0  ;;  %v7081_v19 = vmax.f32 %v173_v16, 0.0  ;;  %v7083_v20 = vmax.f32 %v187_v17, 0.0  ;;  %10984 = vst [vmem:[#allocation3_spill] sm:$0xff] %v10983_v33 }
  0x15   : > { %v263_v21 = vcombine.high %v203_v12, %v203_v12  ;;  %v7086_v22 = vrot.slane %v203_v12, %v7073_v10  ;;  %v280_v23 = vcombine.high %v204_v13, %v204_v13  ;;  %v7089_v24 = vrot.slane %v204_v13, %v7073_v10  ;;  %v188_v12 = vld [vmem:[%s7065_s19 + $0x88] sm:$0xff] }
  0x16   : > { %v494_v25 = vcombine.high %v7077_v15, %v7077_v15  ;;  %v511_v26 = vcombine.high %v218_v18, %v218_v18  ;;  %v7097_v27 = vrot.slane %v218_v18, %v7073_v10  ;;  %v7101_v28 = vrot.slane %v7081_v19, %v7073_v10 }
  0x17   : > { %v7104_v29 = vrot.slane %v263_v21, %v7073_v10  ;;  %v7108_v30 = vcombine.high %v7086_v22, %v7086_v22  ;;  %v5789_v31 = vrot.slane %v7086_v22, 9  ;;  %v758_v32 = vrot.slane %v7089_v24, 7 }
  0x18   : > { %10981 = vst [vmem:[#allocation2_spill] sm:$0xff] %v7097_v27  ;;  %v7118_v34 = vrot.slane %v494_v25, %v7073_v10  ;;  %v7121_v35 = vrot.slane %v511_v26, %v7073_v10  ;;  %v7125_v36 = vcombine.high %v7097_v27, %v7097_v27  ;;  %v912_v37 = vrot.slane %v7097_v27, 7 }
  0x19   : > { %v7130_v38 = vcombine.high %v7104_v29, %v7104_v29  ;;  %v749_v39 = vrot.slane %v7108_v30, 7  ;;  %v752_v40 = vrot.slane %v7104_v29, 7  ;;  %v7135_v41 = vrot.slane %v280_v23, %v7073_v10 }
  0x1a   : > { %10985 = vst [vmem:[#allocation4_spill] sm:$0xff] %v7121_v35  ;;  %10986 = vst [vmem:[#allocation5_spill] sm:$0xff] %v7125_v36  ;;  %v7139_v42 = vcombine.high %v7118_v34, %v7118_v34  ;;  %v7143_v43 = vcombine.high %v7121_v35, %v7121_v35  ;;  %v914_v44 = vrot.slane %v912_v37, 2  ;;  %v915_v45 = vrot.slane %v7125_v36, 7 }
  0x1b   : > { %v750_v46 = vsel %vm7113_vm8, %v5789_v31, %v749_v39  ;;  %v751_v47 = vrot.slane %v749_v39, 2  ;;  %v754_v48 = vrot.slane %v752_v40, 2  ;;  %v755_v49 = vrot.slane %v7130_v38, 7  ;;  %v5856_v31 = vld [vmem:[%s10605_s1 + $0x8] sm:$0xf] }
  0x1c   : > { %10987 = vst [vmem:[#allocation6_spill] sm:$0xff] %v7143_v43  ;;  %v10608_v50 = vrot.slane %v7139_v42, 7  ;;  %v7152_v51 = vsel %vm7113_vm8, %v914_v44, %v915_v45  ;;  %v917_v52 = vrot.slane %v915_v45, 2  ;;  %v918_v53 = vrot.slane %v7121_v35, 7  ;;  %v725_v44 = vld [vmem:[%s10605_s1] sm:$0xf] }
  0x1d   : > { %10988 = vst [vmem:[#allocation7_spill] sm:$0xff] %v7152_v51  ;;  %v753_v54 = vsel %vm7113_vm8, %v751_v47, %v752_v40  ;;  %v756_v55 = vsel %vm7113_vm8, %v754_v48, %v755_v49  ;;  %v757_v56 = vrot.slane %v755_v49, 2  ;;  %v921_v57 = vrot.slane %v7143_v43, 7  ;;  %v174_v48 = vld [vmem:[%s7065_s19 + $0x18] sm:$0xff] }
  0x1e   : > { %v1057_v58 = vcombine.low %v750_v46, %v753_v54  ;;  %v911_v59 = vrot.slane %v10608_v50, 2  ;;  %v7164_v60 = vsel %vm7113_vm8, %v917_v52, %v918_v53  ;;  %v920_v61 = vrot.slane %v918_v53, 2 }
  0x1f   : > { %10989 = vst [vmem:[#allocation8_spill] sm:$0xff] %v7164_v60  ;;  %v759_v62 = vsel %vm7113_vm8, %v757_v56, %v758_v32  ;;  %v7170_v63 = vcombine.high %v7089_v24, %v7089_v24  ;;  %v7174_v0 = vcombine.high %v7101_v28, %v7101_v28  ;;  %v726_v1 = vcombine.high %v7135_v41, %v7135_v41 }
  0x20   : > { %v1058_v3 = vcombine.low %v756_v55, %v759_v62  ;;  %v1065_v4 = vrot.slane %v1057_v58, %v7073_v10  ;;  %v7181_v5 = vsel %vm7113_vm8, %v911_v59, %v912_v37  ;;  %v7185_v6 = vsel %vm7113_vm8, %v920_v61, %v921_v57 }
  0x21   : > { %10990 = vst [vmem:[#allocation9_spill] sm:$0xff] %v7181_v5  ;;  %10991 = vst [vmem:[#allocation10_spill] sm:$0xff] %v7185_v6  ;;  %v1278_v7 = vcombine.low %v7181_v5, %v7152_v51  ;;  %v1279_v8 = vcombine.low %v7164_v60, %v7185_v6  ;;  %v760_v9 = vrot.slane %v758_v32, 2  ;;  %v761_v11 = vrot.slane %v7170_v63, 7  ;;  %v176_v6 = vld [vmem:[%s7065_s19 + $0x28] sm:$0xff] }
  0x22   : > { %v1072_v13 = vrot.slane %v1058_v3, %v7073_v10  ;;  %v764_v14 = vrot.slane %v7135_v41, 7  ;;  %v767_v16 = vrot.slane %v726_v1, 7  ;;  %v5790_v17 = vrot.slane %v7101_v28, 9 }
  0x23   : > { %v7197_v18 = vrot.slane %v1278_v7, %v7073_v10  ;;  %v7200_v21 = vrot.slane %v1279_v8, %v7073_v10  ;;  %v762_v23 = vsel %vm7113_vm8, %v760_v9, %v761_v11  ;;  %v763_v25 = vrot.slane %v761_v11, 2 }
  0x24   : > { %v1073_v26 = vcombine.low %v1065_v4, %v1072_v13  ;;  %v766_v32 = vrot.slane %v764_v14, 2  ;;  %v771_v37 = vrot.slane %v7174_v0, 7  ;;  %v220_v39 = vmax.f32 %v188_v12, 0.0  ;;  %v189_v12 = vld [vmem:[%s7065_s19 + $0x90] sm:$0xff] }
  0x25   : > { %10992 = vst [vmem:[#allocation11_spill] sm:$0xff] %v7197_v18  ;;  %10993 = vst [vmem:[#allocation12_spill] sm:$0xff] %v7200_v21  ;;  %v1294_v40 = vcombine.low %v7197_v18, %v7200_v21  ;;  %v765_v45 = vsel %vm7113_vm8, %v763_v25, %v764_v14  ;;  %v527_v46 = vcombine.high %v7083_v20, %v7083_v20  ;;  %v206_v61 = vmax.f32 %v174_v48, 0.0 }
  0x26   : > { %v7219_v47 = vrot.slane %v7083_v20, %v7073_v10  ;;  %6303 = vmatmul.mubr.msk.f32.vlgmr.msra.gmra.mrb[0].mxu0 %vm1473_vm9, %v1073_v26  ;;  %v768_v49 = vsel %vm7113_vm8, %v766_v32, %v767_v16  ;;  %v7227_v52 = vsel %vm7113_vm8, %v5790_v17, %v771_v37  ;;  %v1074_v53 = vcombine.low %v762_v23, %v765_v45 }
  0x27   : > { %10995 = vst [vmem:[#allocation14_spill] sm:$0xff] %v7227_v52  ;;  %v544_v54 = vcombine.high %v220_v39, %v220_v39  ;;  %6342 = vmatmul.mubr.msk.f32.vlgmr.msra.gmra.mrb[0].mxu1 %vm1473_vm9, %v1294_v40  ;;  %6455 = vmatpush3.msk.msra.mxu0 %vm1524_vm0, %v5856_v31  ;;  %v1075_v55 = vcombine.low %v768_v49, %v7227_v52  ;;  %v773_v32 = vrot.slane %v771_v37, 2  ;;  %v7286_v40 = vmax.f32 %v189_v12, 0.0 }
  0x28   : > { %10994 = vst [vmem:[#allocation13_spill] sm:$0xff] %v7219_v47  ;;  %v7233_v20 = vrot.slane %v527_v46, %v7073_v10  ;;  %v7237_v56 = vcombine.high %v7219_v47, %v7219_v47  ;;  %v5797_v57 = vrot.slane %v7219_v47, 9  ;;  %6378 = vmatpush3.msk.msra.mxu1 %vm1524_vm0, %v725_v44  ;;  %6305 = vmatprep.mubr.msk.f32.mxu0 %vm7017_vm3, %v10609_v2  ;;  %v11016_v18 = vmov 0.0  }
  0x29   : > { %v1082_v58 = vrot.slane %v1074_v53, %v7073_v10  ;;  %v7245_v59 = vrot.slane %v220_v39, %v7073_v10  ;;  %6344 = vmatprep.mubr.msk.f32.mxu1 %vm7017_vm3, %v10609_v2  ;;  %v1089_v62 = vrot.slane %v1075_v55, %v7073_v10  ;;  %6531 = vmatprep.subr.mxu1 %v10609_v2 }
  0x2a   : > { %10996 = vst [vmem:[#allocation15_spill] sm:$0xff] %v7233_v20  ;;  %10997 = vst [vmem:[#allocation16_spill] sm:$0xff] %v7237_v56  ;;  %v7252_v1 = vcombine.high %v7233_v20, %v7233_v20  ;;  %v925_v3 = vrot.slane %v7237_v56, 7  ;;  %v928_v4 = vrot.slane %v7233_v20, 7  ;;  %v7258_v7 = vrot.slane %v544_v54, %v7073_v10  ;;  %6608 = vmatprep.subr.mxu0 %v10609_v2 }
  0x2b   : > { %10998 = vst [vmem:[#allocation17_spill] sm:$0xff] %v7245_v59  ;;  %v934_v8 = vrot.slane %v7245_v59, 7  ;;  %v296_v9 = vcombine.high %v7081_v19, %v7081_v19  ;;  %v7264_v11 = vrot.slane %v206_v61, %v7073_v10  ;;  %v1090_v13 = vcombine.low %v1082_v58, %v1089_v62 }
  0x2c   : > { %10999 = vst [vmem:[#allocation18_spill] sm:$0xff] %v7252_v1  ;;  %11000 = vst [vmem:[#allocation19_spill] sm:$0xff] %v7258_v7  ;;  %v7270_v14 = vsel %vm7113_vm8, %v5797_v57, %v925_v3  ;;  %v927_v16 = vrot.slane %v925_v3, 2  ;;  %v930_v17 = vrot.slane %v928_v4, 2  ;;  %v931_v23 = vrot.slane %v7252_v1, 7 }
  0x2d   : > { %11001 = vst [vmem:[#allocation20_spill] sm:$0xff] %v7270_v14  ;;  %v7274_v25 = vrot.slane %v296_v9, %v7073_v10  ;;  %v313_v26 = vcombine.high %v206_v61, %v206_v61  ;;  %v7278_v19 = vcombine.high %v7264_v11, %v7264_v11  ;;  %6306 = vmatmul.mubr.msk.f32.gmra.mrb[2].mxu0 %vm1473_vm9, %v1090_v13  ;;  %v780_v39 = vrot.slane %v7264_v11, 7 }
  0x2e   : > { %v7283_v31 = vsel %vm7113_vm8, %v927_v16, %v928_v4  ;;  %v7290_v44 = vsel %vm7113_vm8, %v930_v17, %v931_v23  ;;  %v933_v45 = vrot.slane %v931_v23, 2  ;;  %6308 = vmatprep.mubr.msk.f32.mxu0 %vm7017_vm3, %v10609_v2  ;;  %v7304_v54 = vcombine.high %v7245_v59, %v7245_v59 }
  0x2f   : > { %11002 = vst [vmem:[#allocation21_spill] sm:$0xff] %v7283_v31  ;;  %11003 = vst [vmem:[#allocation22_spill] sm:$0xff] %v7290_v44  ;;  %v1295_v46 = vcombine.low %v7270_v14, %v7283_v31  ;;  %v7298_v48 = vcombine.high %v7274_v25, %v7274_v25  ;;  %v774_v37 = vrot.slane %v7274_v25, 7  ;;  %v782_v49 = vrot.slane %v780_v39, 2 }
  0x30   : > { %v783_v53 = vrot.slane %v7278_v19, 7  ;;  %11004 = vst [vmem:[#allocation23_spill] sm:$0xff] %v7304_v54  ;;  %v7308_v55 = vsel %vm7113_vm8, %v933_v45, %v934_v8  ;;  %v7316_v61 = vrot.slane %v7286_v40, %v7073_v10  ;;  %v7336_v17 = vcombine.high %v7258_v7, %v7258_v7 }
  0x31   : > { %11005 = vst [vmem:[#allocation24_spill] sm:$0xff] %v7308_v55  ;;  %v7311_v57 = vrot.slane %v1295_v46, %v7073_v10  ;;  %v777_v58 = vrot.slane %v7298_v48, 7  ;;  %v1296_v62 = vcombine.low %v7290_v44, %v7308_v55  ;;  %v7322_v3 = vsel %vm7113_vm8, %v773_v32, %v774_v37 }
  0x32   : > { %11007 = vst [vmem:[#allocation26_spill] sm:$0xff] %v7316_v61  ;;  %11008 = vst [vmem:[#allocation27_spill] sm:$0xff] %v7322_v3  ;;  %v776_v4 = vrot.slane %v774_v37, 2  ;;  %v7326_v9 = vsel %vm7113_vm8, %v782_v49, %v783_v53  ;;  %v7332_v16 = vcombine.high %v7316_v61, %v7316_v61  ;;  %v936_v45 = vrot.slane %v934_v8, 2 }
  0x33   : > { %11006 = vst [vmem:[#allocation25_spill] sm:$0xff] %v7311_v57  ;;  %11009 = vst [vmem:[#allocation28_spill] sm:$0xff] %v7326_v9  ;;  %v779_v12 = vrot.slane %v777_v58, 2  ;;  %v7339_v23 = vrot.slane %v1296_v62, %v7073_v10  ;;  %v937_v46 = vrot.slane %v7304_v54, 7  ;;  %v7347_v37 = vrot.slane %v313_v26, %v7073_v10  ;;  %v180_v54 = vld [vmem:[%s7065_s19 + $0x48] sm:$0xff] }
  0x34   : > { %11010 = vst [vmem:[#allocation29_spill] sm:$0xff] %v7332_v16  ;;  %11011 = vst [vmem:[#allocation30_spill] sm:$0xff] %v7336_v17  ;;  %v7343_v32 = vsel %vm7113_vm8, %v776_v4, %v777_v58  ;;  %v940_v62 = vrot.slane %v7258_v7, 7  ;;  %v943_v21 = vrot.slane %v7336_v17, 7  ;;  %v947_v58 = vrot.slane %v7332_v16, 7 }
  0x35   : > { %11012 = vst [vmem:[#allocation31_spill] sm:$0xff] %v7339_v23  ;;  %11013 = vst [vmem:[#allocation32_spill] sm:$0xff] %v7343_v32  ;;  %v7351_v49 = vsel %vm7113_vm8, %v779_v12, %v780_v39  ;;  %v1091_v13 = vcombine.low %v7322_v3, %v7343_v32  ;;  %v1311_v50 = vcombine.low %v7311_v57, %v7339_v23  ;;  %v175_v39 = vld [vmem:[%s7065_s19 + $0x20] sm:$0xff]  ;;  %v939_v12 = vrot.slane %v937_v46, 2 }
  0x36   : > { %11014 = vst [vmem:[#allocation33_spill] sm:$0xff] %v7351_v49  ;;  %v1092_v8 = vcombine.low %v7351_v49, %v7326_v9  ;;  %v7364_v26 = vsel %vm7113_vm8, %v936_v45, %v937_v46  ;;  %v942_v2 = vrot.slane %v940_v62, 2  ;;  %v5798_v57 = vrot.slane %v7316_v61, 9 }
  0x37   : > { %11015 = vst [vmem:[#allocation34_spill] sm:$0xff] %v7364_v26  ;;  %v1099_v4 = vrot.slane %v1091_v13, %v7073_v10  ;;  %6345 = vmatmul.mubr.msk.f32.gmra.mrb[2].mxu1 %vm1473_vm9, %v1311_v50  ;;  %v7377_v45 = vsel %vm7113_vm8, %v939_v12, %v940_v62  ;;  %v207_v46 = vmax.f32 %v175_v39, 0.0  ;;  %v7385_v50 = vcombine.high %v7347_v37, %v7347_v37 }
  0x38   : > { %v1106_v23 = vrot.slane %v1092_v8, %v7073_v10  ;;  %6347 = vmatprep.mubr.msk.f32.mxu1 %vm7017_vm3, %v11016_v18  ;;  %11017 = vst [vmem:[#allocation35_spill] sm:$0xff] %v7377_v45  ;;  %v7381_v13 = vsel %vm7113_vm8, %v942_v2, %v943_v21  ;;  %v190_v8 = vld [vmem:[%s7065_s19 + $0x98] sm:$0xff]  ;;  %v7390_v55 = vsel %vm7113_vm8, %v5798_v57, %v947_v58  ;;  %v785_v62 = vrot.slane %v783_v53, 2 }
  0x39   : > { %11018 = vst [vmem:[#allocation36_spill] sm:$0xff] %v7381_v13  ;;  %11019 = vst [vmem:[#allocation37_spill] sm:$0xff] %v7390_v55  ;;  %v1312_v31 = vcombine.low %v7364_v26, %v7377_v45  ;;  %v1313_v12 = vcombine.low %v7381_v13, %v7390_v55  ;;  %v329_v2 = vcombine.high %v207_v46, %v207_v46  ;;  %v786_v39 = vrot.slane %v7347_v37, 7 }
  0x3a   : > { %v1107_v17 = vcombine.low %v1099_v4, %v1106_v23  ;;  %v7397_v21 = vrot.slane %v207_v46, %v7073_v10  ;;  %v789_v57 = vrot.slane %v7385_v50, 7  ;;  %v222_v4 = vmax.f32 %v190_v8, 0.0 }
  0x3b   : > { %v7402_v23 = vrot.slane %v1312_v31, %v7073_v10  ;;  %v560_v53 = vcombine.high %v7286_v40, %v7286_v40  ;;  %v7408_v55 = vrot.slane %v1313_v12, %v7073_v10  ;;  %v7413_v46 = vrot.slane %v329_v2, %v7073_v10 }
  0x3c   : > { %6309 = vmatmul.mubr.msk.f32.gmra.mrb[4].mxu0 %vm1473_vm9, %v1107_v17  ;;  %v7417_v31 = vcombine.high %v7397_v21, %v7397_v21  ;;  %v7421_v17 = vsel %vm7113_vm8, %v785_v62, %v786_v39  ;;  %v788_v8 = vrot.slane %v786_v39, 2  ;;  %v5791_v40 = vrot.slane %v7397_v21, 9 }
  0x3d   : > { %11020 = vst [vmem:[#allocation38_spill] sm:$0xff] %v7402_v23  ;;  %11021 = vst [vmem:[#allocation39_spill] sm:$0xff] %v7408_v55  ;;  %6311 = vmatprep.mubr.msk.f32.mxu0 %vm7017_vm3, %v11016_v18  ;;  %v7425_v12 = vrot.slane %v560_v53, %v7073_v10  ;;  %v577_v45 = vcombine.high %v222_v4, %v222_v4  ;;  %v1328_v13 = vcombine.low %v7402_v23, %v7408_v55 }
  0x3e   : > { %11022 = vst [vmem:[#allocation40_spill] sm:$0xff] %v7421_v17  ;;  %v793_v2 = vrot.slane %v7417_v31, 7  ;;  %v796_v26 = vrot.slane %v7413_v46, 7  ;;  %v7432_v44 = vrot.slane %v222_v4, %v7073_v10  ;;  %v7437_v62 = vsel %vm7113_vm8, %v788_v8, %v789_v57 }
  0x3f   : > { %11023 = vst [vmem:[#allocation41_spill] sm:$0xff] %v7425_v12  ;;  %11025 = vst [vmem:[#allocation43_spill] sm:$0xff] %v7437_v62  ;;  %v7441_v39 = vcombine.high %v7425_v12, %v7425_v12  ;;  %v7444_v53 = vrot.slane %v577_v45, %v7073_v10  ;;  %v949_v55 = vrot.slane %v947_v58, 2  ;;  %6348 = vmatmul.mubr.msk.f32.gmra.mrb[4].mxu1 %vm1473_vm9, %v1328_v13  ;;  %v950_v45 = vrot.slane %v7425_v12, 7  ;;  %v178_v12 = vld [vmem:[%s7065_s19 + $0x38] sm:$0xff] }
  0x40   : > { %11024 = vst [vmem:[#allocation42_spill] sm:$0xff] %v7432_v44  ;;  %v7449_v23 = vsel %vm7113_vm8, %v5791_v40, %v793_v2  ;;  %v795_v4 = vrot.slane %v793_v2, 2  ;;  %v1108_v14 = vcombine.low %v7421_v17, %v7437_v62  ;;  %v7455_v57 = vcombine.high %v7432_v44, %v7432_v44  ;;  %6350 = vmatprep.mubr.msk.f32.mxu1 %vm7017_vm3, %v11016_v18 }
  0x41   : > { %11026 = vst [vmem:[#allocation44_spill] sm:$0xff] %v7441_v39  ;;  %11027 = vst [vmem:[#allocation45_spill] sm:$0xff] %v7444_v53  ;;  %v953_v58 = vrot.slane %v7441_v39, 7  ;;  %v956_v13 = vrot.slane %v7432_v44, 7  ;;  %v208_v8 = vmax.f32 %v176_v6, 0.0  ;;  %v7470_v60 = vcombine.high %v7413_v46, %v7413_v46  ;;  %v177_v39 = vld [vmem:[%s7065_s19 + $0x30] sm:$0xff] }
  0x42   : > { %11028 = vst [vmem:[#allocation46_spill] sm:$0xff] %v7449_v23  ;;  %11029 = vst [vmem:[#allocation47_spill] sm:$0xff] %v7455_v57  ;;  %v7464_v40 = vsel %vm7113_vm8, %v795_v4, %v796_v26  ;;  %v1116_v2 = vrot.slane %v1108_v14, %v7073_v10  ;;  %v959_v51 = vrot.slane %v7455_v57, 7  ;;  %v7476_v62 = vsel %vm7113_vm8, %v949_v55, %v950_v45 }
  0x43   : > { %11030 = vst [vmem:[#allocation48_spill] sm:$0xff] %v7464_v40  ;;  %v1109_v5 = vcombine.low %v7449_v23, %v7464_v40  ;;  %11031 = vst [vmem:[#allocation49_spill] sm:$0xff] %v7476_v62  ;;  %v952_v6 = vrot.slane %v950_v45, 2  ;;  %v955_v9 = vrot.slane %v953_v58, 2  ;;  %v958_v4 = vrot.slane %v956_v13, 2 }
  0x44   : > { %v346_v17 = vcombine.high %v208_v8, %v208_v8  ;;  %v7479_v14 = vrot.slane %v208_v8, %v7073_v10  ;;  %v798_v49 = vrot.slane %v796_v26, 2  ;;  %v799_v55 = vrot.slane %v7470_v60, 7  ;;  %v191_v8 = vld [vmem:[%s7065_s19 + $0xa0] sm:$0xff] }
  0x45   : > { %v7482_v32 = vrot.slane %v1109_v5, %v7073_v10  ;;  %v7486_v3 = vsel %vm7113_vm8, %v952_v6, %v953_v58  ;;  %v7490_v40 = vsel %vm7113_vm8, %v955_v9, %v956_v13  ;;  %v7495_v45 = vsel %vm7113_vm8, %v958_v4, %v959_v51 }
  0x46   : > { %11033 = vst [vmem:[#allocation51_spill] sm:$0xff] %v7486_v3  ;;  %11034 = vst [vmem:[#allocation52_spill] sm:$0xff] %v7490_v40  ;;  %v1329_v26 = vcombine.low %v7476_v62, %v7486_v3  ;;  %v7500_v5 = vrot.slane %v346_v17, %v7073_v10  ;;  %v7504_v58 = vcombine.high %v7479_v14, %v7479_v14  ;;  %v801_v4 = vrot.slane %v799_v55, 2 }
  0x47   : > { %11032 = vst [vmem:[#allocation50_spill] sm:$0xff] %v7482_v32  ;;  %11035 = vst [vmem:[#allocation53_spill] sm:$0xff] %v7495_v45  ;;  %v1124_v9 = vcombine.low %v1116_v2, %v7482_v32  ;;  %v1330_v13 = vcombine.low %v7490_v40, %v7495_v45  ;;  %v7512_v6 = vsel %vm7113_vm8, %v798_v49, %v799_v55  ;;  %v802_v17 = vrot.slane %v7479_v14, 7 }
  0x48   : > { %11036 = vst [vmem:[#allocation54_spill] sm:$0xff] %v7500_v5  ;;  %11037 = vst [vmem:[#allocation55_spill] sm:$0xff] %v7512_v6  ;;  %v7515_v3 = vrot.slane %v1329_v26, %v7073_v10  ;;  %v805_v62 = vrot.slane %v7504_v58, 7  ;;  %v808_v23 = vrot.slane %v7500_v5, 7  ;;  %v223_v45 = vmax.f32 %v191_v8, 0.0 }
  0x49   : > { %6312 = vmatmul.mubr.msk.f32.gmra.mrb[6].mxu0 %vm1473_vm9, %v1124_v9  ;;  %v7522_v2 = vrot.slane %v1330_v13, %v7073_v10  ;;  %v7526_v49 = vcombine.high %v7444_v53, %v7444_v53  ;;  %v961_v55 = vrot.slane %v959_v51, 2  ;;  %v7532_v26 = vsel %vm7113_vm8, %v801_v4, %v802_v17 }
  0x4a   : > { %11038 = vst [vmem:[#allocation56_spill] sm:$0xff] %v7515_v3  ;;  %6314 = vmatprep.mubr.msk.f32.mxu0 %vm7017_vm3, %v11016_v18  ;;  %11041 = vst [vmem:[#allocation59_spill] sm:$0xff] %v7532_v26  ;;  %v804_v40 = vrot.slane %v802_v17, 2  ;;  %v807_v52 = vrot.slane %v805_v62, 2  ;;  %v962_v9 = vrot.slane %v7444_v53, 7  ;;  %v1125_v8 = vcombine.low %v7512_v6, %v7532_v26 }
  0x4b   : > { %11039 = vst [vmem:[#allocation57_spill] sm:$0xff] %v7522_v2  ;;  %11040 = vst [vmem:[#allocation58_spill] sm:$0xff] %v7526_v49  ;;  %v1345_v13 = vcombine.low %v7515_v3, %v7522_v2  ;;  %v593_v57 = vcombine.high %v223_v45, %v223_v45  ;;  %v7540_v51 = vrot.slane %v223_v45, %v7073_v10 }
  0x4c   : > { %v7545_v44 = vsel %vm7113_vm8, %v804_v40, %v805_v62  ;;  %v7549_v4 = vsel %vm7113_vm8, %v807_v52, %v808_v23  ;;  %v7553_v17 = vsel %vm7113_vm8, %v961_v55, %v962_v9  ;;  %v964_v2 = vrot.slane %v962_v9, 2 }
  0x4d   : > { %11042 = vst [vmem:[#allocation60_spill] sm:$0xff] %v7540_v51  ;;  %11043 = vst [vmem:[#allocation61_spill] sm:$0xff] %v7545_v44  ;;  %6351 = vmatmul.mubr.msk.f32.gmra.mrb[6].mxu1 %vm1473_vm9, %v1345_v13  ;;  %v1126_v45 = vcombine.low %v7545_v44, %v7549_v4  ;;  %v7559_v3 = vrot.slane %v1125_v8, %v7073_v10  ;;  %v7562_v62 = vrot.slane %v593_v57, %v7073_v10 }
  0x4e   : > { %11044 = vst [vmem:[#allocation62_spill] sm:$0xff] %v7549_v4  ;;  %11045 = vst [vmem:[#allocation63_spill] sm:$0xff] %v7553_v17  ;;  %v7566_v52 = vcombine.high %v7540_v51, %v7540_v51  ;;  %6353 = vmatprep.mubr.msk.f32.mxu1 %vm7017_vm3, %v11016_v18  ;;  %v965_v40 = vrot.slane %v7526_v49, 7  ;;  %v5799_v55 = vrot.slane %v7540_v51, 9  ;;  %v209_v9 = vmax.f32 %v177_v39, 0.0  ;;  %v192_v51 = vld [vmem:[%s7065_s19 + $0xa8] sm:$0xff] }
  0x4f   : > { %11046 = vst [vmem:[#allocation64_spill] sm:$0xff] %v7559_v3  ;;  %11047 = vst [vmem:[#allocation65_spill] sm:$0xff] %v7562_v62  ;;  %v7574_v13 = vcombine.high %v7500_v5, %v7500_v5  ;;  %v7577_v8 = vrot.slane %v1126_v45, %v7073_v10  ;;  %v972_v26 = vrot.slane %v7562_v62, 7  ;;  %v810_v49 = vrot.slane %v808_v23, 2 }
  0x50   : > { %11048 = vst [vmem:[#allocation66_spill] sm:$0xff] %v7566_v52  ;;  %v969_v4 = vrot.slane %v7566_v52, 7  ;;  %v7585_v44 = vsel %vm7113_vm8, %v964_v2, %v965_v40  ;;  %v362_v6 = vcombine.high %v209_v9, %v209_v9  ;;  %v7588_v39 = vrot.slane %v209_v9, %v7073_v10 }
  0x51   : > { %11049 = vst [vmem:[#allocation67_spill] sm:$0xff] %v7574_v13  ;;  %11050 = vst [vmem:[#allocation68_spill] sm:$0xff] %v7577_v8  ;;  %v1141_v45 = vcombine.low %v7559_v3, %v7577_v8  ;;  %v1346_v52 = vcombine.low %v7553_v17, %v7585_v44  ;;  %v811_v23 = vrot.slane %v7574_v13, 7  ;;  %v224_v8 = vmax.f32 %v192_v51, 0.0 }
  0x52   : > { %11051 = vst [vmem:[#allocation69_spill] sm:$0xff] %v7585_v44  ;;  %v7595_v57 = vsel %vm7113_vm8, %v5799_v55, %v969_v4  ;;  %v971_v32 = vrot.slane %v969_v4, 2  ;;  %v7600_v2 = vrot.slane %v362_v6, %v7073_v10  ;;  %v7604_v40 = vcombine.high %v7588_v39, %v7588_v39 }
  0x53   : > { %11052 = vst [vmem:[#allocation70_spill] sm:$0xff] %v7595_v57  ;;  %v5792_v9 = vrot.slane %v7588_v39, 9  ;;  %6315 = vmatmul.mubr.msk.f32.gmra.mrb[8].mxu0 %vm1473_vm9, %v1141_v45  ;;  %v7614_v4 = vrot.slane %v1346_v52, %v7073_v10  ;;  %v7618_v6 = vcombine.high %v7562_v62, %v7562_v62  ;;  %v610_v13 = vcombine.high %v224_v8, %v224_v8 }
  0x54   : > { %v7611_v55 = vsel %vm7113_vm8, %v971_v32, %v972_v26  ;;  %6317 = vmatprep.mubr.msk.f32.mxu0 %vm7017_vm3, %v11016_v18  ;;  %v7626_v45 = vcombine.high %v7600_v2, %v7600_v2  ;;  %v7630_v32 = vsel %vm7113_vm8, %v810_v49, %v811_v23  ;;  %v815_v51 = vrot.slane %v7604_v40, 7 }
  0x55   : > { %11053 = vst [vmem:[#allocation71_spill] sm:$0xff] %v7611_v55  ;;  %11054 = vst [vmem:[#allocation72_spill] sm:$0xff] %v7614_v4  ;;  %v1347_v3 = vcombine.low %v7595_v57, %v7611_v55  ;;  %v818_v52 = vrot.slane %v7600_v2, 7  ;;  %v7635_v55 = vrot.slane %v224_v8, %v7073_v10  ;;  %v974_v44 = vrot.slane %v972_v26, 2 }
  0x56   : > { %11055 = vst [vmem:[#allocation73_spill] sm:$0xff] %v7618_v6  ;;  %11056 = vst [vmem:[#allocation74_spill] sm:$0xff] %v7630_v32  ;;  %v7642_v17 = vsel %vm7113_vm8, %v5792_v9, %v815_v51  ;;  %v817_v49 = vrot.slane %v815_v51, 2  ;;  %v821_v23 = vrot.slane %v7626_v45, 7  ;;  %v7648_v16 = vrot.slane %v610_v13, %v7073_v10 }
  0x57   : > { %11057 = vst [vmem:[#allocation75_spill] sm:$0xff] %v7635_v55  ;;  %v7638_v57 = vrot.slane %v1347_v3, %v7073_v10  ;;  %11059 = vst [vmem:[#allocation77_spill] sm:$0xff] %v7642_v17  ;;  %v820_v62 = vrot.slane %v818_v52, 2  ;;  %v1142_v53 = vcombine.low %v7630_v32, %v7642_v17  ;;  %v7652_v26 = vcombine.high %v7635_v55, %v7635_v55  ;;  %v193_v17 = vld [vmem:[%s7065_s19 + $0xb0] sm:$0xff] }
  0x58   : > { %11060 = vst [vmem:[#allocation78_spill] sm:$0xff] %v7648_v16  ;;  %v7658_v8 = vsel %vm7113_vm8, %v817_v49, %v818_v52  ;;  %v975_v9 = vrot.slane %v7618_v6, 7  ;;  %v978_v51 = vrot.slane %v7635_v55, 7  ;;  %v823_v6 = vrot.slane %v821_v23, 2 }
  0x59   : > { %11058 = vst [vmem:[#allocation76_spill] sm:$0xff] %v7638_v57  ;;  %11061 = vst [vmem:[#allocation79_spill] sm:$0xff] %v7652_v26  ;;  %v1362_v3 = vcombine.low %v7614_v4, %v7638_v57  ;;  %v7666_v13 = vsel %vm7113_vm8, %v820_v62, %v821_v23  ;;  %v7669_v32 = vrot.slane %v1142_v53, %v7073_v10  ;;  %v981_v43 = vrot.slane %v7652_v26, 7 }
  0x5a   : > { %11062 = vst [vmem:[#allocation80_spill] sm:$0xff] %v7658_v8  ;;  %11063 = vst [vmem:[#allocation81_spill] sm:$0xff] %v7666_v13  ;;  %v984_v57 = vrot.slane %v7648_v16, 7  ;;  %v1143_v52 = vcombine.low %v7658_v8, %v7666_v13  ;;  %v7678_v49 = vsel %vm7113_vm8, %v974_v44, %v975_v9  ;;  %v977_v4 = vrot.slane %v975_v9, 2  ;;  %v179_v8 = vld [vmem:[%s7065_s19 + $0x40] sm:$0xff] }
  0x5b   : > { %11064 = vst [vmem:[#allocation82_spill] sm:$0xff] %v7669_v32  ;;  %6354 = vmatmul.mubr.msk.f32.gmra.mrb[8].mxu1 %vm1473_vm9, %v1362_v3  ;;  %11065 = vst [vmem:[#allocation83_spill] sm:$0xff] %v7678_v49  ;;  %v980_v55 = vrot.slane %v978_v51, 2  ;;  %v983_v53 = vrot.slane %v981_v43, 2  ;;  %v210_v62 = vmax.f32 %v178_v12, 0.0  ;;  %v225_v26 = vmax.f32 %v193_v17, 0.0 }
  0x5c   : > { %6356 = vmatprep.mubr.msk.f32.mxu1 %vm7017_vm3, %v11016_v18  ;;  %v7683_v7 = vrot.slane %v1143_v52, %v7073_v10  ;;  %v7687_v3 = vsel %vm7113_vm8, %v977_v4, %v978_v51  ;;  %v7695_v9 = vcombine.high %v7648_v16, %v7648_v16 }
  0x5d   : > { %11067 = vst [vmem:[#allocation85_spill] sm:$0xff] %v7687_v3  ;;  %v7691_v44 = vsel %vm7113_vm8, %v980_v55, %v981_v43  ;;  %v7699_v12 = vsel %vm7113_vm8, %v983_v53, %v984_v57  ;;  %v1363_v17 = vcombine.low %v7678_v49, %v7687_v3  ;;  %v379_v23 = vcombine.high %v210_v62, %v210_v62 }
  0x5e   : > { %11066 = vst [vmem:[#allocation84_spill] sm:$0xff] %v7683_v7  ;;  %11068 = vst [vmem:[#allocation86_spill] sm:$0xff] %v7691_v44  ;;  %v7704_v52 = vrot.slane %v210_v62, %v7073_v10  ;;  %v1158_v4 = vcombine.low %v7669_v32, %v7683_v7  ;;  %v1364_v43 = vcombine.low %v7691_v44, %v7699_v12  ;;  %v987_v49 = vrot.slane %v7695_v9, 7 }
  0x5f   : > { %11069 = vst [vmem:[#allocation87_spill] sm:$0xff] %v7695_v9  ;;  %11070 = vst [vmem:[#allocation88_spill] sm:$0xff] %v7699_v12  ;;  %v626_v55 = vcombine.high %v225_v26, %v225_v26  ;;  %v7711_v51 = vrot.slane %v225_v26, %v7073_v10  ;;  %v7714_v53 = vrot.slane %v1363_v17, %v7073_v10 }
  0x60   : > { %v7717_v13 = vrot.slane %v379_v23, %v7073_v10  ;;  %v7721_v62 = vcombine.high %v7704_v52, %v7704_v52  ;;  %v824_v7 = vrot.slane %v7704_v52, 7  ;;  %6318 = vmatmul.mubr.msk.f32.gmra.mrb[10].mxu0 %vm1473_vm9, %v1158_v4  ;;  %v7726_v32 = vrot.slane %v1364_v43, %v7073_v10 }
  0x61   : > { %11071 = vst [vmem:[#allocation89_spill] sm:$0xff] %v7711_v51  ;;  %11072 = vst [vmem:[#allocation90_spill] sm:$0xff] %v7714_v53  ;;  %v7729_v26 = vrot.slane %v626_v55, %v7073_v10  ;;  %v7733_v17 = vcombine.high %v7711_v51, %v7711_v51  ;;  %v986_v23 = vrot.slane %v984_v57, 2  ;;  %6320 = vmatprep.mubr.msk.f32.mxu0 %vm7017_vm3, %v11016_v18  ;;  %v5800_v61 = vrot.slane %v7711_v51, 9 }
  0x62   : > { %11073 = vst [vmem:[#allocation91_spill] sm:$0xff] %v7726_v32  ;;  %v7739_v12 = vcombine.high %v7717_v13, %v7717_v13  ;;  %v7743_v4 = vsel %vm7113_vm8, %v823_v6, %v824_v7  ;;  %v826_v43 = vrot.slane %v824_v7, 2  ;;  %v827_v55 = vrot.slane %v7721_v62, 7 }
  0x63   : > { %11074 = vst [vmem:[#allocation92_spill] sm:$0xff] %v7729_v26  ;;  %11075 = vst [vmem:[#allocation93_spill] sm:$0xff] %v7733_v17  ;;  %v1379_v3 = vcombine.low %v7714_v53, %v7726_v32  ;;  %v830_v57 = vrot.slane %v7717_v13, 7  ;;  %v7751_v44 = vcombine.high %v7729_v26, %v7729_v26  ;;  %v7766_v9 = vsel %vm7113_vm8, %v986_v23, %v987_v49 }
  0x64   : > { %11076 = vst [vmem:[#allocation94_spill] sm:$0xff] %v7743_v4  ;;  %v7757_v6 = vsel %vm7113_vm8, %v826_v43, %v827_v55  ;;  %v829_v7 = vrot.slane %v827_v55, 2  ;;  %v833_v16 = vrot.slane %v7739_v12, 7  ;;  %11079 = vst [vmem:[#allocation97_spill] sm:$0xff] %v7766_v9  ;;  %v991_v59 = vrot.slane %v7733_v17, 7 }
  0x65   : > { %11077 = vst [vmem:[#allocation95_spill] sm:$0xff] %v7751_v44  ;;  %11078 = vst [vmem:[#allocation96_spill] sm:$0xff] %v7757_v6  ;;  %6357 = vmatmul.mubr.msk.f32.gmra.mrb[10].mxu1 %vm1473_vm9, %v1379_v3  ;;  %v832_v32 = vrot.slane %v830_v57, 2  ;;  %v1159_v53 = vcombine.low %v7743_v4, %v7757_v6  ;;  %v994_v3 = vrot.slane %v7729_v26, 7  ;;  %v997_v55 = vrot.slane %v7751_v44, 7  ;;  %v194_v6 = vld [vmem:[%s7065_s19 + $0xb8] sm:$0xff] }
  0x66   : > { %6359 = vmatprep.mubr.msk.f32.mxu1 %vm7017_vm3, %v11016_v18  ;;  %v7774_v43 = vsel %vm7113_vm8, %v829_v7, %v830_v57  ;;  %v211_v51 = vmax.f32 %v179_v8, 0.0  ;;  %v7788_v4 = vsel %vm7113_vm8, %v5800_v61, %v991_v59  ;;  %v993_v17 = vrot.slane %v991_v59, 2 }
  0x67   : > { %11080 = vst [vmem:[#allocation98_spill] sm:$0xff] %v7774_v43  ;;  %v7781_v49 = vsel %vm7113_vm8, %v832_v32, %v833_v16  ;;  %v7784_v23 = vrot.slane %v1159_v53, %v7073_v10  ;;  %11083 = vst [vmem:[#allocation101_spill] sm:$0xff] %v7788_v4  ;;  %v996_v7 = vrot.slane %v994_v3, 2  ;;  %v1380_v8 = vcombine.low %v7766_v9, %v7788_v4  ;;  %v181_v9 = vld [vmem:[%s7065_s19 + $0x50] sm:$0xff] }
  0x68   : > { %11081 = vst [vmem:[#allocation99_spill] sm:$0xff] %v7781_v49  ;;  %v1160_v57 = vcombine.low %v7774_v43, %v7781_v49  ;;  %v212_v44 = vmax.f32 %v180_v54, 0.0  ;;  %v7796_v16 = vsel %vm7113_vm8, %v993_v17, %v994_v3  ;;  %v395_v32 = vcombine.high %v211_v51, %v211_v51 }
  0x69   : > { %11082 = vst [vmem:[#allocation100_spill] sm:$0xff] %v7784_v23  ;;  %11084 = vst [vmem:[#allocation102_spill] sm:$0xff] %v7796_v16  ;;  %v7799_v53 = vrot.slane %v211_v51, %v7073_v10  ;;  %v226_v26 = vmax.f32 %v194_v6, 0.0  ;;  %v7806_v59 = vsel %vm7113_vm8, %v996_v7, %v997_v55  ;;  %v7809_v49 = vrot.slane %v1380_v8, %v7073_v10 }
  0x6a   : > { %v7802_v61 = vrot.slane %v1160_v57, %v7073_v10  ;;  %11086 = vst [vmem:[#allocation104_spill] sm:$0xff] %v7806_v59  ;;  %v412_v54 = vcombine.high %v212_v44, %v212_v44  ;;  %v1381_v17 = vcombine.low %v7796_v16, %v7806_v59  ;;  %v7814_v3 = vrot.slane %v395_v32, %v7073_v10 }
  0x6b   : > { %11087 = vst [vmem:[#allocation105_spill] sm:$0xff] %v7809_v49  ;;  %v7818_v51 = vcombine.high %v7799_v53, %v7799_v53  ;;  %v7821_v6 = vrot.slane %v212_v44, %v7073_v10  ;;  %v5793_v8 = vrot.slane %v7799_v53, 9  ;;  %v643_v59 = vcombine.high %v226_v26, %v226_v26 }
  0x6c   : > { %11085 = vst [vmem:[#allocation103_spill] sm:$0xff] %v7802_v61  ;;  %v1175_v57 = vcombine.low %v7784_v23, %v7802_v61  ;;  %v7826_v7 = vrot.slane %v412_v54, %v7073_v10  ;;  %v7830_v32 = vrot.slane %v1381_v17, %v7073_v10  ;;  %v7834_v4 = vcombine.high %v7814_v3, %v7814_v3 }
  0x6d   : > { %11088 = vst [vmem:[#allocation106_spill] sm:$0xff] %v7821_v6  ;;  %v837_v16 = vrot.slane %v7818_v51, 7  ;;  %v840_v44 = vrot.slane %v7814_v3, 7  ;;  %v846_v61 = vrot.slane %v7821_v6, 7  ;;  %v7841_v54 = vrot.slane %v226_v26, %v7073_v10 }
  0x6e   : > { %11089 = vst [vmem:[#allocation107_spill] sm:$0xff] %v7826_v7  ;;  %11090 = vst [vmem:[#allocation108_spill] sm:$0xff] %v7830_v32  ;;  %6321 = vmatmul.mubr.msk.f32.gmra.mrb[12].mxu0 %vm1473_vm9, %v1175_v57  ;;  %v7844_v23 = vrot.slane %v643_v59, %v7073_v10  ;;  %v999_v17 = vrot.slane %v997_v55, 2  ;;  %v1396_v43 = vcombine.low %v7809_v49, %v7830_v32  ;;  %v843_v26 = vrot.slane %v7834_v4, 7 }
  0x6f   : > { %11091 = vst [vmem:[#allocation109_spill] sm:$0xff] %v7841_v54  ;;  %6323 = vmatprep.mubr.msk.f32.mxu0 %vm7017_vm3, %v11016_v18  ;;  %v7853_v20 = vsel %vm7113_vm8, %v5793_v8, %v837_v16  ;;  %v839_v57 = vrot.slane %v837_v16, 2  ;;  %v842_v1 = vrot.slane %v840_v44, 2  ;;  %v7858_v59 = vcombine.high %v7841_v54, %v7841_v54 }
  0x70   : > { %11092 = vst [vmem:[#allocation110_spill] sm:$0xff] %v7844_v23  ;;  %11093 = vst [vmem:[#allocation111_spill] sm:$0xff] %v7853_v20  ;;  %v7862_v55 = vcombine.high %v7844_v23, %v7844_v23  ;;  %v1000_v32 = vrot.slane %v7841_v54, 7  ;;  %6360 = vmatmul.mubr.msk.f32.gmra.mrb[12].mxu1 %vm1473_vm9, %v1396_v43  ;;  %v1006_v16 = vrot.slane %v7844_v23, 7  ;;  %v7871_v49 = vmax.f32 %v181_v9, 0.0 }
  0x71   : > { %11094 = vst [vmem:[#allocation112_spill] sm:$0xff] %v7858_v59  ;;  %v7868_v8 = vsel %vm7113_vm8, %v839_v57, %v840_v44  ;;  %v7875_v47 = vcombine.high %v7821_v6, %v7821_v6  ;;  %6362 = vmatprep.mubr.msk.f32.mxu1 %vm7017_vm3, %v11016_v18  ;;  %v7881_v54 = vsel %vm7113_vm8, %v842_v1, %v843_v26  ;;  %v845_v43 = vrot.slane %v843_v26, 2  ;;  %v182_v6 = vld [vmem:[%s7065_s19 + $0x58] sm:$0xff] }
  0x72   : > { %11095 = vst [vmem:[#allocation113_spill] sm:$0xff] %v7862_v55  ;;  %11096 = vst [vmem:[#allocation114_spill] sm:$0xff] %v7868_v8  ;;  %v1176_v44 = vcombine.low %v7853_v20, %v7868_v8  ;;  %v7887_v57 = vsel %vm7113_vm8, %v999_v17, %v1000_v32  ;;  %v1002_v9 = vrot.slane %v1000_v32, 2  ;;  %v1003_v23 = vrot.slane %v7858_v59, 7 }
  0x73   : > { %11097 = vst [vmem:[#allocation115_spill] sm:$0xff] %v7875_v47  ;;  %11098 = vst [vmem:[#allocation116_spill] sm:$0xff] %v7881_v54  ;;  %v1008_v56 = vrot.slane %v1006_v16, 2  ;;  %v1009_v36 = vrot.slane %v7862_v55, 7  ;;  %v7893_v35 = vsel %vm7113_vm8, %v845_v43, %v846_v61  ;;  %v7900_v26 = vrot.slane %v7871_v49, %v7073_v10 }
  0x74   : > { %11099 = vst [vmem:[#allocation117_spill] sm:$0xff] %v7887_v57  ;;  %11100 = vst [vmem:[#allocation118_spill] sm:$0xff] %v7893_v35  ;;  %v7896_v1 = vrot.slane %v1176_v44, %v7073_v10  ;;  %v7904_v32 = vcombine.high %v7826_v7, %v7826_v7  ;;  %v1177_v17 = vcombine.low %v7881_v54, %v7893_v35  ;;  %v1005_v8 = vrot.slane %v1003_v23, 2 }
  0x75   : > { %11102 = vst [vmem:[#allocation120_spill] sm:$0xff] %v7900_v26  ;;  %v7910_v43 = vsel %vm7113_vm8, %v1002_v9, %v1003_v23  ;;  %v7914_v44 = vsel %vm7113_vm8, %v1008_v56, %v1009_v36  ;;  %v7920_v55 = vcombine.high %v7900_v26, %v7900_v26  ;;  %v848_v59 = vrot.slane %v846_v61, 2  ;;  %v195_v9 = vld [vmem:[%s7065_s19 + $0xc0] sm:$0xff] }
  0x76   : > { %11101 = vst [vmem:[#allocation119_spill] sm:$0xff] %v7896_v1  ;;  %11103 = vst [vmem:[#allocation121_spill] sm:$0xff] %v7904_v32  ;;  %v1397_v20 = vcombine.low %v7887_v57, %v7910_v43  ;;  %v849_v35 = vrot.slane %v7875_v47, 7  ;;  %v7924_v54 = vrot.slane %v1177_v17, %v7073_v10  ;;  %v7928_v23 = vsel %vm7113_vm8, %v1005_v8, %v1006_v16 }
  0x77   : > { %11104 = vst [vmem:[#allocation122_spill] sm:$0xff] %v7910_v43  ;;  %11105 = vst [vmem:[#allocation123_spill] sm:$0xff] %v7914_v44  ;;  %v852_v36 = vrot.slane %v7826_v7, 7  ;;  %v855_v56 = vrot.slane %v7904_v32, 7  ;;  %v196_v43 = vld [vmem:[%s7065_s19 + $0xc8] sm:$0xff]  ;;  %v1398_v57 = vcombine.low %v7928_v23, %v7914_v44  ;;  %v5794_v32 = vrot.slane %v7900_v26, 9 }
  0x78   : > { %11106 = vst [vmem:[#allocation124_spill] sm:$0xff] %v7920_v55  ;;  %11107 = vst [vmem:[#allocation125_spill] sm:$0xff] %v7924_v54  ;;  %v7937_v61 = vrot.slane %v1397_v20, %v7073_v10  ;;  %v7941_v17 = vsel %vm7113_vm8, %v848_v59, %v849_v35  ;;  %v851_v27 = vrot.slane %v849_v35, 2  ;;  %v1192_v8 = vcombine.low %v7896_v1, %v7924_v54 }
  0x79   : > { %11108 = vst [vmem:[#allocation126_spill] sm:$0xff] %v7928_v23  ;;  %11110 = vst [vmem:[#allocation128_spill] sm:$0xff] %v7941_v17  ;;  %v854_v16 = vrot.slane %v852_v36, 2  ;;  %v859_v7 = vrot.slane %v7920_v55, 7  ;;  %v7949_v47 = vrot.slane %v1398_v57, %v7073_v10  ;;  %v227_v44 = vmax.f32 %v195_v9, 0.0 }
  0x7a   : > { %11109 = vst [vmem:[#allocation127_spill] sm:$0xff] %v7937_v61  ;;  %v7953_v20 = vsel %vm7113_vm8, %v851_v27, %v852_v36  ;;  %v228_v59 = vmax.f32 %v196_v43, 0.0  ;;  %6324 = vmatmul.mubr.msk.f32.gmra.mrb[14].mxu0 %vm1473_vm9, %v1192_v8  ;;  %v214_v1 = vmax.f32 %v182_v6, 0.0  ;;  %v428_v6 = vcombine.high %v7871_v49, %v7871_v49 }
  0x7b   : > { %11111 = vst [vmem:[#allocation129_spill] sm:$0xff] %v7949_v47  ;;  %11112 = vst [vmem:[#allocation130_spill] sm:$0xff] %v7953_v20  ;;  %v7958_v35 = vsel %vm7113_vm8, %v854_v16, %v855_v56  ;;  %v7962_v54 = vsel %vm7113_vm8, %v5794_v32, %v859_v7  ;;  %v1193_v57 = vcombine.low %v7941_v17, %v7953_v20  ;;  %6326 = vmatprep.mubr.msk.f32.mxu0 %vm7017_vm3, %v11016_v18 }
  0x7c   : > { %11113 = vst [vmem:[#allocation131_spill] sm:$0xff] %v7958_v35  ;;  %11114 = vst [vmem:[#allocation132_spill] sm:$0xff] %v7962_v54  ;;  %v1413_v27 = vcombine.low %v7937_v61, %v7949_v47  ;;  %v1194_v43 = vcombine.low %v7958_v35, %v7962_v54  ;;  %v659_v36 = vcombine.high %v227_v44, %v227_v44  ;;  %v861_v35 = vrot.slane %v859_v7, 2 }
  0x7d   : > { %v7973_v56 = vrot.slane %v227_v44, %v7073_v10  ;;  %v7976_v32 = vrot.slane %v1193_v57, %v7073_v10  ;;  %v676_v9 = vcombine.high %v228_v59, %v228_v59  ;;  %v7979_v8 = vrot.slane %v228_v59, %v7073_v10 }
  0x7e   : > { %6363 = vmatmul.mubr.msk.f32.gmra.mrb[14].mxu1 %vm1473_vm9, %v1413_v27  ;;  %v7985_v16 = vrot.slane %v1194_v43, %v7073_v10  ;;  %v7988_v47 = vrot.slane %v659_v36, %v7073_v10  ;;  %v8002_v27 = vrot.slane %v428_v6, %v7073_v10  ;;  %v445_v43 = vcombine.high %v214_v1, %v214_v1 }
  0x7f   : > { %11115 = vst [vmem:[#allocation133_spill] sm:$0xff] %v7973_v56  ;;  %11116 = vst [vmem:[#allocation134_spill] sm:$0xff] %v7976_v32  ;;  %v7992_v44 = vcombine.high %v7973_v56, %v7973_v56  ;;  %v5801_v57 = vrot.slane %v7973_v56, 9  ;;  %6365 = vmatprep.mubr.msk.f32.mxu1 %vm7017_vm3, %v11016_v18  ;;  %v7998_v49 = vrot.slane %v676_v9, %v7073_v10  ;;  %v1022_v59 = vrot.slane %v7979_v8, 7 }
  0x80   : > { %11117 = vst [vmem:[#allocation135_spill] sm:$0xff] %v7979_v8  ;;  %11118 = vst [vmem:[#allocation136_spill] sm:$0xff] %v7985_v16  ;;  %v1209_v36 = vcombine.low %v7976_v32, %v7985_v16  ;;  %v8008_v61 = vcombine.high %v7988_v47, %v7988_v47  ;;  %v1016_v54 = vrot.slane %v7988_v47, 7  ;;  %v8014_v9 = vcombine.high %v8002_v27, %v8002_v27  ;;  %v197_v16 = vld [vmem:[%s7065_s19 + $0xd0] sm:$0xff] }
  0x81   : > { %11119 = vst [vmem:[#allocation137_spill] sm:$0xff] %v7988_v47  ;;  %11120 = vst [vmem:[#allocation138_spill] sm:$0xff] %v7992_v44  ;;  %v1013_v23 = vrot.slane %v7992_v44, 7  ;;  %v8017_v20 = vrot.slane %v214_v1, %v7073_v10  ;;  %v8020_v6 = vrot.slane %v445_v43, %v7073_v10  ;;  %v862_v7 = vrot.slane %v8002_v27, 7 }
  0x82   : > { %11121 = vst [vmem:[#allocation139_spill] sm:$0xff] %v7998_v49  ;;  %11122 = vst [vmem:[#allocation140_spill] sm:$0xff] %v8002_v27  ;;  %6327 = vmatmul.mubr.msk.f32.gmra.mrb[16].mxu0 %vm1473_vm9, %v1209_v36  ;;  %v1018_v47 = vrot.slane %v1016_v54, 2  ;;  %v1019_v56 = vrot.slane %v8008_v61, 7  ;;  %v865_v43 = vrot.slane %v8014_v9, 7  ;;  %v229_v44 = vmax.f32 %v197_v16, 0.0 }
  0x83   : > { %11123 = vst [vmem:[#allocation141_spill] sm:$0xff] %v8008_v61  ;;  %11124 = vst [vmem:[#allocation142_spill] sm:$0xff] %v8014_v9  ;;  %v8026_v32 = vsel %vm7113_vm8, %v5801_v57, %v1013_v23  ;;  %v1015_v17 = vrot.slane %v1013_v23, 2  ;;  %6329 = vmatprep.mubr.msk.f32.mxu0 %vm7017_vm3, %v11016_v18  ;;  %v8033_v1 = vcombine.high %v8017_v20, %v8017_v20  ;;  %v868_v36 = vrot.slane %v8017_v20, 7 }
  0x84   : > { %11125 = vst [vmem:[#allocation143_spill] sm:$0xff] %v8017_v20  ;;  %11126 = vst [vmem:[#allocation144_spill] sm:$0xff] %v8026_v32  ;;  %v8044_v23 = vsel %vm7113_vm8, %v1018_v47, %v1019_v56  ;;  %v1021_v61 = vrot.slane %v1019_v56, 2  ;;  %v8050_v27 = vsel %vm7113_vm8, %v861_v35, %v862_v7  ;;  %v864_v26 = vrot.slane %v862_v7, 2 }
  0x85   : > { %11127 = vst [vmem:[#allocation145_spill] sm:$0xff] %v8033_v1  ;;  %v8040_v57 = vsel %vm7113_vm8, %v1015_v17, %v1016_v54  ;;  %11129 = vst [vmem:[#allocation147_spill] sm:$0xff] %v8044_v23  ;;  %v867_v9 = vrot.slane %v865_v43, 2  ;;  %v870_v54 = vrot.slane %v868_v36, 2  ;;  %v871_v47 = vrot.slane %v8033_v1, 7 }
  0x86   : > { %11128 = vst [vmem:[#allocation146_spill] sm:$0xff] %v8040_v57  ;;  %v1414_v55 = vcombine.low %v8026_v32, %v8040_v57  ;;  %11130 = vst [vmem:[#allocation148_spill] sm:$0xff] %v8050_v27  ;;  %v8054_v20 = vsel %vm7113_vm8, %v1021_v61, %v1022_v59  ;;  %v8059_v17 = vcombine.high %v7979_v8, %v7979_v8 }
  0x87   : > { %11131 = vst [vmem:[#allocation149_spill] sm:$0xff] %v8054_v20  ;;  %v1415_v56 = vcombine.low %v8044_v23, %v8054_v20  ;;  %v8068_v16 = vsel %vm7113_vm8, %v864_v26, %v865_v43  ;;  %v8072_v61 = vsel %vm7113_vm8, %v867_v9, %v868_v36  ;;  %v8076_v7 = vsel %vm7113_vm8, %v870_v54, %v871_v47  ;;  %v183_v54 = vld [vmem:[%s7065_s19 + $0x60] sm:$0xff] }
  0x88   : > { %11132 = vst [vmem:[#allocation150_spill] sm:$0xff] %v8059_v17  ;;  %v8064_v35 = vrot.slane %v1414_v55, %v7073_v10  ;;  %11134 = vst [vmem:[#allocation152_spill] sm:$0xff] %v8068_v16  ;;  %v1210_v57 = vcombine.low %v8050_v27, %v8068_v16  ;;  %v8081_v20 = vrot.slane %v229_v44, %v7073_v10  ;;  %v1024_v43 = vrot.slane %v1022_v59, 2 }
  0x89   : > { %11135 = vst [vmem:[#allocation153_spill] sm:$0xff] %v8072_v61  ;;  %11136 = vst [vmem:[#allocation154_spill] sm:$0xff] %v8076_v7  ;;  %v8085_v55 = vcombine.high %v7998_v49, %v7998_v49  ;;  %v8088_v26 = vrot.slane %v1415_v56, %v7073_v10  ;;  %v1211_v9 = vcombine.low %v8072_v61, %v8076_v7  ;;  %v1025_v36 = vrot.slane %v8059_v17, 7 }
  0x8a   : > { %11133 = vst [vmem:[#allocation151_spill] sm:$0xff] %v8064_v35  ;;  %11137 = vst [vmem:[#allocation155_spill] sm:$0xff] %v8081_v20  ;;  %v8095_v23 = vrot.slane %v1210_v57, %v7073_v10  ;;  %v8099_v32 = vcombine.high %v8081_v20, %v8081_v20  ;;  %v1028_v16 = vrot.slane %v7998_v49, 7  ;;  %v5802_v8 = vrot.slane %v8081_v20, 9 }
  0x8b   : > { %11138 = vst [vmem:[#allocation156_spill] sm:$0xff] %v8085_v55  ;;  %11139 = vst [vmem:[#allocation157_spill] sm:$0xff] %v8088_v26  ;;  %v1031_v56 = vrot.slane %v8085_v55, 7  ;;  %v1430_v27 = vcombine.low %v8064_v35, %v8088_v26  ;;  %v8106_v59 = vrot.slane %v1211_v9, %v7073_v10  ;;  %v8110_v7 = vsel %vm7113_vm8, %v1024_v43, %v1025_v36  ;;  %v198_v26 = vld [vmem:[%s7065_s19 + $0xd8] sm:$0xff] }
  0x8c   : > { %11140 = vst [vmem:[#allocation158_spill] sm:$0xff] %v8095_v23  ;;  %11141 = vst [vmem:[#allocation159_spill] sm:$0xff] %v8099_v32  ;;  %v1027_v57 = vrot.slane %v1025_v36, 2  ;;  %v1030_v61 = vrot.slane %v1028_v16, 2  ;;  %v1035_v17 = vrot.slane %v8099_v32, 7  ;;  %v215_v1 = vmax.f32 %v183_v54, 0.0 }
  0x8d   : > { %11142 = vst [vmem:[#allocation160_spill] sm:$0xff] %v8106_v59  ;;  %11143 = vst [vmem:[#allocation161_spill] sm:$0xff] %v8110_v7  ;;  %6366 = vmatmul.mubr.msk.f32.gmra.mrb[16].mxu1 %vm1473_vm9, %v1430_v27  ;;  %v1226_v55 = vcombine.low %v8095_v23, %v8106_v59  ;;  %v8123_v43 = vcombine.high %v8020_v6, %v8020_v6  ;;  %v873_v36 = vrot.slane %v871_v47, 2  ;;  %v874_v59 = vrot.slane %v8020_v6, 7 }
  0x8e   : > { %v8119_v9 = vsel %vm7113_vm8, %v1027_v57, %v1028_v16  ;;  %6368 = vmatprep.mubr.msk.f32.mxu1 %vm7017_vm3, %v11016_v18  ;;  %v8130_v54 = vsel %vm7113_vm8, %v1030_v61, %v1031_v56  ;;  %v8134_v27 = vsel %vm7113_vm8, %v5802_v8, %v1035_v17  ;;  %v461_v57 = vcombine.high %v215_v1, %v215_v1 }
  0x8f   : > { %11144 = vst [vmem:[#allocation162_spill] sm:$0xff] %v8119_v9  ;;  %11145 = vst [vmem:[#allocation163_spill] sm:$0xff] %v8123_v43  ;;  %v1431_v16 = vcombine.low %v8110_v7, %v8119_v9  ;;  %6330 = vmatmul.mubr.msk.f32.gmra.mrb[18].mxu0 %vm1473_vm9, %v1226_v55  ;;  %v1432_v47 = vcombine.low %v8130_v54, %v8134_v27  ;;  %v8142_v35 = vrot.slane %v215_v1, %v7073_v10 }
  0x90   : > { %11146 = vst [vmem:[#allocation164_spill] sm:$0xff] %v8130_v54  ;;  %11147 = vst [vmem:[#allocation165_spill] sm:$0xff] %v8134_v27  ;;  %v877_v61 = vrot.slane %v8123_v43, 7  ;;  %6332 = vmatprep.mubr.msk.f32.mxu0 %vm7017_vm3, %v11016_v18  ;;  %v8152_v8 = vrot.slane %v461_v57, %v7073_v10  ;;  %v230_v55 = vmax.f32 %v198_v26, 0.0  ;;  %v692_v23 = vcombine.high %v229_v44, %v229_v44 }
  0x91   : > { %11148 = vst [vmem:[#allocation166_spill] sm:$0xff] %v8142_v35  ;;  %v8147_v56 = vrot.slane %v1431_v16, %v7073_v10  ;;  %v8155_v27 = vrot.slane %v1432_v47, %v7073_v10  ;;  %v8159_v1 = vcombine.high %v8142_v35, %v8142_v35  ;;  %v8163_v16 = vsel %vm7113_vm8, %v873_v36, %v874_v59 }
  0x92   : > { %11151 = vst [vmem:[#allocation169_spill] sm:$0xff] %v8163_v16  ;;  %v876_v9 = vrot.slane %v874_v59, 2  ;;  %v5795_v54 = vrot.slane %v8142_v35, 9  ;;  %v884_v7 = vrot.slane %v8152_v8, 7  ;;  %v8168_v57 = vrot.slane %v692_v23, %v7073_v10  ;;  %v184_v59 = vld [vmem:[%s7065_s19 + $0x68] sm:$0xff] }
  0x93   : > { %11149 = vst [vmem:[#allocation167_spill] sm:$0xff] %v8147_v56  ;;  %11150 = vst [vmem:[#allocation168_spill] sm:$0xff] %v8155_v27  ;;  %v709_v44 = vcombine.high %v230_v55, %v230_v55  ;;  %v1447_v26 = vcombine.low %v8147_v56, %v8155_v27  ;;  %v881_v32 = vrot.slane %v8159_v1, 7  ;;  %v8178_v36 = vrot.slane %v230_v55, %v7073_v10 }
  0x94   : > { %11152 = vst [vmem:[#allocation170_spill] sm:$0xff] %v8168_v57  ;;  %v8174_v47 = vsel %vm7113_vm8, %v876_v9, %v877_v61  ;;  %v8185_v23 = vcombine.high %v8168_v57, %v8168_v57  ;;  %v1037_v27 = vrot.slane %v1035_v17, 2  ;;  %v1038_v56 = vrot.slane %v8168_v57, 7 }
  0x95   : > { %11153 = vst [vmem:[#allocation171_spill] sm:$0xff] %v8174_v47  ;;  %11154 = vst [vmem:[#allocation172_spill] sm:$0xff] %v8178_v36  ;;  %v1227_v49 = vcombine.low %v8163_v16, %v8174_v47  ;;  %v8188_v20 = vrot.slane %v709_v44, %v7073_v10  ;;  %6369 = vmatmul.mubr.msk.f32.gmra.mrb[18].mxu1 %vm1473_vm9, %v1447_v26  ;;  %v8193_v9 = vsel %vm7113_vm8, %v5795_v54, %v881_v32 }
  0x96   : > { %11155 = vst [vmem:[#allocation173_spill] sm:$0xff] %v8185_v23  ;;  %11157 = vst [vmem:[#allocation175_spill] sm:$0xff] %v8193_v9  ;;  %v883_v61 = vrot.slane %v881_v32, 2  ;;  %v8197_v55 = vcombine.high %v8178_v36, %v8178_v36  ;;  %6371 = vmatprep.mubr.msk.f32.mxu1 %vm7017_vm3, %v11016_v18  ;;  %v1041_v17 = vrot.slane %v8185_v23, 7  ;;  %v1044_v26 = vrot.slane %v8178_v36, 7 }
  0x97   : > { %11156 = vst [vmem:[#allocation174_spill] sm:$0xff] %v8188_v20  ;;  %v8203_v44 = vrot.slane %v1227_v49, %v7073_v10  ;;  %v216_v47 = vmax.f32 %v184_v59, 0.0  ;;  %v8213_v54 = vsel %vm7113_vm8, %v1037_v27, %v1038_v56  ;;  %v1040_v16 = vrot.slane %v1038_v56, 2 }
  0x98   : > { %11158 = vst [vmem:[#allocation176_spill] sm:$0xff] %v8197_v55  ;;  %v8209_v32 = vsel %vm7113_vm8, %v883_v61, %v884_v7  ;;  %11161 = vst [vmem:[#allocation179_spill] sm:$0xff] %v8213_v54  ;;  %v1047_v57 = vrot.slane %v8197_v55, 7  ;;  %v1043_v43 = vrot.slane %v1041_v17, 2  ;;  %v1046_v35 = vrot.slane %v1044_v26, 2 }
  0x99   : > { %11159 = vst [vmem:[#allocation177_spill] sm:$0xff] %v8203_v44  ;;  %11160 = vst [vmem:[#allocation178_spill] sm:$0xff] %v8209_v32  ;;  %v1228_v49 = vcombine.low %v8193_v9, %v8209_v32  ;;  %v8220_v23 = vcombine.high %v8152_v8, %v8152_v8  ;;  %v8224_v59 = vsel %vm7113_vm8, %v1040_v16, %v1041_v17  ;;  %v886_v56 = vrot.slane %v884_v7, 2 }
  0x9a   : > { %11162 = vst [vmem:[#allocation180_spill] sm:$0xff] %v8224_v59  ;;  %v478_v61 = vcombine.high %v216_v47, %v216_v47  ;;  %v8227_v27 = vrot.slane %v216_v47, %v7073_v10  ;;  %v8234_v32 = vsel %vm7113_vm8, %v1043_v43, %v1044_v26  ;;  %v8238_v9 = vsel %vm7113_vm8, %v1046_v35, %v1047_v57 }
  0x9b   : > { %v8230_v55 = vrot.slane %v1228_v49, %v7073_v10  ;;  %11165 = vst [vmem:[#allocation183_spill] sm:$0xff] %v8234_v32  ;;  %11166 = vst [vmem:[#allocation184_spill] sm:$0xff] %v8238_v9  ;;  %v1448_v16 = vcombine.low %v8213_v54, %v8224_v59  ;;  %v1449_v17 = vcombine.low %v8234_v32, %v8238_v9  ;;  %v887_v43 = vrot.slane %v8220_v23, 7 }
  0x9c   : > { %11163 = vst [vmem:[#allocation181_spill] sm:$0xff] %v8227_v27  ;;  %v8245_v47 = vrot.slane %v478_v61, %v7073_v10  ;;  %v8249_v7 = vcombine.high %v8227_v27, %v8227_v27  ;;  %v890_v49 = vrot.slane %v8227_v27, 7  ;;  %v8260_v9 = vcombine.high %v8188_v20, %v8188_v20 }
  0x9d   : > { %11164 = vst [vmem:[#allocation182_spill] sm:$0xff] %v8230_v55  ;;  %v1243_v26 = vcombine.low %v8203_v44, %v8230_v55  ;;  %v8255_v35 = vrot.slane %v1448_v16, %v7073_v10  ;;  %v8263_v61 = vrot.slane %v1449_v17, %v7073_v10  ;;  %v8267_v59 = vsel %vm7113_vm8, %v886_v56, %v887_v43 }
  0x9e   : > { %11167 = vst [vmem:[#allocation185_spill] sm:$0xff] %v8245_v47  ;;  %11169 = vst [vmem:[#allocation187_spill] sm:$0xff] %v8260_v9  ;;  %v889_v32 = vrot.slane %v887_v43, 2  ;;  %v893_v54 = vrot.slane %v8249_v7, 7  ;;  %v892_v16 = vrot.slane %v890_v49, 2  ;;  %v896_v55 = vrot.slane %v8245_v47, 7 }
  0x9f   : > { %11168 = vst [vmem:[#allocation186_spill] sm:$0xff] %v8255_v35  ;;  %11170 = vst [vmem:[#allocation188_spill] sm:$0xff] %v8263_v61  ;;  %6333 = vmatmul.mubr.msk.f32.gmra.mrb[20].mxu0 %vm1473_vm9, %v1243_v26  ;;  %v1049_v44 = vrot.slane %v1047_v57, 2  ;;  %v1050_v36 = vrot.slane %v8188_v20, 7  ;;  %v1464_v27 = vcombine.low %v8255_v35, %v8263_v61  ;;  %v1053_v43 = vrot.slane %v8260_v9, 7 }
  0xa0   : > { %11171 = vst [vmem:[#allocation189_spill] sm:$0xff] %v8267_v59  ;;  %6335 = vmatprep.mubr.msk.f32.mxu0 %vm7017_vm3, %v11016_v18  ;;  %v8279_v56 = vsel %vm7113_vm8, %v889_v32, %v890_v49  ;;  %v895_v17 = vrot.slane %v893_v54, 2  ;;  %v8284_v26 = vsel %vm7113_vm8, %v892_v16, %v893_v54  ;;  %v8299_v49 = vrot.slane %v7077_v15, %v7073_v10 }
  0xa1   : > { %11172 = vst [vmem:[#allocation190_spill] sm:$0xff] %v8279_v56  ;;  %11173 = vst [vmem:[#allocation191_spill] sm:$0xff] %v8284_v26  ;;  %v1244_v57 = vcombine.low %v8267_v59, %v8279_v56  ;;  %v8290_v61 = vsel %vm7113_vm8, %v1049_v44, %v1050_v36  ;;  %v1052_v35 = vrot.slane %v1050_v36, 2  ;;  %6372 = vmatmul.mubr.msk.f32.gmra.mrb[20].mxu1 %vm1473_vm9, %v1464_v27  ;;  %v898_v16 = vrot.slane %v896_v55, 2 }
  0xa2   : > { %11174 = vst [vmem:[#allocation192_spill] sm:$0xff] %v8290_v61  ;;  %v8295_v32 = vsel %vm7113_vm8, %v895_v17, %v896_v55  ;;  %v8303_v54 = vcombine.high %v8245_v47, %v8245_v47  ;;  %6374 = vmatprep.mubr.msk.f32.mxu1 %vm7017_vm3, %v11016_v18  ;;  %v906_v15 = vrot.slane %v7118_v34, 7  ;;  %v8321_v55 = vcombine.high %v8299_v49, %v8299_v49 }
  0xa3   : > { %11175 = vst [vmem:[#allocation193_spill] sm:$0xff] %v8295_v32  ;;  %v1245_v36 = vcombine.low %v8284_v26, %v8295_v32  ;;  %v8310_v44 = vrot.slane %v1244_v57, %v7073_v10  ;;  %v8314_v27 = vsel %vm7113_vm8, %v1052_v35, %v1053_v43  ;;  %v5796_v32 = vrot.slane %v8299_v49, 9 }
  0xa4   : > { %11176 = vst [vmem:[#allocation194_spill] sm:$0xff] %v8303_v54  ;;  %11178 = vst [vmem:[#allocation196_spill] sm:$0xff] %v8314_v27  ;;  %v1465_v17 = vcombine.low %v8290_v61, %v8314_v27  ;;  %v899_v56 = vrot.slane %v8303_v54, 7  ;;  %v908_v26 = vrot.slane %v906_v15, 2  ;;  %v1718_v35 = vcombine.low %v7086_v22, %v7108_v30 }
  0xa5   : > { %11177 = vst [vmem:[#allocation195_spill] sm:$0xff] %v8310_v44  ;;  %v8326_v57 = vrot.slane %v1245_v36, %v7073_v10  ;;  %v1719_v43 = vcombine.low %v7104_v29, %v7130_v38  ;;  %v903_v54 = vrot.slane %v8321_v55, 7  ;;  %v1735_v36 = vcombine.low %v7089_v24, %v7170_v63 }
  0xa6   : > { %v8333_v27 = vrot.slane %v1465_v17, %v7073_v10  ;;  %v8337_v61 = vsel %vm7113_vm8, %v898_v16, %v899_v56  ;;  %v11181_v22 = vrot.slane %v7139_v42, 7  ;;  %v1726_v17 = vrot.slane %v1718_v35, %v7073_v10 }
  0xa7   : > { %11179 = vst [vmem:[#allocation197_spill] sm:$0xff] %v8326_v57  ;;  %v1260_v59 = vcombine.low %v8310_v44, %v8326_v57  ;;  %v1733_v20 = vrot.slane %v1719_v43, %v7073_v10  ;;  %v8356_v56 = vsel %vm7113_vm8, %v5796_v32, %v903_v54  ;;  %v905_v16 = vrot.slane %v903_v54, 2 }
  0xa8   : > { %11180 = vst [vmem:[#allocation198_spill] sm:$0xff] %v8333_v27  ;;  %v8348_v9 = vsel %vm7113_vm8, %v908_v26, %v11181_v22  ;;  %6375 = vmatmul.mubr.msk.f32.gmra.mrb[22].mxu1 %vm1473_vm9, %v8333_v27  ;;  %11183 = vst [vmem:[#allocation200_spill] sm:$0xff] %v8356_v56  ;;  %v1736_v57 = vcombine.low %v7135_v41, %v7101_v28  ;;  %v1743_v44 = vrot.slane %v1735_v36, %v7073_v10 }
  0xa9   : > { %11182 = vst [vmem:[#allocation199_spill] sm:$0xff] %v8348_v9  ;;  %6336 = vmatmul.mubr.msk.f32.gmra.mrb[22].mxu0 %vm1473_vm9, %v1260_v59  ;;  %6379 = vmatprep.mubr.msk.f32.mxu1 %vm7017_vm3, %v11016_v18  ;;  %v1261_v26 = vcombine.low %v8337_v61, %v8356_v56  ;;  %v1734_v35 = vcombine.low %v1726_v17, %v1733_v20  ;;  %v5890_v59 = vld [vmem:[%s10605_s1 + $0xc] sm:$0xf] }
  0xaa   : > { %v2379_v43 = vcombine.low %v7108_v30, %v7104_v29  ;;  %6338 = vmatprep.mubr.msk.f32.mxu0 %vm7017_vm3, %v11016_v18  ;;  %v8372_v32 = vsel %vm7113_vm8, %v905_v16, %v906_v15  ;;  %v1750_v54 = vrot.slane %v1736_v57, %v7073_v10  ;;  %v2380_v36 = vcombine.low %v7130_v38, %v7089_v24 }
  0xab   : > { %11184 = vst [vmem:[#allocation201_spill] sm:$0xff] %v8372_v32  ;;  %v1752_v20 = vcombine.low %v7174_v0, %v7274_v25  ;;  %v1262_v29 = vcombine.low %v8372_v32, %v8348_v9  ;;  %v8385_v30 = vrot.slane %v1261_v26, %v7073_v10  ;;  %v1753_v22 = vcombine.low %v7298_v48, %v7264_v11 }
  0xac   : > { %v2387_v15 = vrot.slane %v2379_v43, %v7073_v10  ;;  %6380 = vmatmul.mubr.msk.f32.vlgmr.msra.gmra.mrb[24].mxu1 %vm1473_vm9, %v1734_v35  ;;  %v1751_v57 = vcombine.low %v1743_v44, %v1750_v54  ;;  %v2394_v17 = vrot.slane %v2380_v36, %v7073_v10  ;;  %v2396_v38 = vcombine.low %v7170_v63, %v7135_v41 }
  0xad   : > { %11185 = vst [vmem:[#allocation202_spill] sm:$0xff] %v8385_v30  ;;  %v1760_v24 = vrot.slane %v1752_v20, %v7073_v10  ;;  %v8396_v16 = vrot.slane %v1262_v29, %v7073_v10  ;;  %6532 = vmatpush3.msk.msra.mxu1 %vm1524_vm0, %v5890_v59  ;;  %6382 = vmatprep.mubr.msk.f32.mxu1 %vm7017_vm3, %v11016_v18 }
  0xae   : > { %v1767_v26 = vrot.slane %v1753_v22, %v7073_v10  ;;  %v5857_v44 = vcombine.high %v7135_v41, %v7101_v28  ;;  %v1769_v35 = vcombine.low %v7278_v19, %v7347_v37  ;;  %v1770_v43 = vcombine.low %v7397_v21, %v7417_v31  ;;  %6685 = vmatprep.subr.mxu1 %v11016_v18 }
  0xaf   : > { %11186 = vst [vmem:[#allocation203_spill] sm:$0xff] %v8396_v16  ;;  %v1277_v63 = vcombine.low %v8385_v30, %v8396_v16  ;;  %v2395_v59 = vcombine.low %v2387_v15, %v2394_v17  ;;  %v2404_v54 = vrot.slane %v2396_v38, %v7073_v10  ;;  %v2413_v15 = vcombine.low %v7274_v25, %v7298_v48  ;;  %v11201_v16 = vld [vmem:[#allocation142_spill] sm:$0xff] }
  0xb0   : > { %6383 = vmatmul.mubr.msk.f32.gmra.mrb[26].mxu1 %vm1473_vm9, %v1751_v57  ;;  %v8413_v36 = vcombine.low %v1760_v24, %v1767_v26  ;;  %v2411_v41 = vrot.slane %v5857_v44, %v7073_v10  ;;  %v8417_v20 = vrot.slane %v1769_v35, %v7073_v10  ;;  %v8420_v29 = vrot.slane %v1770_v43, %v7073_v10  ;;  %v5918_v24 = vld [vmem:[%s10605_s1 + $0x10] sm:$0xf] }
  0xb1   : > { %6339 = vmatmul.mubr.msk.f32.gmra.mrb[24].mxu0 %vm1473_vm9, %v1277_v63  ;;  %6385 = vmatprep.mubr.msk.f32.mxu1 %vm7017_vm3, %v11016_v18  ;;  %v2414_v22 = vcombine.low %v7264_v11, %v7278_v19  ;;  %v1786_v57 = vcombine.low %v7413_v46, %v7470_v60  ;;  %v1787_v17 = vcombine.low %v7479_v14, %v7504_v58 }
  0xb2   : > { %11187 = vst [vmem:[#allocation204_spill] sm:$0xff] %v8413_v36  ;;  %11188 = vst [vmem:[#allocation205_spill] sm:$0xff] %v8417_v20  ;;  %6456 = vmatprep.mubr.msk.f32.mxu0 %vm7017_vm3, %v11016_v18  ;;  %v2430_v25 = vcombine.low %v7347_v37, %v7385_v50  ;;  %v2431_v11 = vcombine.low %v7417_v31, %v7413_v46  ;;  %v1803_v19 = vcombine.low %v7500_v5, %v7588_v39  ;;  %v11199_v31 = vld [vmem:[#allocation106_spill] sm:$0xff] }
  0xb3   : > { %11189 = vst [vmem:[#allocation206_spill] sm:$0xff] %v8420_v29  ;;  %v8439_v38 = vrot.slane %v1786_v57, %v7073_v10  ;;  %v2412_v48 = vcombine.low %v2404_v54, %v2411_v41  ;;  %v1785_v26 = vcombine.low %v8417_v20, %v8420_v29  ;;  %v8452_v44 = vrot.slane %v1787_v17, %v7073_v10 }
  0xb4   : > { %6386 = vmatmul.mubr.msk.f32.gmra.mrb[28].mxu1 %vm1473_vm9, %v8413_v36  ;;  %v1804_v35 = vcombine.low %v7604_v40, %v7600_v2  ;;  %v8460_v50 = vrot.slane %v2413_v15, %v7073_v10  ;;  %v8463_v46 = vrot.slane %v2414_v22, %v7073_v10  ;;  %v2438_v43 = vrot.slane %v2430_v25, %v7073_v10  ;;  %v11255_v36 = vld [vmem:[#allocation42_spill] sm:$0xff] }
  0xb5   : > { %11190 = vst [vmem:[#allocation207_spill] sm:$0xff] %v8439_v38  ;;  %11191 = vst [vmem:[#allocation208_spill] sm:$0xff] %v8452_v44  ;;  %6457 = vmatmul.mubr.msk.f32.vlgmr.msra.gmra.mrb[26].mxu0 %vm1473_vm9, %v2395_v59  ;;  %6388 = vmatprep.mubr.msk.f32.mxu1 %vm7017_vm3, %v11016_v18  ;;  %v8472_v63 = vrot.slane %v2431_v11, %v7073_v10  ;;  %v8475_v59 = vrot.slane %v1803_v19, %v7073_v10 }
  0xb6   : > { %6609 = vmatpush3.msk.msra.mxu0 %vm1524_vm0, %v5918_v24  ;;  %6459 = vmatprep.mubr.msk.f32.mxu0 %vm7017_vm3, %v11016_v18  ;;  %v8478_v54 = vrot.slane %v1804_v35, %v7073_v10  ;;  %v8484_v41 = vcombine.low %v8439_v38, %v8452_v44  ;;  %v1820_v15 = vcombine.low %v7626_v45, %v7704_v52 }
  0xb7   : > { %11192 = vst [vmem:[#allocation209_spill] sm:$0xff] %v8475_v59  ;;  %6762 = vmatprep.subr.mxu0 %v11016_v18  ;;  %v1821_v22 = vcombine.low %v7721_v62, %v7717_v13  ;;  %v2429_v57 = vcombine.low %v8460_v50, %v8463_v46  ;;  %v2447_v17 = vcombine.low %v7470_v60, %v7479_v14 }
  0xb8   : > { %11193 = vst [vmem:[#allocation210_spill] sm:$0xff] %v8478_v54  ;;  %6389 = vmatmul.mubr.msk.f32.gmra.mrb[30].mxu1 %vm1473_vm9, %v1785_v26  ;;  %11194 = vst [vmem:[#allocation211_spill] sm:$0xff] %v8484_v41  ;;  %v2448_v24 = vcombine.low %v7504_v58, %v7500_v5  ;;  %v2446_v25 = vcombine.low %v2438_v43, %v8472_v63  ;;  %v1819_v11 = vcombine.low %v8475_v59, %v8478_v54  ;;  %v11211_v59 = vld [vmem:[#allocation124_spill] sm:$0xff]  ;;  %v11246_v54 = vld [vmem:[#allocation19_spill] sm:$0xff] }
  0xb9   : > { %6460 = vmatmul.mubr.msk.f32.gmra.mrb[28].mxu0 %vm1473_vm9, %v2412_v48  ;;  %6391 = vmatprep.mubr.msk.f32.mxu1 %vm7017_vm3, %v11016_v18  ;;  %v5858_v19 = vcombine.high %v7500_v5, %v7588_v39  ;;  %v8509_v48 = vrot.slane %v1820_v15, %v7073_v10  ;;  %v8512_v60 = vrot.slane %v1821_v22, %v7073_v10 }
  0xba   : > { %6462 = vmatprep.mubr.msk.f32.mxu0 %vm7017_vm3, %v11016_v18  ;;  %v1837_v14 = vcombine.low %v7799_v53, %v7818_v51  ;;  %v1838_v58 = vcombine.low %v7814_v3, %v7834_v4  ;;  %v8522_v26 = vrot.slane %v2447_v17, %v7073_v10  ;;  %v8525_v35 = vrot.slane %v2448_v24, %v7073_v10  ;;  %v11200_v17 = vld [vmem:[#allocation143_spill] sm:$0xff] }
  0xbb   : > { %11195 = vst [vmem:[#allocation212_spill] sm:$0xff] %v8509_v48  ;;  %11196 = vst [vmem:[#allocation213_spill] sm:$0xff] %v8512_v60  ;;  %v2465_v43 = vcombine.low %v7600_v2, %v7626_v45  ;;  %v2481_v15 = vcombine.low %v7704_v52, %v7721_v62  ;;  %v2482_v22 = vcombine.low %v7717_v13, %v7739_v12  ;;  %v11205_v62 = vld [vmem:[#allocation120_spill] sm:$0xff]  ;;  %v11206_v12 = vld [vmem:[#allocation107_spill] sm:$0xff] }
  0xbc   : > { %6392 = vmatmul.mubr.msk.f32.gmra.mrb[32].mxu1 %vm1473_vm9, %v8484_v41  ;;  %11197 = vst [vmem:[#allocation214_spill] sm:$0xff] %v8525_v35  ;;  %v1872_v30 = vcombine.low %v11201_v16, %v11200_v17  ;;  %v8542_v2 = vcombine.low %v8509_v48, %v8512_v60  ;;  %v8545_v45 = vrot.slane %v1837_v14, %v7073_v10  ;;  %v11210_v48 = vld [vmem:[#allocation140_spill] sm:$0xff] }
  0xbd   : > { %6463 = vmatmul.mubr.msk.f32.gmra.mrb[30].mxu0 %vm1473_vm9, %v2429_v57  ;;  %6394 = vmatprep.mubr.msk.f32.mxu1 %vm7017_vm3, %v11016_v18  ;;  %v11198_v57 = vld [vmem:[#allocation115_spill] sm:$0xff]  ;;  %v8548_v52 = vrot.slane %v1838_v58, %v7073_v10  ;;  %v1855_v24 = vcombine.low %v11206_v12, %v11205_v62  ;;  %v2463_v44 = vcombine.low %v8522_v26, %v8525_v35 }
  0xbe   : > { %6465 = vmatprep.mubr.msk.f32.mxu0 %vm7017_vm3, %v11016_v18  ;;  %v1854_v27 = vcombine.low %v11199_v31, %v11198_v57  ;;  %11202 = vst [vmem:[#allocation115_spill] sm:$0xff] %v8542_v2  ;;  %11203 = vst [vmem:[#allocation106_spill] sm:$0xff] %v8545_v45  ;;  %v8561_v14 = vrot.slane %v2465_v43, %v7073_v10  ;;  %v8566_v58 = vrot.slane %v2481_v15, %v7073_v10 }
  0xbf   : > { %11204 = vst [vmem:[#allocation143_spill] sm:$0xff] %v8548_v52  ;;  %v1871_v38 = vcombine.low %v11211_v59, %v11210_v48  ;;  %v8581_v43 = vrot.slane %v1855_v24, %v7073_v10  ;;  %v2498_v15 = vcombine.low %v7818_v51, %v7814_v3 }
  0xc0   : > { %6395 = vmatmul.mubr.msk.f32.gmra.mrb[34].mxu1 %vm1473_vm9, %v1819_v11  ;;  %v8558_v11 = vrot.slane %v5858_v19, %v7073_v10  ;;  %v8572_v60 = vrot.slane %v1854_v27, %v7073_v10  ;;  %v1853_v19 = vcombine.low %v8545_v45, %v8548_v52  ;;  %v2499_v45 = vcombine.low %v7834_v4, %v11199_v31 }
  0xc1   : > { %6466 = vmatmul.mubr.msk.f32.gmra.mrb[32].mxu0 %vm1473_vm9, %v2446_v25  ;;  %6397 = vmatprep.mubr.msk.f32.mxu1 %vm7017_vm3, %v11016_v18  ;;  %v8569_v25 = vrot.slane %v2482_v22, %v7073_v10  ;;  %11212 = vst [vmem:[#allocation140_spill] sm:$0xff] %v8581_v43  ;;  %v11213_v22 = vld [vmem:[#allocation145_spill] sm:$0xff]  ;;  %v8599_v51 = vrot.slane %v1871_v38, %v7073_v10  ;;  %v11217_v38 = vld [vmem:[#allocation166_spill] sm:$0xff] }
  0xc2   : > { %11207 = vst [vmem:[#allocation142_spill] sm:$0xff] %v8558_v11  ;;  %6468 = vmatprep.mubr.msk.f32.mxu0 %vm7017_vm3, %v11016_v18  ;;  %11209 = vst [vmem:[#allocation215_spill] sm:$0xff] %v8572_v60  ;;  %v2533_v29 = vcombine.low %v11200_v17, %v11213_v22  ;;  %v2480_v27 = vcombine.low %v8558_v11, %v8561_v14  ;;  %v2550_v17 = vcombine.low %v8159_v1, %v8152_v8  ;;  %v11221_v11 = vld [vmem:[#allocation181_spill] sm:$0xff] }
  0xc3   : > { %11208 = vst [vmem:[#allocation120_spill] sm:$0xff] %v8569_v25  ;;  %v2497_v3 = vcombine.low %v8566_v58, %v8569_v25  ;;  %11214 = vst [vmem:[#allocation124_spill] sm:$0xff] %v8599_v51  ;;  %v1870_v4 = vcombine.low %v8572_v60, %v8581_v43  ;;  %v8610_v31 = vrot.slane %v2498_v15, %v7073_v10  ;;  %v11234_v60 = vld [vmem:[#allocation5_spill] sm:$0xff] }
  0xc4   : > { %6398 = vmatmul.mubr.msk.f32.gmra.mrb[36].mxu1 %vm1473_vm9, %v8542_v2  ;;  %v1888_v24 = vcombine.low %v11213_v22, %v8020_v6  ;;  %v1889_v25 = vcombine.low %v11217_v38, %v8159_v1  ;;  %v5859_v15 = vcombine.high %v11206_v12, %v11205_v62  ;;  %v2532_v22 = vcombine.low %v11210_v48, %v11201_v16  ;;  %v11239_v2 = vld [vmem:[#allocation18_spill] sm:$0xff] }
  0xc5   : > { %6469 = vmatmul.mubr.msk.f32.gmra.mrb[34].mxu0 %vm1473_vm9, %v2463_v44  ;;  %6400 = vmatprep.mubr.msk.f32.mxu1 %vm7017_vm3, %v11016_v18  ;;  %v8602_v44 = vrot.slane %v1872_v30, %v7073_v10  ;;  %11216 = vst [vmem:[#allocation216_spill] sm:$0xff] %v8610_v31  ;;  %v8620_v30 = vrot.slane %v2499_v45, %v7073_v10 }
  0xc6   : > { %6471 = vmatprep.mubr.msk.f32.mxu0 %vm7017_vm3, %v11016_v18  ;;  %v8636_v45 = vrot.slane %v1888_v24, %v7073_v10  ;;  %v1906_v43 = vcombine.low %v11221_v11, %v8249_v7  ;;  %v8654_v48 = vrot.slane %v5859_v15, %v7073_v10 }
  0xc7   : > { %11215 = vst [vmem:[#allocation145_spill] sm:$0xff] %v8602_v44  ;;  %v8630_v1 = vcombine.low %v8599_v51, %v8602_v44  ;;  %v2514_v44 = vcombine.low %v8610_v31, %v8620_v30 }
  0xc8   : > { %6401 = vmatmul.mubr.msk.f32.gmra.mrb[38].mxu1 %vm1473_vm9, %v1853_v19  ;;  %v2515_v19 = vcombine.low %v11198_v57, %v11206_v12  ;;  %11219 = vst [vmem:[#allocation217_spill] sm:$0xff] %v8636_v45  ;;  %v8639_v57 = vrot.slane %v1889_v25, %v7073_v10  ;;  %11222 = vst [vmem:[#allocation181_spill] sm:$0xff] %v8654_v48  ;;  %v8662_v25 = vrot.slane %v2533_v29, %v7073_v10  ;;  %v11227_v29 = vld [vmem:[#allocation163_spill] sm:$0xff]  ;;  %v11245_v12 = vld [vmem:[#allocation26_spill] sm:$0xff] }
  0xc9   : > { %6472 = vmatmul.mubr.msk.f32.gmra.mrb[36].mxu0 %vm1473_vm9, %v2480_v27  ;;  %6403 = vmatprep.mubr.msk.f32.mxu1 %vm7017_vm3, %v11016_v18  ;;  %11218 = vst [vmem:[#allocation166_spill] sm:$0xff] %v8630_v1  ;;  %v1905_v27 = vcombine.low %v8152_v8, %v8220_v23  ;;  %v8659_v8 = vrot.slane %v2532_v22, %v7073_v10 }
  0xca   : > { %6474 = vmatprep.mubr.msk.f32.mxu0 %vm7017_vm3, %v11016_v18  ;;  %11220 = vst [vmem:[#allocation218_spill] sm:$0xff] %v8639_v57  ;;  %v8651_v16 = vrot.slane %v2515_v19, %v7073_v10  ;;  %11224 = vst [vmem:[#allocation220_spill] sm:$0xff] %v8662_v25  ;;  %v1904_v24 = vcombine.low %v8636_v45, %v8639_v57  ;;  %v8676_v15 = vrot.slane %v1906_v43, %v7073_v10 }
  0xcb   : > { %11223 = vst [vmem:[#allocation219_spill] sm:$0xff] %v8659_v8  ;;  %v8673_v19 = vrot.slane %v1905_v27, %v7073_v10  ;;  %v2549_v22 = vcombine.low %v8020_v6, %v11227_v29  ;;  %v2548_v27 = vcombine.low %v8659_v8, %v8662_v25  ;;  %v1974_v41 = vcombine.low %v11246_v54, %v11245_v12 }
  0xcc   : > { %6404 = vmatmul.mubr.msk.f32.gmra.mrb[40].mxu1 %vm1473_vm9, %v1870_v4  ;;  %v1923_v4 = vcombine.low %v8321_v55, %v7118_v34  ;;  %11226 = vst [vmem:[#allocation222_spill] sm:$0xff] %v8676_v15  ;;  %v2531_v51 = vcombine.low %v8651_v16, %v8654_v48  ;;  %v11232_v48 = vld [vmem:[#allocation2_spill] sm:$0xff] }
  0xcd   : > { %6475 = vmatmul.mubr.msk.f32.gmra.mrb[38].mxu0 %vm1473_vm9, %v2497_v3  ;;  %6406 = vmatprep.mubr.msk.f32.mxu1 %vm7017_vm3, %v11016_v18  ;;  %v1922_v3 = vcombine.low %v8245_v47, %v8299_v49  ;;  %11225 = vst [vmem:[#allocation221_spill] sm:$0xff] %v8673_v19  ;;  %v8701_v29 = vrot.slane %v2549_v22, %v7073_v10 }
  0xce   : > { %6477 = vmatprep.mubr.msk.f32.mxu0 %vm7017_vm3, %v11016_v18  ;;  %v8693_v57 = vrot.slane %v1923_v4, %v7073_v10  ;;  %v1939_v45 = vcombine.low %v7139_v42, %v11232_v48  ;;  %v2566_v4 = vcombine.low %v8220_v23, %v11221_v11  ;;  %v11237_v11 = vld [vmem:[#allocation16_spill] sm:$0xff] }
  0xcf   : > { %v8690_v43 = vrot.slane %v1922_v3, %v7073_v10  ;;  %11231 = vst [vmem:[#allocation225_spill] sm:$0xff] %v8701_v29  ;;  %v8711_v3 = vrot.slane %v2550_v17, %v7073_v10  ;;  %v11238_v17 = vld [vmem:[#allocation13_spill] sm:$0xff] }
  0xd0   : > { %6407 = vmatmul.mubr.msk.f32.gmra.mrb[42].mxu1 %vm1473_vm9, %v8630_v1  ;;  %11229 = vst [vmem:[#allocation223_spill] sm:$0xff] %v8693_v57  ;;  %v11233_v1 = vld [vmem:[#allocation4_spill] sm:$0xff]  ;;  %v8728_v23 = vrot.slane %v1939_v45, %v7073_v10 }
  0xd1   : > { %6478 = vmatmul.mubr.msk.f32.gmra.mrb[40].mxu0 %vm1473_vm9, %v2514_v44  ;;  %6409 = vmatprep.mubr.msk.f32.mxu1 %vm7017_vm3, %v11016_v18  ;;  %11228 = vst [vmem:[#allocation163_spill] sm:$0xff] %v8690_v43  ;;  %v8698_v44 = vcombine.low %v8673_v19, %v8676_v15  ;;  %v1940_v52 = vcombine.low %v11234_v60, %v11233_v1 }
  0xd2   : > { %6480 = vmatprep.mubr.msk.f32.mxu0 %vm7017_vm3, %v11016_v18  ;;  %v1938_v22 = vcombine.low %v8690_v43, %v8693_v57  ;;  %v2584_v15 = vcombine.low %v7118_v34, %v7139_v42  ;;  %11235 = vst [vmem:[#allocation2_spill] sm:$0xff] %v8728_v23  ;;  %v1956_v19 = vcombine.low %v11238_v17, %v11237_v11  ;;  %v11240_v43 = vld [vmem:[#allocation15_spill] sm:$0xff]  ;;  %v11273_v17 = vld [vmem:[#allocation65_spill] sm:$0xff] }
  0xd3   : > { %11230 = vst [vmem:[#allocation224_spill] sm:$0xff] %v8698_v44  ;;  %v1957_v57 = vcombine.low %v11240_v43, %v11239_v2  ;;  %v2565_v34 = vcombine.low %v8701_v29, %v8711_v3  ;;  %v8743_v42 = vrot.slane %v2566_v4, %v7073_v10  ;;  %v11244_v29 = vld [vmem:[#allocation17_spill] sm:$0xff] }
  0xd4   : > { %6410 = vmatmul.mubr.msk.f32.gmra.mrb[44].mxu1 %vm1473_vm9, %v1904_v24  ;;  %v2567_v24 = vcombine.low %v8249_v7, %v8245_v47  ;;  %v8731_v7 = vrot.slane %v1940_v52, %v7073_v10 }
  0xd5   : > { %6481 = vmatmul.mubr.msk.f32.gmra.mrb[42].mxu0 %vm1473_vm9, %v2531_v51  ;;  %6412 = vmatprep.mubr.msk.f32.mxu1 %vm7017_vm3, %v11016_v18  ;;  %v5860_v51 = vcombine.high %v8245_v47, %v8299_v49 }
  0xd6   : > { %6483 = vmatprep.mubr.msk.f32.mxu0 %vm7017_vm3, %v11016_v18  ;;  %11236 = vst [vmem:[#allocation5_spill] sm:$0xff] %v8731_v7  ;;  %v8746_v52 = vrot.slane %v2567_v24, %v7073_v10  ;;  %v8763_v4 = vcombine.low %v8728_v23, %v8731_v7  ;;  %v8766_v24 = vrot.slane %v1956_v19, %v7073_v10  ;;  %v11254_v23 = vld [vmem:[#allocation29_spill] sm:$0xff] }
  0xd7   : > { %v8751_v45 = vrot.slane %v5860_v51, %v7073_v10  ;;  %v8769_v51 = vrot.slane %v1957_v57, %v7073_v10 }
  0xd8   : > { %6413 = vmatmul.mubr.msk.f32.gmra.mrb[46].mxu1 %vm1473_vm9, %v8698_v44  ;;  %11241 = vst [vmem:[#allocation16_spill] sm:$0xff] %v8746_v52  ;;  %v11243_v44 = vld [vmem:[#allocation23_spill] sm:$0xff]  ;;  %11247 = vst [vmem:[#allocation15_spill] sm:$0xff] %v8763_v4  ;;  %v2582_v5 = vcombine.low %v8743_v42, %v8746_v52 }
  0xd9   : > { %6484 = vmatmul.mubr.msk.f32.gmra.mrb[44].mxu0 %vm1473_vm9, %v2548_v27  ;;  %6415 = vmatprep.mubr.msk.f32.mxu1 %vm7017_vm3, %v11016_v18  ;;  %11242 = vst [vmem:[#allocation18_spill] sm:$0xff] %v8751_v45  ;;  %v8754_v27 = vrot.slane %v2584_v15, %v7073_v10  ;;  %v1973_v47 = vcombine.low %v11244_v29, %v11243_v44  ;;  %11248 = vst [vmem:[#allocation23_spill] sm:$0xff] %v8766_v24 }
  0xda   : > { %6486 = vmatprep.mubr.msk.f32.mxu0 %vm7017_vm3, %v11016_v18  ;;  %11249 = vst [vmem:[#allocation17_spill] sm:$0xff] %v8769_v51  ;;  %v2600_v15 = vcombine.low %v11232_v48, %v11234_v60  ;;  %v8788_v60 = vrot.slane %v1974_v41, %v7073_v10  ;;  %v1972_v48 = vcombine.low %v8766_v24, %v8769_v51 }
  0xdb   : > { %v2599_v57 = vcombine.low %v8751_v45, %v8754_v27  ;;  %v8785_v19 = vrot.slane %v1973_v47, %v7073_v10  ;;  %v11256_v45 = vld [vmem:[#allocation44_spill] sm:$0xff]  ;;  %v2617_v41 = vcombine.low %v11237_v11, %v11240_v43  ;;  %v2634_v24 = vcombine.low %v11243_v44, %v11246_v54 }
  0xdc   : > { %6416 = vmatmul.mubr.msk.f32.gmra.mrb[48].mxu1 %vm1473_vm9, %v1938_v22  ;;  %v11250_v22 = vld [vmem:[#allocation6_spill] sm:$0xff]  ;;  %11252 = vst [vmem:[#allocation226_spill] sm:$0xff] %v8788_v60  ;;  %v1991_v33 = vcombine.low %v11256_v45, %v11255_v36 }
  0xdd   : > { %6487 = vmatmul.mubr.msk.f32.gmra.mrb[46].mxu0 %vm1473_vm9, %v2565_v34  ;;  %6418 = vmatprep.mubr.msk.f32.mxu1 %vm7017_vm3, %v11016_v18  ;;  %v2601_v7 = vcombine.low %v11233_v1, %v11250_v22  ;;  %11251 = vst [vmem:[#allocation6_spill] sm:$0xff] %v8785_v19  ;;  %v8795_v34 = vrot.slane %v2600_v15, %v7073_v10  ;;  %v11253_v22 = vld [vmem:[#allocation41_spill] sm:$0xff] }
  0xde   : > { %6489 = vmatprep.mubr.msk.f32.mxu0 %vm7017_vm3, %v11016_v18  ;;  %v1990_v20 = vcombine.low %v11254_v23, %v11253_v22  ;;  %v2618_v15 = vcombine.low %v11239_v2, %v11244_v29  ;;  %v1989_v51 = vcombine.low %v8785_v19, %v8788_v60  ;;  %v8824_v43 = vrot.slane %v1991_v33, %v7073_v10  ;;  %v11260_v2 = vld [vmem:[#allocation45_spill] sm:$0xff]  ;;  %v11261_v29 = vld [vmem:[#allocation47_spill] sm:$0xff]  ;;  %v11263_v23 = vld [vmem:[#allocation60_spill] sm:$0xff] }
  0xdf   : > { %v8805_v47 = vrot.slane %v2601_v7, %v7073_v10  ;;  %v2007_v11 = vcombine.low %v11261_v29, %v11260_v2  ;;  %v11267_v60 = vld [vmem:[#allocation27_spill] sm:$0xff]  ;;  %v2651_v1 = vcombine.low %v11253_v22, %v11256_v45 }
  0xe0   : > { %6419 = vmatmul.mubr.msk.f32.gmra.mrb[50].mxu1 %vm1473_vm9, %v8763_v4  ;;  %v8821_v7 = vrot.slane %v1990_v20, %v7073_v10  ;;  %11259 = vst [vmem:[#allocation44_spill] sm:$0xff] %v8824_v43  ;;  %v11262_v4 = vld [vmem:[#allocation66_spill] sm:$0xff]  ;;  %v8836_v20 = vrot.slane %v2617_v41, %v7073_v10  ;;  %v8839_v33 = vrot.slane %v2618_v15, %v7073_v10  ;;  %v11269_v41 = vld [vmem:[#allocation32_spill] sm:$0xff] }
  0xe1   : > { %6490 = vmatmul.mubr.msk.f32.gmra.mrb[48].mxu0 %vm1473_vm9, %v2582_v5  ;;  %6421 = vmatprep.mubr.msk.f32.mxu1 %vm7017_vm3, %v11016_v18  ;;  %11257 = vst [vmem:[#allocation41_spill] sm:$0xff] %v8805_v47  ;;  %v5861_v5 = vcombine.high %v11246_v54, %v11245_v12  ;;  %v2008_v44 = vcombine.low %v11263_v23, %v11262_v4  ;;  %v11270_v12 = vld [vmem:[#allocation33_spill] sm:$0xff] }
  0xe2   : > { %6492 = vmatprep.mubr.msk.f32.mxu0 %vm7017_vm3, %v11016_v18  ;;  %11258 = vst [vmem:[#allocation42_spill] sm:$0xff] %v8821_v7  ;;  %v2616_v54 = vcombine.low %v8795_v34, %v8805_v47  ;;  %11264 = vst [vmem:[#allocation47_spill] sm:$0xff] %v8836_v20  ;;  %v11266_v47 = vld [vmem:[#allocation14_spill] sm:$0xff]  ;;  %v11271_v15 = vcombine.low %v11269_v41, %v11270_v12  ;;  %v11277_v12 = vld [vmem:[#allocation79_spill] sm:$0xff]  ;;  %v2633_v45 = vcombine.low %v8836_v20, %v8839_v33 }
  0xe3   : > { %v11268_v19 = vcombine.low %v11266_v47, %v11267_v60  ;;  %v8874_v60 = vrot.slane %v2008_v44, %v7073_v10  ;;  %v11278_v47 = vld [vmem:[#allocation75_spill] sm:$0xff] }
  0xe4   : > { %6422 = vmatmul.mubr.msk.f32.gmra.mrb[52].mxu1 %vm1473_vm9, %v1972_v48  ;;  %v8844_v48 = vrot.slane %v2634_v24, %v7073_v10  ;;  %v8859_v9 = vrot.slane %v11271_v15, %v7073_v10  ;;  %v11272_v24 = vld [vmem:[#allocation73_spill] sm:$0xff]  ;;  %v2025_v41 = vcombine.low %v11278_v47, %v11277_v12  ;;  %v8899_v15 = vcombine.low %v8472_v63, %v8522_v26  ;;  %v11288_v26 = vld [vmem:[#allocation58_spill] sm:$0xff] }
  0xe5   : > { %6493 = vmatmul.mubr.msk.f32.gmra.mrb[50].mxu0 %vm1473_vm9, %v2599_v57  ;;  %6424 = vmatprep.mubr.msk.f32.mxu1 %vm7017_vm3, %v11016_v18  ;;  %v8847_v57 = vrot.slane %v5861_v5, %v7073_v10  ;;  %v8853_v23 = vrot.slane %v11268_v19, %v7073_v10  ;;  %v2024_v56 = vcombine.low %v11273_v17, %v11272_v24 }
  0xe6   : > { %6495 = vmatprep.mubr.msk.f32.mxu0 %vm7017_vm3, %v11016_v18  ;;  %v8868_v5 = vcombine.low %v8821_v7, %v8824_v43  ;;  %v8871_v19 = vrot.slane %v2007_v11, %v7073_v10  ;;  %11276 = vst [vmem:[#allocation32_spill] sm:$0xff] %v8874_v60  ;;  %v8890_v11 = vrot.slane %v2651_v1, %v7073_v10  ;;  %11281 = vst [vmem:[#allocation65_spill] sm:$0xff] %v8899_v15  ;;  %v11283_v1 = vld [vmem:[#allocation89_spill] sm:$0xff]  ;;  %v11285_v43 = vld [vmem:[#allocation92_spill] sm:$0xff] }
  0xe7   : > { %11265 = vst [vmem:[#allocation66_spill] sm:$0xff] %v8847_v57  ;;  %v2650_v22 = vcombine.low %v8844_v48, %v8847_v57  ;;  %v11284_v57 = vld [vmem:[#allocation78_spill] sm:$0xff]  ;;  %v11286_v7 = vld [vmem:[#allocation93_spill] sm:$0xff]  ;;  %v2668_v44 = vcombine.low %v11260_v2, %v11288_v26  ;;  %v11293_v2 = vld [vmem:[#allocation112_spill] sm:$0xff] }
  0xe8   : > { %6425 = vmatmul.mubr.msk.f32.gmra.mrb[54].mxu1 %vm1473_vm9, %v1989_v51  ;;  %11274 = vst [vmem:[#allocation14_spill] sm:$0xff] %v8868_v5  ;;  %11275 = vst [vmem:[#allocation27_spill] sm:$0xff] %v8871_v19  ;;  %v2652_v51 = vcombine.low %v11255_v36, %v11261_v29  ;;  %v2023_v36 = vcombine.low %v8871_v19, %v8874_v60  ;;  %v8906_v29 = vrot.slane %v2025_v41, %v7073_v10  ;;  %v11292_v26 = vld [vmem:[#allocation110_spill] sm:$0xff] }
  0xe9   : > { %6496 = vmatmul.mubr.msk.f32.gmra.mrb[52].mxu0 %vm1473_vm9, %v2616_v54  ;;  %6427 = vmatprep.mubr.msk.f32.mxu1 %vm7017_vm3, %v11016_v18  ;;  %11279 = vst [vmem:[#allocation33_spill] sm:$0xff] %v8890_v11  ;;  %v8893_v54 = vrot.slane %v2024_v56, %v7073_v10  ;;  %v2041_v56 = vcombine.low %v11284_v57, %v11283_v1 }
  0xea   : > { %6498 = vmatprep.mubr.msk.f32.mxu0 %vm7017_vm3, %v11016_v18  ;;  %11282 = vst [vmem:[#allocation79_spill] sm:$0xff] %v8906_v29  ;;  %v2042_v20 = vcombine.low %v11286_v7, %v11285_v43  ;;  %v8916_v63 = vrot.slane %v2652_v51, %v7073_v10  ;;  %v2669_v41 = vcombine.low %v11262_v4, %v11273_v17  ;;  %v11290_v51 = vld [vmem:[#allocation109_spill] sm:$0xff] }
  0xeb   : > { %11280 = vst [vmem:[#allocation73_spill] sm:$0xff] %v8893_v54  ;;  %v2685_v60 = vcombine.low %v11272_v24, %v11278_v47  ;;  %v8930_v19 = vcombine.low %v8561_v14, %v8566_v58  ;;  %v2059_v32 = vcombine.low %v11293_v2, %v11292_v26  ;;  %v8939_v17 = vcombine.low %v8893_v54, %v8906_v29  ;;  %v11304_v54 = vld [vmem:[#allocation141_spill] sm:$0xff] }
  0xec   : > { %6428 = vmatmul.mubr.msk.f32.gmra.mrb[56].mxu1 %vm1473_vm9, %v8868_v5  ;;  %11287 = vst [vmem:[#allocation75_spill] sm:$0xff] %v8916_v63  ;;  %v11291_v5 = vld [vmem:[#allocation95_spill] sm:$0xff]  ;;  %v8942_v4 = vrot.slane %v2041_v56, %v7073_v10  ;;  %v8945_v24 = vrot.slane %v2042_v20, %v7073_v10  ;;  %v2667_v14 = vcombine.low %v8890_v11, %v8916_v63  ;;  %v11302_v56 = vld [vmem:[#allocation138_spill] sm:$0xff]  ;;  %v11305_v63 = vld [vmem:[#allocation137_spill] sm:$0xff] }
  0xed   : > { %6499 = vmatmul.mubr.msk.f32.gmra.mrb[54].mxu0 %vm1473_vm9, %v2633_v45  ;;  %6430 = vmatprep.mubr.msk.f32.mxu1 %vm7017_vm3, %v11016_v18  ;;  %v2686_v45 = vcombine.low %v11277_v12, %v11284_v57  ;;  %11289 = vst [vmem:[#allocation89_spill] sm:$0xff] %v8930_v19  ;;  %v2058_v7 = vcombine.low %v11291_v5, %v11290_v51  ;;  %11294 = vst [vmem:[#allocation92_spill] sm:$0xff] %v8939_v17 }
  0xee   : > { %6501 = vmatprep.mubr.msk.f32.mxu0 %vm7017_vm3, %v11016_v18  ;;  %11295 = vst [vmem:[#allocation58_spill] sm:$0xff] %v8942_v4  ;;  %11296 = vst [vmem:[#allocation109_spill] sm:$0xff] %v8945_v24  ;;  %v8953_v58 = vrot.slane %v2668_v44, %v7073_v10  ;;  %v8956_v12 = vrot.slane %v2669_v41, %v7073_v10  ;;  %v8961_v20 = vrot.slane %v2685_v60, %v7073_v10  ;;  %v11303_v41 = vld [vmem:[#allocation133_spill] sm:$0xff] }
  0xef   : > { %v8964_v47 = vrot.slane %v2686_v45, %v7073_v10  ;;  %v8974_v44 = vrot.slane %v2059_v32, %v7073_v10  ;;  %v2075_v29 = vcombine.low %v11303_v41, %v11302_v56  ;;  %v2076_v60 = vcombine.low %v11305_v63, %v11304_v54  ;;  %v11313_v41 = vld [vmem:[#allocation139_spill] sm:$0xff] }
  0xf0   : > { %6431 = vmatmul.mubr.msk.f32.gmra.mrb[58].mxu1 %vm1473_vm9, %v2023_v36  ;;  %11297 = vst [vmem:[#allocation95_spill] sm:$0xff] %v8953_v58  ;;  %v8971_v36 = vrot.slane %v2058_v7, %v7073_v10  ;;  %v2057_v45 = vcombine.low %v8942_v4, %v8945_v24  ;;  %v2684_v32 = vcombine.low %v8953_v58, %v8956_v12  ;;  %v11311_v24 = vld [vmem:[#allocation135_spill] sm:$0xff] }
  0xf1   : > { %6502 = vmatmul.mubr.msk.f32.gmra.mrb[56].mxu0 %vm1473_vm9, %v2650_v22  ;;  %6433 = vmatprep.mubr.msk.f32.mxu1 %vm7017_vm3, %v11016_v18  ;;  %11298 = vst [vmem:[#allocation110_spill] sm:$0xff] %v8964_v47  ;;  %v8968_v22 = vcombine.low %v8620_v30, %v8651_v16  ;;  %11301 = vst [vmem:[#allocation228_spill] sm:$0xff] %v8974_v44  ;;  %v5862_v30 = vcombine.high %v11284_v57, %v11283_v1  ;;  %v11312_v57 = vld [vmem:[#allocation155_spill] sm:$0xff] }
  0xf2   : > { %6504 = vmatprep.mubr.msk.f32.mxu0 %vm7017_vm3, %v11016_v18  ;;  %11300 = vst [vmem:[#allocation227_spill] sm:$0xff] %v8971_v36  ;;  %v2703_v16 = vcombine.low %v11285_v43, %v11291_v5  ;;  %v2701_v7 = vcombine.low %v8961_v20, %v8964_v47  ;;  %v8999_v4 = vcombine.low %v8971_v36, %v8974_v44  ;;  %v11310_v5 = vld [vmem:[#allocation150_spill] sm:$0xff] }
  0xf3   : > { %11299 = vst [vmem:[#allocation112_spill] sm:$0xff] %v8968_v22  ;;  %v9005_v58 = vrot.slane %v2076_v60, %v7073_v10  ;;  %v9009_v43 = vrot.slane %v5862_v30, %v7073_v10  ;;  %v2093_v47 = vcombine.low %v11313_v41, %v11312_v57  ;;  %v9017_v44 = vcombine.low %v8711_v3, %v8743_v42 }
  0xf4   : > { %6434 = vmatmul.mubr.msk.f32.gmra.mrb[60].mxu1 %vm1473_vm9, %v8939_v17  ;;  %11306 = vst [vmem:[#allocation138_spill] sm:$0xff] %v8999_v4  ;;  %v2092_v17 = vcombine.low %v11311_v24, %v11310_v5  ;;  %v2719_v60 = vcombine.low %v11290_v51, %v11293_v2  ;;  %v2736_v42 = vcombine.low %v11302_v56, %v11305_v63  ;;  %v11319_v63 = vld [vmem:[#allocation159_spill] sm:$0xff] }
  0xf5   : > { %6505 = vmatmul.mubr.msk.f32.gmra.mrb[58].mxu0 %vm1473_vm9, %v2667_v14  ;;  %6436 = vmatprep.mubr.msk.f32.mxu1 %vm7017_vm3, %v11016_v18  ;;  %v9002_v14 = vrot.slane %v2075_v29, %v7073_v10  ;;  %11308 = vst [vmem:[#allocation137_spill] sm:$0xff] %v9005_v58  ;;  %11309 = vst [vmem:[#allocation229_spill] sm:$0xff] %v9009_v43  ;;  %v2717_v29 = vrot.slane %v2703_v16, %v7073_v10 }
  0xf6   : > { %6507 = vmatprep.mubr.msk.f32.mxu0 %vm7017_vm3, %v11016_v18  ;;  %11314 = vst [vmem:[#allocation150_spill] sm:$0xff] %v9017_v44  ;;  %v9037_v16 = vcombine.low %v8754_v27, %v8795_v34  ;;  %v9044_v51 = vrot.slane %v2092_v17, %v7073_v10  ;;  %v2727_v17 = vrot.slane %v2719_v60, %v7073_v10 }
  0xf7   : > { %11307 = vst [vmem:[#allocation141_spill] sm:$0xff] %v9002_v14  ;;  %v2091_v3 = vcombine.low %v9002_v14, %v9005_v58  ;;  %v11318_v14 = vld [vmem:[#allocation170_spill] sm:$0xff]  ;;  %v11320_v58 = vld [vmem:[#allocation172_spill] sm:$0xff]  ;;  %v2718_v34 = vcombine.low %v9009_v43, %v2717_v29 }
  0xf8   : > { %6437 = vmatmul.mubr.msk.f32.gmra.mrb[62].mxu1 %vm1473_vm9, %v2057_v45  ;;  %v11315_v45 = vld [vmem:[#allocation113_spill] sm:$0xff]  ;;  %11316 = vst [vmem:[#allocation135_spill] sm:$0xff] %v9037_v16  ;;  %v2109_v56 = vcombine.low %v11319_v63, %v11318_v14  ;;  %v11330_v43 = vld [vmem:[#allocation176_spill] sm:$0xff] }
  0xf9   : > { %6508 = vmatmul.mubr.msk.f32.gmra.mrb[60].mxu0 %vm1473_vm9, %v2684_v32  ;;  %6439 = vmatprep.mubr.msk.f32.mxu1 %vm7017_vm3, %v11016_v18  ;;  %v2720_v30 = vcombine.low %v11292_v26, %v11315_v45  ;;  %v2737_v32 = vcombine.low %v11304_v54, %v11311_v24  ;;  %v9039_v2 = vpop.f32.mrb[0].mxu0  ;;  %v9047_v45 = vrot.slane %v2093_v47, %v7073_v10  ;;  %v11321_v54 = vld [vmem:[#allocation173_spill] sm:$0xff] }
  0xfa   : > { %6510 = vmatprep.mubr.msk.f32.mxu0 %vm7017_vm3, %v11016_v18  ;;  %v2110_v24 = vcombine.low %v11321_v54, %v11320_v58  ;;  %v6304_v36 = vpop.f32.mrb[1].mxu0  ;;  %v9053_v27 = vpop.f32.mrb[0].mxu1 }
  0xfb   : > { %11317 = vst [vmem:[#allocation155_spill] sm:$0xff] %v9047_v45  ;;  %11322 = vst [vmem:[#allocation139_spill] sm:$0xff] %v9053_v27  ;;  %v9061_v47 = vrot.slane %v2720_v30, %v7073_v10  ;;  %v9066_v36 = vrot.slane %v2736_v42, %v7073_v10  ;;  %v2751_v27 = vrot.slane %v2737_v32, %v7073_v10 }
  0xfc   : > { %6440 = vmatmul.mubr.msk.f32.gmra.mrb[64].mxu1 %vm1473_vm9, %v8999_v4  ;;  %v6343_v4 = vpop.f32.mrb[1].mxu1  ;;  %v2108_v60 = vcombine.low %v9044_v51, %v9047_v45  ;;  %v9077_v30 = vrot.slane %v2109_v56, %v7073_v10  ;;  %v2753_v42 = vcombine.low %v11310_v5, %v11313_v41 }
  0xfd   : > { %6511 = vmatmul.mubr.msk.f32.gmra.mrb[62].mxu0 %vm1473_vm9, %v2701_v7  ;;  %6442 = vmatprep.mubr.msk.f32.mxu1 %vm7017_vm3, %v11016_v18  ;;  %11323 = vst [vmem:[#allocation113_spill] sm:$0xff] %v9061_v47  ;;  %11324 = vst [vmem:[#allocation170_spill] sm:$0xff] %v9066_v36  ;;  %v9071_v7 = vcombine.low %v8839_v33, %v8844_v48  ;;  %v9080_v4 = vrot.slane %v2110_v24, %v7073_v10 }
  0xfe   : > { %6513 = vmatprep.mubr.msk.f32.mxu0 %vm7017_vm3, %v11016_v18  ;;  %11326 = vst [vmem:[#allocation172_spill] sm:$0xff] %v9077_v30  ;;  %v2735_v32 = vcombine.low %v2727_v17, %v9061_v47  ;;  %v5863_v33 = vcombine.high %v11313_v41, %v11312_v57  ;;  %v2752_v5 = vcombine.low %v9066_v36, %v2751_v27  ;;  %v11329_v47 = vld [vmem:[#allocation174_spill] sm:$0xff] }
  0xff   : > { %11325 = vst [vmem:[#allocation159_spill] sm:$0xff] %v9071_v7  ;;  %11327 = vst [vmem:[#allocation173_spill] sm:$0xff] %v9080_v4  ;;  %v9100_v24 = vcombine.low %v9077_v30, %v9080_v4  ;;  %v2126_v45 = vcombine.low %v11330_v43, %v11329_v47 }
 0x100   : > { %6443 = vmatmul.mubr.msk.f32.gmra.mrb[66].mxu1 %vm1473_vm9, %v2091_v3  ;;  %v9092_v48 = vpop.f32.mrb[2].mxu0  ;;  %v3100_v3 = vcombine.low %v7101_v28, %v7174_v0  ;;  %v9109_v28 = vrot.slane %v5863_v33, %v7073_v10  ;;  %v2770_v0 = vcombine.low %v11318_v14, %v11321_v54  ;;  %v3109_v14 = vcombine.low %v7347_v37, %v7397_v21 }
 0x101   : > { %6514 = vmatmul.mubr.msk.f32.gmra.mrb[64].mxu0 %vm1473_vm9, %v2718_v34  ;;  %6445 = vmatprep.mubr.msk.f32.mxu1 %vm7017_vm3, %v11016_v18  ;;  %v6307_v56 = vpop.f32.mrb[3].mxu0  ;;  %11328 = vst [vmem:[#allocation230_spill] sm:$0xff] %v9100_v24  ;;  %v2761_v34 = vrot.slane %v2753_v42, %v7073_v10  ;;  %v9119_v42 = vcombine.low %v8956_v12, %v8961_v20 }
 0x102   : > { %6516 = vmatprep.mubr.msk.f32.mxu0 %vm7017_vm3, %v11016_v18  ;;  %11331 = vst [vmem:[#allocation174_spill] sm:$0xff] %v9109_v28  ;;  %v9125_v33 = vrot.slane %v2126_v45, %v7073_v10  ;;  %v9129_v54 = vcombine.low %v2717_v29, %v2727_v17  ;;  %v9136_v12 = vrot.slane %v2770_v0, %v7073_v10  ;;  %v5945_v0 = vld [vmem:[%s10605_s1 + $0x14] sm:$0xf] }
 0x103   : > { %11332 = vst [vmem:[#allocation176_spill] sm:$0xff] %v9119_v42  ;;  %v3116_v29 = vrot.slane %v3109_v14, %v7073_v10  ;;  %v11339_v14 = vld [vmem:[#allocation28_spill] sm:$0xff] }
 0x104   : > { %6446 = vmatmul.mubr.msk.f32.gmra.mrb[68].mxu1 %vm1473_vm9, %v2108_v60  ;;  %v2771_v60 = vcombine.low %v11320_v58, %v11330_v43  ;;  %11333 = vst [vmem:[#allocation231_spill] sm:$0xff] %v9125_v33  ;;  %11334 = vst [vmem:[#allocation232_spill] sm:$0xff] %v9129_v54  ;;  %v2769_v58 = vcombine.low %v2761_v34, %v9109_v28  ;;  %v11342_v28 = vld [vmem:[#allocation43_spill] sm:$0xff] }
 0x105   : > { %6517 = vmatmul.mubr.msk.f32.gmra.mrb[66].mxu0 %vm1473_vm9, %v2735_v32  ;;  %6448 = vmatprep.mubr.msk.f32.mxu1 %vm7017_vm3, %v11016_v18  ;;  %v3107_v32 = vrot.slane %v3100_v3, %v7073_v10  ;;  %11335 = vst [vmem:[#allocation233_spill] sm:$0xff] %v9136_v12  ;;  %v11336_v3 = vld [vmem:[#allocation187_spill] sm:$0xff] }
 0x106   : > { %6519 = vmatprep.mubr.msk.f32.mxu0 %vm7017_vm3, %v11016_v18  ;;  %v9139_v20 = vrot.slane %v2771_v60, %v7073_v10  ;;  %v2787_v56 = vcombine.low %v11329_v47, %v11336_v3  ;;  %v3117_v60 = vcombine.low %v8463_v46, %v3116_v29  ;;  %v3119_v3 = vcombine.low %v7588_v39, %v7604_v40 }
 0x107   : > { %v3108_v43 = vcombine.low %v3107_v32, %v8460_v50  ;;  %v9156_v50 = vcombine.low %v2751_v27, %v2761_v34  ;;  %v11338_v32 = vld [vmem:[#allocation40_spill] sm:$0xff]  ;;  %v11341_v34 = vld [vmem:[#allocation46_spill] sm:$0xff] }
 0x108   : > { %6449 = vmatmul.mubr.msk.f32.gmra.mrb[70].mxu1 %vm1473_vm9, %v9100_v24  ;;  %v2786_v17 = vcombine.low %v9136_v12, %v9139_v20  ;;  %v9173_v27 = vrot.slane %v2787_v56, %v7073_v10  ;;  %v3126_v40 = vrot.slane %v3119_v3, %v7073_v10  ;;  %v11346_v56 = vld [vmem:[#allocation59_spill] sm:$0xff]  ;;  %v11347_v3 = vld [vmem:[#allocation74_spill] sm:$0xff]  ;;  %v11420_v24 = vld [vmem:[#allocation133_spill] sm:$0xff] }
 0x109   : > { %6520 = vmatmul.mubr.msk.f32.gmra.mrb[68].mxu0 %vm1473_vm9, %v2752_v5  ;;  %6451 = vmatprep.mubr.msk.f32.mxu1 %vm7017_vm3, %v11016_v18  ;;  %11337 = vst [vmem:[#allocation187_spill] sm:$0xff] %v9156_v50 }
 0x10a   : > { %6522 = vmatprep.mubr.msk.f32.mxu0 %vm7017_vm3, %v11016_v18  ;;  %v9147_v45 = vpop.f32.mrb[2].mxu1  ;;  %11340 = vst [vmem:[#allocation40_spill] sm:$0xff] %v9173_v27 }
 0x10b   : > { %v6346_v5 = vpop.f32.mrb[3].mxu1 }
 0x10c   : > { %6452 = vmatmul.mubr.msk.f32.gmra.mrb[72].mxu1 %vm1473_vm9, %v9125_v33  ;;  %v11422_v33 = vld [vmem:[#allocation101_spill] sm:$0xff] }
 0x10d   : > { %6523 = vmatmul.mubr.msk.f32.gmra.mrb[70].mxu0 %vm1473_vm9, %v2769_v58  ;;  %6533 = vmatprep.mubr.msk.f32.mxu1 %vm7017_vm3, %v11016_v18  ;;  %v3570_v58 = vcombine.low %v11339_v14, %v11338_v32  ;;  %v5979_v14 = vld [vmem:[%s10605_s1 + $0x18] sm:$0xf] }
 0x10e   : > { %6525 = vmatprep.mubr.msk.f32.mxu0 %vm7017_vm3, %v11016_v18 }
 0x10f   : > { %v9169_v5 = vpop.f32.mrb[4].mxu0  ;;  %v3578_v39 = vrot.slane %v3570_v58, %v7073_v10  ;;  %v3127_v58 = vcombine.low %v8525_v35, %v3126_v40 }
 0x110   : > { %6534 = vmatmul.mubr.msk.f32.vlgmr.msra.gmra.mrb[74].mxu1 %vm1473_vm9, %v3108_v43  ;;  %v3571_v43 = vcombine.low %v11342_v28, %v11341_v34  ;;  %v6310_v4 = vpop.f32.mrb[5].mxu0  ;;  %v11344_v28 = vld [vmem:[#allocation48_spill] sm:$0xff]  ;;  %v11348_v34 = vld [vmem:[#allocation62_spill] sm:$0xff] }
 0x111   : > { %6526 = vmatmul.mubr.msk.f32.gmra.mrb[72].mxu0 %vm1473_vm9, %v2786_v17  ;;  %6686 = vmatpush3.msk.msra.mxu1 %vm1524_vm0, %v5945_v0  ;;  %v11343_v4 = vld [vmem:[#allocation55_spill] sm:$0xff]  ;;  %v11345_v17 = vld [vmem:[#allocation61_spill] sm:$0xff] }
 0x112   : > { %6528 = vmatprep.mubr.msk.f32.mxu0 %vm7017_vm3, %v11016_v18  ;;  %6536 = vmatprep.mubr.msk.f32.mxu1 %vm7017_vm3, %v11016_v18  ;;  %v3585_v46 = vrot.slane %v3571_v43, %v7073_v10  ;;  %v3587_v29 = vcombine.low %v11344_v28, %v11343_v4  ;;  %v3588_v0 = vcombine.low %v11346_v56, %v11345_v17  ;;  %v9195_v32 = vpop.f32.mrb[4].mxu1  ;;  %v11349_v4 = vld [vmem:[#allocation80_spill] sm:$0xff]  ;;  %v11350_v28 = vld [vmem:[#allocation77_spill] sm:$0xff] }
 0x113   : > { %6839 = vmatprep.subr.mxu1 %v11016_v18  ;;  %v3604_v43 = vcombine.low %v11348_v34, %v11347_v3  ;;  %v3605_v17 = vcombine.low %v11350_v28, %v11349_v4  ;;  %v3129_v56 = vcombine.low %v7717_v13, %v7799_v53  ;;  %v11353_v3 = vld [vmem:[#allocation81_spill] sm:$0xff]  ;;  %v11355_v34 = vld [vmem:[#allocation96_spill] sm:$0xff] }
 0x114   : > { %6537 = vmatmul.mubr.msk.f32.gmra.mrb[76].mxu1 %vm1473_vm9, %v3117_v60  ;;  %v6349_v60 = vpop.f32.mrb[5].mxu1  ;;  %v3595_v40 = vrot.slane %v3587_v29, %v7073_v10  ;;  %v3602_v35 = vrot.slane %v3588_v0, %v7073_v10 }
 0x115   : > { %6529 = vmatmul.mubr.msk.f32.gmra.mrb[74].mxu0 %vm1473_vm9, %v9173_v27  ;;  %6539 = vmatprep.mubr.msk.f32.mxu1 %vm7017_vm3, %v11016_v18  ;;  %v11351_v60 = vcombine.low %v8853_v23, %v8859_v9  ;;  %v3586_v27 = vcombine.low %v3578_v39, %v3585_v46  ;;  %v3612_v9 = vrot.slane %v3604_v43, %v7073_v10  ;;  %v11352_v46 = vld [vmem:[#allocation94_spill] sm:$0xff] }
 0x116   : > { %6610 = vmatprep.mubr.msk.f32.mxu0 %vm7017_vm3, %v11016_v18  ;;  %v3619_v23 = vrot.slane %v3605_v17, %v7073_v10  ;;  %v3136_v39 = vrot.slane %v3129_v56, %v7073_v10  ;;  %v3621_v29 = vcombine.low %v11353_v3, %v11352_v46  ;;  %v3603_v0 = vcombine.low %v3595_v40, %v3602_v35  ;;  %v11357_v40 = vld [vmem:[#allocation99_spill] sm:$0xff]  ;;  %v11358_v3 = vld [vmem:[#allocation116_spill] sm:$0xff] }
 0x118   : > { %6540 = vmatmul.mubr.msk.f32.gmra.mrb[78].mxu1 %vm1473_vm9, %v8899_v15  ;;  %v3620_v28 = vcombine.low %v3612_v9, %v3619_v23  ;;  %v3137_v17 = vcombine.low %v3136_v39, %v8610_v31  ;;  %v3629_v35 = vrot.slane %v3621_v29, %v7073_v10  ;;  %v11361_v29 = vld [vmem:[#allocation118_spill] sm:$0xff] }
 0x119   : > { %6611 = vmatmul.mubr.msk.f32.vlgmr.msra.gmra.mrb[76].mxu0 %vm1473_vm9, %v11351_v60  ;;  %6542 = vmatprep.mubr.msk.f32.mxu1 %vm7017_vm3, %v11016_v18  ;;  %v11356_v60 = vld [vmem:[#allocation111_spill] sm:$0xff] }
 0x11a   : > { %6763 = vmatpush3.msk.msra.mxu0 %vm1524_vm0, %v5979_v14  ;;  %6613 = vmatprep.mubr.msk.f32.mxu0 %vm7017_vm3, %v11016_v18  ;;  %v11354_v14 = vld [vmem:[#allocation98_spill] sm:$0xff]  ;;  %v3638_v46 = vcombine.low %v11357_v40, %v11356_v60  ;;  %v3148_v60 = vcombine.low %v8020_v6, %v11217_v38 }
 0x11b   : > { %6916 = vmatprep.subr.mxu0 %v11016_v18  ;;  %v3622_v4 = vcombine.low %v11355_v34, %v11354_v14  ;;  %v11359_v14 = vld [vmem:[#allocation114_spill] sm:$0xff]  ;;  %v11362_v34 = vld [vmem:[#allocation131_spill] sm:$0xff] }
 0x11c   : > { %6543 = vmatmul.mubr.msk.f32.gmra.mrb[80].mxu1 %vm1473_vm9, %v3127_v58  ;;  %v9236_v58 = vpop.f32.mrb[6].mxu0  ;;  %v3639_v9 = vcombine.low %v11359_v14, %v11358_v3  ;;  %v3646_v3 = vrot.slane %v3638_v46, %v7073_v10 }
 0x11d   : > { %6614 = vmatmul.mubr.msk.f32.gmra.mrb[78].mxu0 %vm1473_vm9, %v3586_v27  ;;  %6545 = vmatprep.mubr.msk.f32.mxu1 %vm7017_vm3, %v11016_v18  ;;  %v6313_v43 = vpop.f32.mrb[7].mxu0  ;;  %v3139_v27 = vcombine.low %v11205_v62, %v11211_v59  ;;  %v3636_v56 = vrot.slane %v3622_v4, %v7073_v10  ;;  %v11360_v62 = vld [vmem:[#allocation128_spill] sm:$0xff]  ;;  %v11363_v4 = vld [vmem:[#allocation130_spill] sm:$0xff] }
 0x11e   : > { %6616 = vmatprep.mubr.msk.f32.mxu0 %vm7017_vm3, %v11016_v18  ;;  %v3656_v43 = vcombine.low %v11363_v4, %v11362_v34  ;;  %v11367_v34 = vld [vmem:[#allocation152_spill] sm:$0xff] }
 0x11f   : > { %v3146_v59 = vrot.slane %v3139_v27, %v7073_v10  ;;  %v3637_v40 = vcombine.low %v3629_v35, %v3636_v56  ;;  %v3155_v35 = vrot.slane %v3148_v60, %v7073_v10  ;;  %v11368_v60 = vld [vmem:[#allocation169_spill] sm:$0xff] }
 0x120   : > { %6546 = vmatmul.mubr.msk.f32.gmra.mrb[82].mxu1 %vm1473_vm9, %v8930_v19  ;;  %v9254_v23 = vpop.f32.mrb[6].mxu1 }
 0x121   : > { %6617 = vmatmul.mubr.msk.f32.gmra.mrb[80].mxu0 %vm1473_vm9, %v3603_v0  ;;  %6548 = vmatprep.mubr.msk.f32.mxu1 %vm7017_vm3, %v11016_v18  ;;  %v6352_v39 = vpop.f32.mrb[7].mxu1  ;;  %v3655_v0 = vcombine.low %v11361_v29, %v11360_v62  ;;  %v3147_v27 = vcombine.low %v3146_v59, %v8659_v8  ;;  %v11366_v29 = vld [vmem:[#allocation153_spill] sm:$0xff] }
 0x122   : > { %6619 = vmatprep.mubr.msk.f32.mxu0 %vm7017_vm3, %v11016_v18  ;;  %v11365_v39 = vld [vmem:[#allocation132_spill] sm:$0xff]  ;;  %v3673_v59 = vcombine.low %v11367_v34, %v11366_v29  ;;  %v11370_v29 = vld [vmem:[#allocation175_spill] sm:$0xff]  ;;  %v11399_v8 = vld [vmem:[#allocation45_spill] sm:$0xff] }
 0x123   : > { %v3663_v14 = vrot.slane %v3655_v0, %v7073_v10 }
 0x124   : > { %6549 = vmatmul.mubr.msk.f32.gmra.mrb[84].mxu1 %vm1473_vm9, %v3137_v17  ;;  %v3653_v17 = vrot.slane %v3639_v9, %v7073_v10  ;;  %v11364_v9 = vld [vmem:[#allocation148_spill] sm:$0xff] }
 0x125   : > { %6620 = vmatmul.mubr.msk.f32.gmra.mrb[82].mxu0 %vm1473_vm9, %v3620_v28  ;;  %6551 = vmatprep.mubr.msk.f32.mxu1 %vm7017_vm3, %v11016_v18  ;;  %v3670_v28 = vrot.slane %v3656_v43, %v7073_v10  ;;  %v3672_v62 = vcombine.low %v11365_v39, %v11364_v9  ;;  %v3156_v43 = vcombine.low %v8662_v25, %v3155_v35  ;;  %v11373_v35 = vld [vmem:[#allocation189_spill] sm:$0xff] }
 0x126   : > { %6622 = vmatprep.mubr.msk.f32.mxu0 %vm7017_vm3, %v11016_v18  ;;  %v9277_v56 = vpop.f32.mrb[8].mxu0  ;;  %v3654_v46 = vcombine.low %v3646_v3, %v3653_v17  ;;  %v3158_v17 = vcombine.low %v8299_v49, %v8321_v55  ;;  %v3687_v39 = vrot.slane %v3673_v59, %v7073_v10 }
 0x127   : > { %v6316_v4 = vpop.f32.mrb[9].mxu0  ;;  %v3671_v0 = vcombine.low %v3663_v14, %v3670_v28  ;;  %v3680_v9 = vrot.slane %v3672_v62, %v7073_v10 }
 0x128   : > { %6552 = vmatmul.mubr.msk.f32.gmra.mrb[86].mxu1 %vm1473_vm9, %v8968_v22  ;;  %v3165_v55 = vrot.slane %v3158_v17, %v7073_v10  ;;  %v11378_v17 = vld [vmem:[#allocation201_spill] sm:$0xff] }
 0x129   : > { %6623 = vmatmul.mubr.msk.f32.gmra.mrb[84].mxu0 %vm1473_vm9, %v3637_v40  ;;  %6554 = vmatprep.mubr.msk.f32.mxu1 %vm7017_vm3, %v11016_v18  ;;  %v11369_v40 = vld [vmem:[#allocation154_spill] sm:$0xff]  ;;  %v3688_v59 = vcombine.low %v3680_v9, %v3687_v39  ;;  %v11379_v9 = vld [vmem:[#allocation200_spill] sm:$0xff] }
 0x12a   : > { %6625 = vmatprep.mubr.msk.f32.mxu0 %vm7017_vm3, %v11016_v18  ;;  %v3689_v3 = vcombine.low %v11369_v40, %v11368_v60  ;;  %v11375_v60 = vld [vmem:[#allocation191_spill] sm:$0xff]  ;;  %v11376_v40 = vld [vmem:[#allocation190_spill] sm:$0xff]  ;;  %v3724_v39 = vcombine.low %v11379_v9, %v11378_v17  ;;  %v11384_v17 = vld [vmem:[#allocation8_spill] sm:$0xff] }
 0x12b   : > { %v11385_v9 = vld [vmem:[#allocation7_spill] sm:$0xff] }
 0x12c   : > { %6555 = vmatmul.mubr.msk.f32.gmra.mrb[88].mxu1 %vm1473_vm9, %v3147_v27  ;;  %v11371_v27 = vld [vmem:[#allocation171_spill] sm:$0xff]  ;;  %v3697_v49 = vrot.slane %v3689_v3, %v7073_v10  ;;  %v11377_v3 = vld [vmem:[#allocation193_spill] sm:$0xff] }
 0x12d   : > { %6626 = vmatmul.mubr.msk.f32.gmra.mrb[86].mxu0 %vm1473_vm9, %v3654_v46  ;;  %6557 = vmatprep.mubr.msk.f32.mxu1 %vm7017_vm3, %v11016_v18  ;;  %v3690_v14 = vcombine.low %v11371_v27, %v11370_v29  ;;  %v11374_v46 = vld [vmem:[#allocation178_spill] sm:$0xff]  ;;  %v3707_v29 = vcombine.low %v11376_v40, %v11375_v60  ;;  %v11380_v27 = vld [vmem:[#allocation13_spill] sm:$0xff] }
 0x12e   : > { %6628 = vmatprep.mubr.msk.f32.mxu0 %vm7017_vm3, %v11016_v18  ;;  %v9303_v28 = vpop.f32.mrb[8].mxu1  ;;  %v3706_v34 = vcombine.low %v11374_v46, %v11373_v35  ;;  %v11381_v35 = vld [vmem:[#allocation4_spill] sm:$0xff] }
 0x12f   : > { %11372 = vst [vmem:[#allocation28_spill] sm:$0xff] %v9303_v28  ;;  %v6355_v62 = vpop.f32.mrb[9].mxu1  ;;  %v3704_v4 = vrot.slane %v3690_v14, %v7073_v10  ;;  %v3168_v14 = vcombine.low %v11381_v35, %v11380_v27  ;;  %v3721_v60 = vrot.slane %v3707_v29, %v7073_v10  ;;  %v11383_v29 = vld [vmem:[#allocation199_spill] sm:$0xff] }
 0x130   : > { %6558 = vmatmul.mubr.msk.f32.gmra.mrb[90].mxu1 %vm1473_vm9, %v3156_v43  ;;  %v3166_v43 = vcombine.low %v8746_v52, %v3165_v55  ;;  %v3714_v62 = vrot.slane %v3706_v34, %v7073_v10 }
 0x131   : > { %6629 = vmatmul.mubr.msk.f32.gmra.mrb[88].mxu0 %vm1473_vm9, %v3671_v0  ;;  %6560 = vmatprep.mubr.msk.f32.mxu1 %vm7017_vm3, %v11016_v18  ;;  %v3723_v0 = vcombine.low %v11377_v3, %v8337_v61  ;;  %v3705_v46 = vcombine.low %v3697_v49, %v3704_v4  ;;  %v3738_v49 = vrot.slane %v3724_v39, %v7073_v10  ;;  %v11382_v4 = vld [vmem:[#allocation9_spill] sm:$0xff] }
 0x132   : > { %6631 = vmatprep.mubr.msk.f32.mxu0 %vm7017_vm3, %v11016_v18  ;;  %v3722_v34 = vcombine.low %v3714_v62, %v3721_v60  ;;  %v3740_v3 = vcombine.low %v11383_v29, %v11382_v4  ;;  %v11388_v62 = vld [vmem:[#allocation20_spill] sm:$0xff]  ;;  %v11389_v60 = vld [vmem:[#allocation10_spill] sm:$0xff]  ;;  %v11390_v4 = vld [vmem:[#allocation29_spill] sm:$0xff] }
 0x133   : > { %v9332_v55 = vpop.f32.mrb[10].mxu0  ;;  %v3731_v40 = vrot.slane %v3723_v0, %v7073_v10  ;;  %v199_v0 = vld [vmem:[%s7065_s19 + $0xe0] sm:$0xff] }
 0x134   : > { %6561 = vmatmul.mubr.msk.f32.gmra.mrb[92].mxu1 %vm1473_vm9, %v9017_v44  ;;  %v6319_v61 = vpop.f32.mrb[11].mxu0  ;;  %v3757_v44 = vcombine.low %v11389_v60, %v11388_v62  ;;  %v11391_v29 = vld [vmem:[#allocation26_spill] sm:$0xff]  ;;  %v11395_v62 = vld [vmem:[#allocation24_spill] sm:$0xff] }
 0x135   : > { %6632 = vmatmul.mubr.msk.f32.gmra.mrb[90].mxu0 %vm1473_vm9, %v3688_v59  ;;  %6563 = vmatprep.mubr.msk.f32.mxu1 %vm7017_vm3, %v11016_v18  ;;  %v3175_v59 = vrot.slane %v3168_v14, %v7073_v10  ;;  %v3741_v61 = vcombine.low %v11385_v9, %v11384_v17  ;;  %v3739_v39 = vcombine.low %v3731_v40, %v3738_v49  ;;  %v11387_v14 = vld [vmem:[#allocation47_spill] sm:$0xff]  ;;  %v231_v49 = vmax.f32 %v199_v0, 0.0 }
 0x136   : > { %6634 = vmatprep.mubr.msk.f32.mxu0 %vm7017_vm3, %v11016_v18  ;;  %v3178_v25 = vcombine.low %v11391_v29, %v11390_v4  ;;  %v3748_v17 = vrot.slane %v3740_v3, %v7073_v10  ;;  %v11396_v4 = vld [vmem:[#allocation36_spill] sm:$0xff]  ;;  %v3765_v3 = vrot.slane %v3757_v44, %v7073_v10  ;;  %v200_v44 = vld [vmem:[%s7065_s19 + $0xe8] sm:$0xff] }
 0x137   : > { %v3755_v9 = vrot.slane %v3741_v61, %v7073_v10 }
 0x138   : > { %6564 = vmatmul.mubr.msk.f32.gmra.mrb[94].mxu1 %vm1473_vm9, %v3166_v43  ;;  %v9347_v52 = vpop.f32.mrb[10].mxu1  ;;  %v3185_v61 = vrot.slane %v3178_v25, %v7073_v10 }
 0x139   : > { %6635 = vmatmul.mubr.msk.f32.gmra.mrb[92].mxu0 %vm1473_vm9, %v3705_v46  ;;  %6566 = vmatprep.mubr.msk.f32.mxu1 %vm7017_vm3, %v11016_v18  ;;  %11386 = vst [vmem:[#allocation46_spill] sm:$0xff] %v9347_v52  ;;  %v6358_v43 = vpop.f32.mrb[11].mxu1  ;;  %v3176_v46 = vcombine.low %v3175_v59, %v11387_v14  ;;  %v11394_v59 = vld [vmem:[#allocation34_spill] sm:$0xff]  ;;  %v11398_v14 = vld [vmem:[#allocation60_spill] sm:$0xff]  ;;  %v3756_v0 = vcombine.low %v3748_v17, %v3755_v9  ;;  %v11403_v9 = vld [vmem:[#allocation51_spill] sm:$0xff] }
 0x13a   : > { %6637 = vmatprep.mubr.msk.f32.mxu0 %vm7017_vm3, %v11016_v18  ;;  %v11392_v43 = vld [vmem:[#allocation22_spill] sm:$0xff]  ;;  %v3774_v60 = vcombine.low %v11395_v62, %v11394_v59  ;;  %v3065_v59 = vcombine.high %v231_v49, %v231_v49  ;;  %v11402_v17 = vld [vmem:[#allocation52_spill] sm:$0xff] }
 0x13b   : > { %v3792_v22 = vcombine.low %v11403_v9, %v11402_v17  ;;  %v11407_v17 = vld [vmem:[#allocation53_spill] sm:$0xff]  ;;  %v11408_v9 = vld [vmem:[#allocation70_spill] sm:$0xff] }
 0x13c   : > { %6567 = vmatmul.mubr.msk.f32.gmra.mrb[96].mxu1 %vm1473_vm9, %v9037_v16  ;;  %v11393_v16 = vld [vmem:[#allocation21_spill] sm:$0xff]  ;;  %v3782_v25 = vrot.slane %v3774_v60, %v7073_v10 }
 0x13d   : > { %6638 = vmatmul.mubr.msk.f32.gmra.mrb[94].mxu0 %vm1473_vm9, %v3722_v34  ;;  %6569 = vmatprep.mubr.msk.f32.mxu1 %vm7017_vm3, %v11016_v18  ;;  %v3758_v40 = vcombine.low %v11393_v16, %v11392_v43  ;;  %v11397_v34 = vld [vmem:[#allocation35_spill] sm:$0xff]  ;;  %v3187_v16 = vcombine.low %v11399_v8, %v11398_v14 }
 0x13e   : > { %6640 = vmatprep.mubr.msk.f32.mxu0 %vm7017_vm3, %v11016_v18  ;;  %v3775_v29 = vcombine.low %v11397_v34, %v11396_v4  ;;  %v11400_v4 = vld [vmem:[#allocation49_spill] sm:$0xff] }
 0x13f   : > { %v3772_v43 = vrot.slane %v3758_v40, %v7073_v10  ;;  %v11401_v34 = vld [vmem:[#allocation37_spill] sm:$0xff]  ;;  %v3186_v40 = vcombine.low %v3185_v61, %v8890_v11  ;;  %v3194_v19 = vrot.slane %v3187_v16, %v7073_v10 }
 0x140   : > { %6570 = vmatmul.mubr.msk.f32.gmra.mrb[98].mxu1 %vm1473_vm9, %v3176_v46  ;;  %v3789_v62 = vrot.slane %v3775_v29, %v7073_v10  ;;  %v9402_v29 = vrot.slane %v231_v49, %v7073_v10  ;;  %v11406_v49 = vld [vmem:[#allocation63_spill] sm:$0xff]  ;;  %v11409_v11 = vld [vmem:[#allocation69_spill] sm:$0xff] }
 0x141   : > { %6641 = vmatmul.mubr.msk.f32.gmra.mrb[96].mxu0 %vm1473_vm9, %v3739_v39  ;;  %6572 = vmatprep.mubr.msk.f32.mxu1 %vm7017_vm3, %v11016_v18  ;;  %v9383_v46 = vpop.f32.mrb[12].mxu0  ;;  %v3791_v39 = vcombine.low %v11401_v34, %v11400_v4  ;;  %v3773_v15 = vcombine.low %v3765_v3, %v3772_v43  ;;  %v9404_v4 = vmax.f32 %v200_v44, 0.0  ;;  %v11405_v43 = vld [vmem:[#allocation75_spill] sm:$0xff]  ;;  %v3808_v44 = vcombine.low %v11407_v17, %v11406_v49  ;;  %v11413_v17 = vld [vmem:[#allocation86_spill] sm:$0xff] }
 0x142   : > { %6643 = vmatprep.mubr.msk.f32.mxu0 %vm7017_vm3, %v11016_v18  ;;  %v6322_v31 = vpop.f32.mrb[13].mxu0  ;;  %v3790_v16 = vcombine.low %v3782_v25, %v3789_v62  ;;  %v3195_v34 = vcombine.low %v11405_v43, %v3194_v19 }
 0x143   : > { %v9399_v60 = vpop.f32.mrb[12].mxu1  ;;  %v9407_v31 = vrot.slane %v3065_v59, %v7073_v10  ;;  %v3799_v3 = vrot.slane %v3791_v39, %v7073_v10  ;;  %v3809_v59 = vcombine.low %v11409_v11, %v11408_v9  ;;  %v9434_v25 = vrot.slane %v9404_v4, %v7073_v10  ;;  %v11414_v9 = vld [vmem:[#allocation85_spill] sm:$0xff] }
 0x144   : > { %6573 = vmatmul.mubr.msk.f32.gmra.mrb[100].mxu1 %vm1473_vm9, %v9071_v7  ;;  %11404 = vst [vmem:[#allocation43_spill] sm:$0xff] %v9399_v60  ;;  %v6361_v61 = vpop.f32.mrb[13].mxu1  ;;  %v11410_v7 = vld [vmem:[#allocation93_spill] sm:$0xff] }
 0x145   : > { %6644 = vmatmul.mubr.msk.f32.gmra.mrb[98].mxu0 %vm1473_vm9, %v3756_v0  ;;  %6575 = vmatprep.mubr.msk.f32.mxu1 %vm7017_vm3, %v11016_v18  ;;  %v3806_v0 = vrot.slane %v3792_v22, %v7073_v10  ;;  %v3197_v60 = vcombine.low %v11283_v1, %v11410_v7  ;;  %v9426_v22 = vcombine.high %v9402_v29, %v9402_v29  ;;  %v11412_v1 = vld [vmem:[#allocation71_spill] sm:$0xff] }
 0x146   : > { %6646 = vmatprep.mubr.msk.f32.mxu0 %vm7017_vm3, %v11016_v18  ;;  %v9430_v19 = vcombine.high %v9407_v31, %v9407_v31  ;;  %v3823_v61 = vrot.slane %v3809_v59, %v7073_v10 }
 0x147   : > { %v3807_v11 = vcombine.low %v3799_v3, %v3806_v0  ;;  %v4687_v39 = vcombine.low %v9402_v29, %v9426_v22  ;;  %v3204_v49 = vrot.slane %v3197_v60, %v7073_v10  ;;  %v3826_v3 = vcombine.low %v11414_v9, %v11413_v17  ;;  %v11418_v17 = vld [vmem:[#allocation97_spill] sm:$0xff]  ;;  %v11419_v9 = vld [vmem:[#allocation88_spill] sm:$0xff] }
 0x148   : > { %6576 = vmatmul.mubr.msk.f32.gmra.mrb[102].mxu1 %vm1473_vm9, %v3186_v40  ;;  %v4356_v62 = vcombine.low %v9407_v31, %v9430_v19  ;;  %v3816_v40 = vrot.slane %v3808_v44, %v7073_v10  ;;  %v9455_v0 = vcombine.high %v9434_v25, %v9434_v25  ;;  %v3842_v43 = vcombine.low %v11419_v9, %v11418_v17 }
 0x149   : > { %6647 = vmatmul.mubr.msk.f32.gmra.mrb[100].mxu0 %vm1473_vm9, %v3773_v15  ;;  %6578 = vmatprep.mubr.msk.f32.mxu1 %vm7017_vm3, %v11016_v18  ;;  %v11411_v15 = vld [vmem:[#allocation83_spill] sm:$0xff]  ;;  %v9461_v44 = vrot.slane %v4687_v39, %v7073_v10  ;;  %v3840_v39 = vrot.slane %v3826_v3, %v7073_v10 }
 0x14a   : > { %6649 = vmatprep.mubr.msk.f32.mxu0 %vm7017_vm3, %v11016_v18  ;;  %v3825_v7 = vcombine.low %v11412_v1, %v11411_v15  ;;  %v4357_v15 = vcombine.low %v9434_v25, %v9455_v0  ;;  %v11417_v1 = vld [vmem:[#allocation110_spill] sm:$0xff] }
 0x14b   : > { %11416 = vst [vmem:[#allocation48_spill] sm:$0xff] %v9461_v44  ;;  %v11421_v44 = vld [vmem:[#allocation102_spill] sm:$0xff] }
 0x14c   : > { %6579 = vmatmul.mubr.msk.f32.gmra.mrb[104].mxu1 %vm1473_vm9, %v3195_v34  ;;  %v9458_v34 = vrot.slane %v4356_v62, %v7073_v10  ;;  %v3833_v60 = vrot.slane %v3825_v7, %v7073_v10  ;;  %v3205_v62 = vcombine.low %v11417_v1, %v3204_v49  ;;  %v3207_v7 = vcombine.low %v11292_v26, %v11420_v24 }
 0x14d   : > { %6650 = vmatmul.mubr.msk.f32.gmra.mrb[102].mxu0 %vm1473_vm9, %v3790_v16  ;;  %6581 = vmatprep.mubr.msk.f32.mxu1 %vm7017_vm3, %v11016_v18  ;;  %v9466_v59 = vpop.f32.mrb[14].mxu0  ;;  %v3824_v16 = vcombine.low %v3816_v40, %v3823_v61  ;;  %v9486_v49 = vrot.slane %v4357_v15, %v7073_v10  ;;  %v11425_v40 = vld [vmem:[#allocation117_spill] sm:$0xff]  ;;  %v11426_v61 = vld [vmem:[#allocation104_spill] sm:$0xff] }
 0x14e   : > { %11415 = vst [vmem:[#allocation55_spill] sm:$0xff] %v9458_v34  ;;  %6652 = vmatprep.mubr.msk.f32.mxu0 %vm7017_vm3, %v11016_v18  ;;  %v6325_v52 = vpop.f32.mrb[15].mxu0  ;;  %v3859_v9 = vcombine.low %v11426_v61, %v11425_v40  ;;  %v3841_v1 = vcombine.low %v3833_v60, %v3840_v39  ;;  %v11429_v39 = vld [vmem:[#allocation144_spill] sm:$0xff]  ;;  %v11430_v61 = vld [vmem:[#allocation123_spill] sm:$0xff] }
 0x14f   : > { %11423 = vst [vmem:[#allocation61_spill] sm:$0xff] %v9486_v49  ;;  %v3235_v49 = vcombine.low %v9426_v22, %v9407_v31 }
 0x150   : > { %6582 = vmatmul.mubr.msk.f32.gmra.mrb[106].mxu1 %vm1473_vm9, %v9119_v42  ;;  %v3843_v42 = vcombine.low %v11422_v33, %v11421_v44  ;;  %v11427_v33 = vld [vmem:[#allocation126_spill] sm:$0xff]  ;;  %v3867_v60 = vrot.slane %v3859_v9, %v7073_v10  ;;  %v11434_v9 = vld [vmem:[#allocation149_spill] sm:$0xff] }
 0x151   : > { %6653 = vmatmul.mubr.msk.f32.gmra.mrb[104].mxu0 %vm1473_vm9, %v3807_v11  ;;  %6584 = vmatprep.mubr.msk.f32.mxu1 %vm7017_vm3, %v11016_v18  ;;  %v9490_v3 = vpop.f32.mrb[14].mxu1  ;;  %v3214_v11 = vrot.slane %v3207_v7, %v7073_v10  ;;  %v11428_v44 = vld [vmem:[#allocation122_spill] sm:$0xff] }
 0x152   : > { %6655 = vmatprep.mubr.msk.f32.mxu0 %vm7017_vm3, %v11016_v18  ;;  %11424 = vst [vmem:[#allocation59_spill] sm:$0xff] %v9490_v3  ;;  %v6364_v17 = vpop.f32.mrb[15].mxu1  ;;  %v3860_v15 = vcombine.low %v11428_v44, %v11427_v33  ;;  %v3857_v52 = vrot.slane %v3843_v42, %v7073_v10  ;;  %v3876_v33 = vcombine.low %v11430_v61, %v11429_v39  ;;  %v11431_v44 = vld [vmem:[#allocation147_spill] sm:$0xff] }
 0x153   : > { %v3850_v17 = vrot.slane %v3842_v43, %v7073_v10  ;;  %v3215_v40 = vcombine.low %v3214_v11, %v9066_v36  ;;  %v3217_v43 = vcombine.low %v11312_v57, %v11319_v63  ;;  %v11433_v11 = vld [vmem:[#allocation161_spill] sm:$0xff]  ;;  %v11435_v36 = vld [vmem:[#allocation164_spill] sm:$0xff]  ;;  %v11436_v57 = vld [vmem:[#allocation162_spill] sm:$0xff] }
 0x154   : > { %6585 = vmatmul.mubr.msk.f32.gmra.mrb[108].mxu1 %vm1473_vm9, %v3205_v62  ;;  %v3894_v63 = vcombine.low %v11436_v57, %v11435_v36  ;;  %v3884_v39 = vrot.slane %v3876_v33, %v7073_v10  ;;  %v3082_v36 = vcombine.high %v9404_v4, %v9404_v4 }
 0x155   : > { %6656 = vmatmul.mubr.msk.f32.gmra.mrb[106].mxu0 %vm1473_vm9, %v3824_v16  ;;  %6587 = vmatprep.mubr.msk.f32.mxu1 %vm7017_vm3, %v11016_v18  ;;  %v9507_v62 = vpop.f32.mrb[16].mxu0  ;;  %v3874_v16 = vrot.slane %v3860_v15, %v7073_v10  ;;  %v3858_v42 = vcombine.low %v3850_v17, %v3857_v52  ;;  %v3893_v15 = vcombine.low %v11434_v9, %v11433_v11  ;;  %v11439_v11 = vld [vmem:[#allocation183_spill] sm:$0xff]  ;;  %v11440_v9 = vld [vmem:[#allocation180_spill] sm:$0xff] }
 0x156   : > { %6658 = vmatprep.mubr.msk.f32.mxu0 %vm7017_vm3, %v11016_v18  ;;  %v6328_v7 = vpop.f32.mrb[17].mxu0  ;;  %v3224_v52 = vrot.slane %v3217_v43, %v7073_v10  ;;  %v3226_v17 = vcombine.low %v11329_v47, %v9402_v29  ;;  %v3537_v43 = vrot.slane %v9430_v19, 7  ;;  %v3911_v57 = vcombine.low %v11440_v9, %v11439_v11 }
 0x157   : > { %v11432_v7 = vld [vmem:[#allocation146_spill] sm:$0xff]  ;;  %v3901_v33 = vrot.slane %v3893_v15, %v7073_v10  ;;  %v3236_v15 = vcombine.low %v9430_v19, %v9434_v25 }
 0x158   : > { %6588 = vmatmul.mubr.msk.f32.gmra.mrb[110].mxu1 %vm1473_vm9, %v9129_v54  ;;  %v3877_v54 = vcombine.low %v11432_v7, %v11431_v44  ;;  %v11437_v44 = vld [vmem:[#allocation179_spill] sm:$0xff]  ;;  %v11438_v7 = vld [vmem:[#allocation165_spill] sm:$0xff]  ;;  %v3225_v34 = vcombine.low %v3224_v52, %v9136_v12  ;;  %v3233_v3 = vrot.slane %v3226_v17, %v7073_v10  ;;  %v3539_v19 = vrot.slane %v3537_v43, 2 }
 0x159   : > { %6659 = vmatmul.mubr.msk.f32.gmra.mrb[108].mxu0 %vm1473_vm9, %v3841_v1  ;;  %6590 = vmatprep.mubr.msk.f32.mxu1 %vm7017_vm3, %v11016_v18  ;;  %v3875_v1 = vcombine.low %v3867_v60, %v3874_v16  ;;  %v5917_v60 = vrot.slane %v9402_v29, 9  ;;  %v3531_v16 = vrot.slane %v9426_v22, 7  ;;  %v3910_v4 = vcombine.low %v11438_v7, %v11437_v44 }
 0x15a   : > { %6661 = vmatprep.mubr.msk.f32.mxu0 %vm7017_vm3, %v11016_v18  ;;  %v3891_v61 = vrot.slane %v3877_v54, %v7073_v10  ;;  %v3908_v54 = vrot.slane %v3894_v63, %v7073_v10  ;;  %v9565_v44 = vrot.slane %v3082_v36, %v7073_v10  ;;  %v3925_v36 = vrot.slane %v3911_v57, %v7073_v10 }
 0x15b   : > { %v3533_v52 = vrot.slane %v3531_v16, 2  ;;  %v9573_v22 = vsel %vm7113_vm8, %v5917_v60, %v3531_v16  ;;  %v3243_v12 = vrot.slane %v3235_v49, %v7073_v10  ;;  %v3250_v60 = vrot.slane %v3236_v15, %v7073_v10  ;;  %v11443_v16 = vld [vmem:[#allocation192_spill] sm:$0xff] }
 0x15c   : > { %6591 = vmatmul.mubr.msk.f32.gmra.mrb[112].mxu1 %vm1473_vm9, %v3215_v40  ;;  %v3534_v40 = vrot.slane %v9407_v31, 7  ;;  %v3892_v63 = vcombine.low %v3884_v39, %v3891_v61  ;;  %v3909_v39 = vcombine.low %v3901_v33, %v3908_v54  ;;  %v3918_v61 = vrot.slane %v3910_v4, %v7073_v10  ;;  %v11445_v33 = vld [vmem:[#allocation196_spill] sm:$0xff] }
 0x15d   : > { %6662 = vmatmul.mubr.msk.f32.gmra.mrb[110].mxu0 %vm1473_vm9, %v3858_v42  ;;  %6593 = vmatprep.mubr.msk.f32.mxu1 %vm7017_vm3, %v11016_v18  ;;  %v3540_v42 = vrot.slane %v9434_v25, 7  ;;  %v3928_v54 = vcombine.low %v11445_v33, %v9573_v22  ;;  %v9611_v4 = vcombine.high %v9565_v44, %v9565_v44  ;;  %v9615_v57 = vcombine.low %v3243_v12, %v3250_v60 }
 0x15e   : > { %6664 = vmatprep.mubr.msk.f32.mxu0 %vm7017_vm3, %v11016_v18  ;;  %v3536_v11 = vrot.slane %v3534_v40, 2 }
 0x15f   : > { %v3542_v25 = vrot.slane %v3540_v42, 2 }
 0x160   : > { %6594 = vmatmul.mubr.msk.f32.gmra.mrb[114].mxu1 %vm1473_vm9, %v9156_v50  ;;  %v9567_v7 = vpop.f32.mrb[16].mxu1  ;;  %v3234_v50 = vcombine.low %v9139_v20, %v3233_v3  ;;  %v9597_v49 = vsel %vm7113_vm8, %v3536_v11, %v3537_v43  ;;  %v3926_v43 = vcombine.low %v3918_v61, %v3925_v36 }
 0x161   : > { %6665 = vmatmul.mubr.msk.f32.gmra.mrb[112].mxu0 %vm1473_vm9, %v3875_v1  ;;  %6596 = vmatprep.mubr.msk.f32.mxu1 %vm7017_vm3, %v11016_v18  ;;  %11441 = vst [vmem:[#allocation74_spill] sm:$0xff] %v9567_v7  ;;  %v3543_v1 = vrot.slane %v9455_v0, 7  ;;  %v6367_v17 = vpop.f32.mrb[17].mxu1  ;;  %v11444_v7 = vld [vmem:[#allocation184_spill] sm:$0xff] }
 0x162   : > { %6667 = vmatprep.mubr.msk.f32.mxu0 %vm7017_vm3, %v11016_v18  ;;  %v9578_v9 = vpop.f32.mrb[18].mxu0  ;;  %v3927_v30 = vcombine.low %v11444_v7, %v11443_v16  ;;  %v6007_v16 = vld [vmem:[%s10605_s1 + $0x1c] sm:$0xf] }
 0x163   : > { %v6331_v28 = vpop.f32.mrb[19].mxu0  ;;  %v9607_v3 = vsel %vm7113_vm8, %v3542_v25, %v3543_v1  ;;  %v5946_v25 = vcombine.high %v7347_v37, %v7397_v21 }
 0x164   : > { %6597 = vmatmul.mubr.msk.f32.gmra.mrb[116].mxu1 %vm1473_vm9, %v3225_v34  ;;  %v9593_v34 = vsel %vm7113_vm8, %v3533_v52, %v3534_v40  ;;  %v9603_v28 = vsel %vm7113_vm8, %v3539_v19, %v3540_v42  ;;  %v3546_v40 = vrot.slane %v9565_v44, 7  ;;  %v3935_v15 = vrot.slane %v3927_v30, %v7073_v10 }
 0x165   : > { %6668 = vmatmul.mubr.msk.f32.gmra.mrb[114].mxu0 %vm1473_vm9, %v3892_v63  ;;  %6599 = vmatprep.mubr.msk.f32.mxu1 %vm7017_vm3, %v11016_v18  ;;  %v3252_v42 = vcombine.low %v9455_v0, %v9565_v44  ;;  %v3942_v63 = vrot.slane %v3928_v54, %v7073_v10  ;;  %v3944_v7 = vcombine.low %v9593_v34, %v9597_v49  ;;  %v3545_v30 = vrot.slane %v3543_v1, 2 }
 0x166   : > { %6670 = vmatprep.mubr.msk.f32.mxu0 %vm7017_vm3, %v11016_v18  ;;  %v3548_v0 = vrot.slane %v3546_v40, 2  ;;  %v3549_v52 = vrot.slane %v9611_v4, 7  ;;  %v4246_v21 = vrot.slane %v5946_v25, %v7073_v10 }
 0x167   : > { %v9636_v19 = vrot.slane %v3252_v42, %v7073_v10  ;;  %v3943_v17 = vcombine.low %v3935_v15, %v3942_v63  ;;  %v3952_v1 = vrot.slane %v3944_v7, %v7073_v10  ;;  %v9649_v61 = vsel %vm7113_vm8, %v3545_v30, %v3546_v40  ;;  %v11446_v40 = vld [vmem:[#allocation204_spill] sm:$0xff]  ;;  %v11448_v42 = vld [vmem:[#allocation67_spill] sm:$0xff]  ;;  %v11449_v63 = vld [vmem:[#allocation54_spill] sm:$0xff] }
 0x168   : > { %6600 = vmatmul.mubr.msk.f32.gmra.mrb[118].mxu1 %vm1473_vm9, %v3234_v50  ;;  %v3945_v50 = vcombine.low %v9603_v28, %v9607_v3  ;;  %v9628_v12 = vpop.f32.mrb[18].mxu1  ;;  %v9653_v37 = vsel %vm7113_vm8, %v3548_v0, %v3549_v52  ;;  %v4248_v7 = vcombine.low %v11449_v63, %v11448_v42  ;;  %v11456_v42 = vld [vmem:[#allocation208_spill] sm:$0xff] }
 0x169   : > { %6671 = vmatmul.mubr.msk.f32.gmra.mrb[116].mxu0 %vm1473_vm9, %v3909_v39  ;;  %6602 = vmatprep.mubr.msk.f32.mxu1 %vm7017_vm3, %v11016_v18  ;;  %v6370_v11 = vpop.f32.mrb[19].mxu1  ;;  %v3961_v60 = vcombine.low %v9649_v61, %v9653_v37 }
 0x16a   : > { %6673 = vmatprep.mubr.msk.f32.mxu0 %vm7017_vm3, %v11016_v18  ;;  %v3959_v39 = vrot.slane %v3945_v50, %v7073_v10  ;;  %v4255_v52 = vrot.slane %v4248_v7, %v7073_v10  ;;  %v6034_v11 = vld [vmem:[%s10605_s1 + $0x20] sm:$0xf] }
 0x16b   : > { %v3968_v50 = vrot.slane %v3961_v60, %v7073_v10  ;;  %v5947_v60 = vcombine.high %v7717_v13, %v7799_v53 }
 0x16c   : > { %6603 = vmatmul.mubr.msk.f32.gmra.mrb[120].mxu1 %vm1473_vm9, %v9615_v57  ;;  %v3960_v36 = vcombine.low %v3952_v1, %v3959_v39  ;;  %v11450_v1 = vld [vmem:[#allocation211_spill] sm:$0xff] }
 0x16d   : > { %6674 = vmatmul.mubr.msk.f32.gmra.mrb[118].mxu0 %vm1473_vm9, %v3926_v43  ;;  %6605 = vmatprep.mubr.msk.f32.mxu1 %vm7017_vm3, %v11016_v18  ;;  %v11447_v43 = vld [vmem:[#allocation205_spill] sm:$0xff] }
 0x16e   : > { %6676 = vmatprep.mubr.msk.f32.mxu0 %vm7017_vm3, %v11016_v18  ;;  %v4247_v15 = vcombine.low %v11447_v43, %v4246_v21  ;;  %v11451_v21 = vld [vmem:[#allocation210_spill] sm:$0xff] }
 0x170   : > { %6606 = vmatmul.mubr.msk.f32.gmra.mrb[122].mxu1 %vm1473_vm9, %v9636_v19 }
 0x171   : > { %6677 = vmatmul.mubr.msk.f32.gmra.mrb[120].mxu0 %vm1473_vm9, %v3943_v17  ;;  %6687 = vmatprep.mubr.msk.f32.mxu1 %vm7017_vm3, %v11016_v18 }
 0x172   : > { %6679 = vmatprep.mubr.msk.f32.mxu0 %vm7017_vm3, %v11016_v18  ;;  %v9668_v33 = vpop.f32.mrb[20].mxu0 }
 0x173   : > { %v6334_v54 = vpop.f32.mrb[21].mxu0 }
 0x174   : > { %6688 = vmatmul.mubr.msk.f32.vlgmr.msra.gmra.mrb[124].mxu1 %vm1473_vm9, %v11446_v40  ;;  %v9678_v30 = vpop.f32.mrb[20].mxu1  ;;  %v11453_v54 = vld [vmem:[#allocation207_spill] sm:$0xff] }
 0x175   : > { %6680 = vmatmul.mubr.msk.f32.gmra.mrb[122].mxu0 %vm1473_vm9, %v3960_v36  ;;  %6840 = vmatpush3.msk.msra.mxu1 %vm1524_vm0, %v6007_v16  ;;  %v6373_v0 = vpop.f32.mrb[21].mxu1  ;;  %v4256_v36 = vcombine.low %v4255_v52, %v11451_v21  ;;  %v11452_v16 = vld [vmem:[#allocation206_spill] sm:$0xff]  ;;  %v11458_v52 = vld [vmem:[#allocation107_spill] sm:$0xff] }
 0x176   : > { %6682 = vmatprep.mubr.msk.f32.mxu0 %vm7017_vm3, %v11016_v18  ;;  %6690 = vmatprep.mubr.msk.f32.mxu1 %vm7017_vm3, %v11016_v18  ;;  %v11454_v40 = vcombine.low %v11452_v16, %v11453_v54  ;;  %v11457_v0 = vld [vmem:[#allocation121_spill] sm:$0xff] }
 0x178   : > { %6691 = vmatmul.mubr.msk.f32.gmra.mrb[126].mxu1 %vm1473_vm9, %v4247_v15  ;;  %v11455_v15 = vld [vmem:[#allocation209_spill] sm:$0xff] }
 0x179   : > { %6683 = vmatmul.mubr.msk.f32.gmra.mrb[124].mxu0 %vm1473_vm9, %v3968_v50  ;;  %6693 = vmatprep.mubr.msk.f32.mxu1 %vm7017_vm3, %v11016_v18  ;;  %v4667_v63 = vcombine.low %v11456_v42, %v11455_v15  ;;  %v4264_v50 = vrot.slane %v5947_v60, %v7073_v10  ;;  %v11460_v60 = vld [vmem:[#allocation115_spill] sm:$0xff]  ;;  %v11462_v42 = vld [vmem:[#allocation106_spill] sm:$0xff] }
 0x17a   : > { %6764 = vmatprep.mubr.msk.f32.mxu0 %vm7017_vm3, %v11016_v18 }
 0x17b   : > { %v9694_v25 = vpop.f32.mrb[22].mxu1 }
 0x17c   : > { %v9696_v17 = vpop.f32.mrb[22].mxu0  ;;  %6694 = vmatmul.mubr.msk.f32.gmra.mrb[128].mxu1 %vm1473_vm9, %v11450_v1  ;;  %v6376_v39 = vpop.f32.mrb[23].mxu1  ;;  %v4266_v1 = vcombine.low %v11458_v52, %v11457_v0  ;;  %v11464_v52 = vld [vmem:[#allocation215_spill] sm:$0xff] }
 0x17d   : > { %6765 = vmatmul.mubr.msk.f32.vlgmr.msra.gmra.mrb[126].mxu0 %vm1473_vm9, %v11454_v40  ;;  %v6337_v43 = vpop.f32.mrb[23].mxu0  ;;  %6696 = vmatprep.mubr.msk.f32.mxu1 %vm7017_vm3, %v11016_v18  ;;  %v11459_v39 = vld [vmem:[#allocation212_spill] sm:$0xff]  ;;  %v11461_v40 = vld [vmem:[#allocation143_spill] sm:$0xff] }
 0x17e   : > { %6917 = vmatpush3.msk.msra.mxu0 %vm1524_vm0, %v6034_v11  ;;  %6767 = vmatprep.mubr.msk.f32.mxu0 %vm7017_vm3, %v11016_v18  ;;  %v4668_v16 = vcombine.low %v11451_v21, %v11459_v39  ;;  %v4265_v43 = vcombine.low %v4264_v50, %v11461_v40  ;;  %v4273_v15 = vrot.slane %v4266_v1, %v7073_v10 }
 0x17f   : > { %v2253_v7 = vpop.f32.mrb[24].mxu1  ;;  %v5948_v39 = vcombine.high %v8020_v6, %v11217_v38 }
 0x180   : > { %v2254_v13 = vadd.f32 %v2253_v7, %v9039_v2  ;;  %6697 = vmatmul.mubr.msk.f32.gmra.mrb[130].mxu1 %vm1473_vm9, %v4256_v36  ;;  %v6381_v53 = vpop.f32.mrb[25].mxu1  ;;  %v4274_v1 = vcombine.low %v11464_v52, %v4273_v15 }
 0x181   : > { %6768 = vmatmul.mubr.msk.f32.gmra.mrb[128].mxu0 %vm1473_vm9, %v4667_v63  ;;  %6699 = vmatprep.mubr.msk.f32.mxu1 %vm7017_vm3, %v11016_v18  ;;  %v11463_v63 = vld [vmem:[#allocation213_spill] sm:$0xff]  ;;  %v4282_v38 = vrot.slane %v5948_v39, %v7073_v10 }
 0x182   : > { %6770 = vmatprep.mubr.msk.f32.mxu0 %vm7017_vm3, %v11016_v18  ;;  %v4669_v7 = vcombine.low %v11463_v63, %v11462_v42 }
 0x183   : > { %v2258_v2 = vpop.f32.mrb[26].mxu1 }
 0x184   : > { %v9726_v11 = vpop.f32.mrb[24].mxu0  ;;  %v2259_v36 = vadd.f32 %v2258_v2, %v9092_v48  ;;  %6700 = vmatmul.mubr.msk.f32.gmra.mrb[132].mxu1 %vm1473_vm9, %v11460_v60  ;;  %v6384_v54 = vpop.f32.mrb[27].mxu1  ;;  %v4670_v60 = vcombine.low %v11461_v40, %v11464_v52  ;;  %v11465_v40 = vld [vmem:[#allocation124_spill] sm:$0xff]  ;;  %v11469_v52 = vld [vmem:[#allocation194_spill] sm:$0xff] }
 0x185   : > { %v6340_v21 = vpop.f32.mrb[25].mxu0  ;;  %6771 = vmatmul.mubr.msk.f32.gmra.mrb[130].mxu0 %vm1473_vm9, %v4668_v16  ;;  %6702 = vmatprep.mubr.msk.f32.mxu1 %vm7017_vm3, %v11016_v18 }
 0x186   : > { %6773 = vmatprep.mubr.msk.f32.mxu0 %vm7017_vm3, %v11016_v18  ;;  %v11466_v21 = vld [vmem:[#allocation140_spill] sm:$0xff] }
 0x187   : > { %v2263_v48 = vpop.f32.mrb[28].mxu1  ;;  %v4671_v42 = vcombine.low %v11466_v21, %v11465_v40 }
 0x188   : > { %v2914_v53 = vpop.f32.mrb[26].mxu0  ;;  %v2264_v0 = vadd.f32 %v2263_v48, %v9169_v5  ;;  %6703 = vmatmul.mubr.msk.f32.gmra.mrb[134].mxu1 %vm1473_vm9, %v4265_v43  ;;  %v6387_v50 = vpop.f32.mrb[29].mxu1  ;;  %v11467_v48 = vld [vmem:[#allocation166_spill] sm:$0xff] }
 0x189   : > { %v9745_v16 = vadd.f32 %v2914_v53, %v2254_v13  ;;  %v6458_v2 = vpop.f32.mrb[27].mxu0  ;;  %6774 = vmatmul.mubr.msk.f32.gmra.mrb[132].mxu0 %vm1473_vm9, %v4669_v7  ;;  %6705 = vmatprep.mubr.msk.f32.mxu1 %vm7017_vm3, %v11016_v18  ;;  %v11468_v53 = vld [vmem:[#allocation217_spill] sm:$0xff] }
 0x18a   : > { %6776 = vmatprep.mubr.msk.f32.mxu0 %vm7017_vm3, %v11016_v18  ;;  %v4283_v50 = vcombine.low %v11468_v53, %v4282_v38 }
 0x18b   : > { %v2268_v5 = vpop.f32.mrb[30].mxu1 }
 0x18c   : > { %v2919_v54 = vpop.f32.mrb[28].mxu0  ;;  %v2269_v43 = vadd.f32 %v2268_v5, %v9236_v58  ;;  %6706 = vmatmul.mubr.msk.f32.gmra.mrb[136].mxu1 %vm1473_vm9, %v4274_v1  ;;  %v6390_v6 = vpop.f32.mrb[31].mxu1  ;;  %v11470_v1 = vld [vmem:[#allocation185_spill] sm:$0xff] }
 0x18d   : > { %v9757_v13 = vadd.f32 %v2919_v54, %v2259_v36  ;;  %v6461_v15 = vpop.f32.mrb[29].mxu0  ;;  %6777 = vmatmul.mubr.msk.f32.gmra.mrb[134].mxu0 %vm1473_vm9, %v4670_v60  ;;  %6708 = vmatprep.mubr.msk.f32.mxu1 %vm7017_vm3, %v11016_v18  ;;  %v4284_v39 = vcombine.low %v11470_v1, %v11469_v52  ;;  %v11471_v5 = vld [vmem:[#allocation145_spill] sm:$0xff]  ;;  %v5949_v1 = vcombine.high %v11381_v35, %v11380_v27 }
 0x18e   : > { %6779 = vmatprep.mubr.msk.f32.mxu0 %vm7017_vm3, %v11016_v18  ;;  %v4672_v54 = vcombine.low %v11471_v5, %v11468_v53  ;;  %v11474_v53 = vld [vmem:[#allocation224_spill] sm:$0xff]  ;;  %v11476_v5 = vld [vmem:[#allocation163_spill] sm:$0xff] }
 0x18f   : > { %v2273_v58 = vpop.f32.mrb[32].mxu1  ;;  %v4291_v15 = vrot.slane %v4284_v39, %v7073_v10  ;;  %v4300_v35 = vrot.slane %v5949_v1, %v7073_v10 }
 0x190   : > { %v2924_v63 = vpop.f32.mrb[30].mxu0  ;;  %v2274_v7 = vadd.f32 %v2273_v58, %v9277_v56  ;;  %6709 = vmatmul.mubr.msk.f32.gmra.mrb[138].mxu1 %vm1473_vm9, %v11467_v48  ;;  %v6393_v36 = vpop.f32.mrb[33].mxu1  ;;  %v11473_v58 = vld [vmem:[#allocation218_spill] sm:$0xff] }
 0x191   : > { %v9772_v2 = vadd.f32 %v2924_v63, %v2264_v0  ;;  %v6464_v60 = vpop.f32.mrb[31].mxu0  ;;  %6780 = vmatmul.mubr.msk.f32.gmra.mrb[136].mxu0 %vm1473_vm9, %v4671_v42  ;;  %6711 = vmatprep.mubr.msk.f32.mxu1 %vm7017_vm3, %v11016_v18  ;;  %v11472_v42 = vld [vmem:[#allocation221_spill] sm:$0xff] }
 0x192   : > { %6782 = vmatprep.mubr.msk.f32.mxu0 %vm7017_vm3, %v11016_v18  ;;  %v4673_v63 = vcombine.low %v11473_v58, %v11472_v42 }
 0x193   : > { %v2278_v56 = vpop.f32.mrb[34].mxu1 }
 0x194   : > { %v2929_v6 = vpop.f32.mrb[32].mxu0  ;;  %v2279_v38 = vadd.f32 %v2278_v56, %v9332_v55  ;;  %6712 = vmatmul.mubr.msk.f32.gmra.mrb[140].mxu1 %vm1473_vm9, %v4283_v50  ;;  %v6396_v0 = vpop.f32.mrb[35].mxu1  ;;  %v11475_v50 = vld [vmem:[#allocation223_spill] sm:$0xff] }
 0x195   : > { %v9784_v40 = vadd.f32 %v2929_v6, %v2269_v43  ;;  %v6467_v21 = vpop.f32.mrb[33].mxu0  ;;  %6783 = vmatmul.mubr.msk.f32.gmra.mrb[138].mxu0 %vm1473_vm9, %v4672_v54  ;;  %6714 = vmatprep.mubr.msk.f32.mxu1 %vm7017_vm3, %v11016_v18  ;;  %v4292_v52 = vcombine.low %v4291_v15, %v11475_v50  ;;  %v11477_v54 = vld [vmem:[#allocation222_spill] sm:$0xff]  ;;  %v11479_v15 = vld [vmem:[#allocation19_spill] sm:$0xff] }
 0x196   : > { %6785 = vmatprep.mubr.msk.f32.mxu0 %vm7017_vm3, %v11016_v18  ;;  %v4674_v56 = vcombine.low %v11477_v54, %v11476_v5  ;;  %v11483_v54 = vld [vmem:[#allocation23_spill] sm:$0xff] }
 0x197   : > { %v2283_v55 = vpop.f32.mrb[36].mxu1 }
 0x198   : > { %v2934_v48 = vpop.f32.mrb[34].mxu0  ;;  %v2284_v36 = vadd.f32 %v2283_v55, %v9383_v46  ;;  %6715 = vmatmul.mubr.msk.f32.gmra.mrb[142].mxu1 %vm1473_vm9, %v11474_v53  ;;  %v6399_v43 = vpop.f32.mrb[37].mxu1 }
 0x199   : > { %v9799_v39 = vadd.f32 %v2934_v48, %v2274_v7  ;;  %v6470_v60 = vpop.f32.mrb[35].mxu0  ;;  %6786 = vmatmul.mubr.msk.f32.gmra.mrb[140].mxu0 %vm1473_vm9, %v4673_v63  ;;  %6717 = vmatprep.mubr.msk.f32.mxu1 %vm7017_vm3, %v11016_v18  ;;  %v11478_v7 = vld [vmem:[#allocation30_spill] sm:$0xff]  ;;  %v11481_v43 = vld [vmem:[#allocation15_spill] sm:$0xff] }
 0x19a   : > { %6788 = vmatprep.mubr.msk.f32.mxu0 %vm7017_vm3, %v11016_v18  ;;  %v4302_v21 = vcombine.low %v11479_v15, %v11478_v7  ;;  %v11480_v63 = vld [vmem:[#allocation2_spill] sm:$0xff]  ;;  %v5950_v15 = vcombine.high %v11399_v8, %v11398_v14 }
 0x19b   : > { %v2288_v46 = vpop.f32.mrb[38].mxu1  ;;  %v4675_v55 = vcombine.low %v11475_v50, %v11480_v63 }
 0x19c   : > { %v2939_v6 = vpop.f32.mrb[36].mxu0  ;;  %v2289_v0 = vadd.f32 %v2288_v46, %v9466_v59  ;;  %6718 = vmatmul.mubr.msk.f32.gmra.mrb[144].mxu1 %vm1473_vm9, %v4292_v52  ;;  %v6402_v27 = vpop.f32.mrb[39].mxu1  ;;  %v11482_v52 = vld [vmem:[#allocation17_spill] sm:$0xff]  ;;  %v4309_v60 = vrot.slane %v4302_v21, %v7073_v10  ;;  %v4318_v14 = vrot.slane %v5950_v15, %v7073_v10 }
 0x19d   : > { %v9813_v42 = vadd.f32 %v2939_v6, %v2279_v38  ;;  %v6473_v58 = vpop.f32.mrb[37].mxu0  ;;  %6789 = vmatmul.mubr.msk.f32.gmra.mrb[142].mxu0 %vm1473_vm9, %v4674_v56  ;;  %6720 = vmatprep.mubr.msk.f32.mxu1 %vm7017_vm3, %v11016_v18  ;;  %v4301_v1 = vcombine.low %v4300_v35, %v11482_v52  ;;  %v11484_v56 = vld [vmem:[#allocation5_spill] sm:$0xff]  ;;  %v11485_v35 = vld [vmem:[#allocation6_spill] sm:$0xff] }
 0x19e   : > { %6791 = vmatprep.mubr.msk.f32.mxu0 %vm7017_vm3, %v11016_v18  ;;  %v4676_v46 = vcombine.low %v11484_v56, %v11483_v54  ;;  %v4310_v7 = vcombine.low %v11485_v35, %v4309_v60  ;;  %v4677_v63 = vcombine.low %v11482_v52, %v11485_v35  ;;  %v11489_v54 = vld [vmem:[#allocation27_spill] sm:$0xff] }
 0x19f   : > { %v2293_v59 = vpop.f32.mrb[40].mxu1  ;;  %v4319_v56 = vcombine.low %v11489_v54, %v4318_v14  ;;  %v11493_v14 = vld [vmem:[#allocation73_spill] sm:$0xff] }
 0x1a0   : > { %v2944_v48 = vpop.f32.mrb[38].mxu0  ;;  %v2294_v53 = vadd.f32 %v2293_v59, %v9507_v62  ;;  %6721 = vmatmul.mubr.msk.f32.gmra.mrb[146].mxu1 %vm1473_vm9, %v11481_v43  ;;  %v6405_v38 = vpop.f32.mrb[41].mxu1  ;;  %v11486_v43 = vld [vmem:[#allocation42_spill] sm:$0xff] }
 0x1a1   : > { %v9827_v5 = vadd.f32 %v2944_v48, %v2284_v36  ;;  %v6476_v50 = vpop.f32.mrb[39].mxu0  ;;  %6792 = vmatmul.mubr.msk.f32.gmra.mrb[144].mxu0 %vm1473_vm9, %v4675_v55  ;;  %6723 = vmatprep.mubr.msk.f32.mxu1 %vm7017_vm3, %v11016_v18  ;;  %v11487_v38 = vld [vmem:[#allocation226_spill] sm:$0xff] }
 0x1a2   : > { %6794 = vmatprep.mubr.msk.f32.mxu0 %vm7017_vm3, %v11016_v18  ;;  %v4678_v52 = vcombine.low %v11487_v38, %v11486_v43  ;;  %v11488_v50 = vld [vmem:[#allocation14_spill] sm:$0xff] }
 0x1a3   : > { %v2298_v62 = vpop.f32.mrb[42].mxu1 }
 0x1a4   : > { %v2949_v6 = vpop.f32.mrb[40].mxu0  ;;  %v2299_v27 = vadd.f32 %v2298_v62, %v9578_v9  ;;  %6724 = vmatmul.mubr.msk.f32.gmra.mrb[148].mxu1 %vm1473_vm9, %v4301_v1  ;;  %v6408_v36 = vpop.f32.mrb[43].mxu1  ;;  %v11491_v62 = vld [vmem:[#allocation78_spill] sm:$0xff] }
 0x1a5   : > { %v9841_v21 = vadd.f32 %v2949_v6, %v2289_v0  ;;  %v6479_v58 = vpop.f32.mrb[41].mxu0  ;;  %6795 = vmatmul.mubr.msk.f32.gmra.mrb[146].mxu0 %vm1473_vm9, %v4676_v46  ;;  %6726 = vmatprep.mubr.msk.f32.mxu1 %vm7017_vm3, %v11016_v18  ;;  %v11490_v46 = vld [vmem:[#allocation87_spill] sm:$0xff] }
 0x1a6   : > { %6797 = vmatprep.mubr.msk.f32.mxu0 %vm7017_vm3, %v11016_v18  ;;  %v4320_v6 = vcombine.low %v11491_v62, %v11490_v46  ;;  %v11498_v62 = vld [vmem:[#allocation58_spill] sm:$0xff] }
 0x1a7   : > { %v2303_v9 = vpop.f32.mrb[44].mxu1 }
 0x1a8   : > { %v2954_v55 = vpop.f32.mrb[42].mxu0  ;;  %v2304_v59 = vadd.f32 %v2303_v9, %v9668_v33  ;;  %6727 = vmatmul.mubr.msk.f32.gmra.mrb[150].mxu1 %vm1473_vm9, %v4310_v7  ;;  %v6411_v8 = vpop.f32.mrb[45].mxu1  ;;  %v11492_v7 = vld [vmem:[#allocation44_spill] sm:$0xff]  ;;  %v4327_v9 = vrot.slane %v4320_v6, %v7073_v10  ;;  %v11499_v6 = vld [vmem:[#allocation79_spill] sm:$0xff] }
 0x1a9   : > { %v9853_v0 = vadd.f32 %v2954_v55, %v2294_v53  ;;  %v6482_v48 = vpop.f32.mrb[43].mxu0  ;;  %6798 = vmatmul.mubr.msk.f32.gmra.mrb[148].mxu0 %vm1473_vm9, %v4677_v63  ;;  %6729 = vmatprep.mubr.msk.f32.mxu1 %vm7017_vm3, %v11016_v18  ;;  %v4679_v15 = vcombine.low %v11492_v7, %v11489_v54  ;;  %v5951_v54 = vcombine.high %v11292_v26, %v11420_v24 }
 0x1aa   : > { %6800 = vmatprep.mubr.msk.f32.mxu0 %vm7017_vm3, %v11016_v18  ;;  %v11494_v48 = vld [vmem:[#allocation32_spill] sm:$0xff] }
 0x1ab   : > { %v2308_v33 = vpop.f32.mrb[46].mxu1  ;;  %v4680_v43 = vcombine.low %v11494_v48, %v11493_v14  ;;  %v4336_v24 = vrot.slane %v5951_v54, %v7073_v10  ;;  %v11504_v54 = vld [vmem:[#allocation141_spill] sm:$0xff] }
 0x1ac   : > { %v2959_v1 = vpop.f32.mrb[44].mxu0  ;;  %v2309_v60 = vadd.f32 %v2308_v33, %v9696_v17  ;;  %6730 = vmatmul.mubr.msk.f32.gmra.mrb[152].mxu1 %vm1473_vm9, %v11488_v50  ;;  %v6414_v53 = vpop.f32.mrb[47].mxu1  ;;  %v11497_v50 = vld [vmem:[#allocation109_spill] sm:$0xff] }
 0x1ad   : > { %v9868_v36 = vadd.f32 %v2959_v1, %v2299_v27  ;;  %v6485_v35 = vpop.f32.mrb[45].mxu0  ;;  %6801 = vmatmul.mubr.msk.f32.gmra.mrb[150].mxu0 %vm1473_vm9, %v4678_v52  ;;  %6732 = vmatprep.mubr.msk.f32.mxu1 %vm7017_vm3, %v11016_v18  ;;  %v11495_v52 = vld [vmem:[#allocation139_spill] sm:$0xff]  ;;  %v11496_v1 = vld [vmem:[#allocation92_spill] sm:$0xff]  ;;  %v4328_v53 = vcombine.low %v4327_v9, %v11497_v50 }
 0x1ae   : > { %6803 = vmatprep.mubr.msk.f32.mxu0 %vm7017_vm3, %v11016_v18  ;;  %v4681_v35 = vcombine.low %v11499_v6, %v11498_v62  ;;  %v5952_v6 = vcombine.high %v11329_v47, %v9402_v29  ;;  %v202_v47 = vld [vmem:[%s7065_s19 + $0xf8] sm:$0xff] }
 0x1af   : > { %v2313_v17 = vpop.f32.mrb[48].mxu1 }
 0x1b0   : > { %v2964_v58 = vpop.f32.mrb[46].mxu0  ;;  %v2314_v63 = vadd.f32 %v2313_v17, %v9726_v11  ;;  %6733 = vmatmul.mubr.msk.f32.gmra.mrb[154].mxu1 %vm1473_vm9, %v4319_v56  ;;  %v6417_v27 = vpop.f32.mrb[49].mxu1  ;;  %v4354_v29 = vrot.slane %v5952_v6, %v7073_v10 }
 0x1b1   : > { %v9880_v55 = vadd.f32 %v2964_v58, %v2304_v59  ;;  %v6488_v8 = vpop.f32.mrb[47].mxu0  ;;  %6804 = vmatmul.mubr.msk.f32.gmra.mrb[152].mxu0 %vm1473_vm9, %v4679_v15  ;;  %6735 = vmatprep.mubr.msk.f32.mxu1 %vm7017_vm3, %v11016_v18 }
 0x1b2   : > { %6806 = vmatprep.mubr.msk.f32.mxu0 %vm7017_vm3, %v11016_v18  ;;  %v11501_v8 = vld [vmem:[#allocation227_spill] sm:$0xff] }
 0x1b3   : > { %v2318_v11 = vpop.f32.mrb[50].mxu1  ;;  %v4682_v14 = vcombine.low %v11497_v50, %v11501_v8  ;;  %v11506_v8 = vld [vmem:[#allocation28_spill] sm:$0xff] }
 0x1b4   : > { %v2969_v38 = vpop.f32.mrb[48].mxu0  ;;  %v2319_v33 = vadd.f32 %v2318_v11, %v11495_v52  ;;  %6736 = vmatmul.mubr.msk.f32.gmra.mrb[156].mxu1 %vm1473_vm9, %v11496_v1  ;;  %v6420_v59 = vpop.f32.mrb[51].mxu1 }
 0x1b5   : > { %v9895_v56 = vadd.f32 %v2969_v38, %v2309_v60  ;;  %v6491_v46 = vpop.f32.mrb[49].mxu0  ;;  %6807 = vmatmul.mubr.msk.f32.gmra.mrb[154].mxu0 %vm1473_vm9, %v4680_v43  ;;  %6738 = vmatprep.mubr.msk.f32.mxu1 %vm7017_vm3, %v11016_v18  ;;  %v11500_v60 = vld [vmem:[#allocation156_spill] sm:$0xff]  ;;  %v11503_v38 = vld [vmem:[#allocation137_spill] sm:$0xff] }
 0x1b6   : > { %6809 = vmatprep.mubr.msk.f32.mxu0 %vm7017_vm3, %v11016_v18  ;;  %v4338_v58 = vcombine.low %v11313_v41, %v11500_v60  ;;  %v11502_v41 = vld [vmem:[#allocation138_spill] sm:$0xff]  ;;  %v4337_v52 = vcombine.low %v4336_v24, %v11503_v38  ;;  %v11505_v46 = vld [vmem:[#allocation228_spill] sm:$0xff] }
 0x1b7   : > { %v2323_v7 = vpop.f32.mrb[52].mxu1  ;;  %v4683_v62 = vcombine.low %v11505_v46, %v11504_v54  ;;  %v11510_v46 = vld [vmem:[#allocation46_spill] sm:$0xff] }
 0x1b8   : > { %v2974_v15 = vpop.f32.mrb[50].mxu0  ;;  %v2324_v17 = vadd.f32 %v2323_v7, %v9147_v45  ;;  %6739 = vmatmul.mubr.msk.f32.gmra.mrb[158].mxu1 %vm1473_vm9, %v4328_v53  ;;  %v6423_v26 = vpop.f32.mrb[53].mxu1  ;;  %v201_v45 = vld [vmem:[%s7065_s19 + $0xf0] sm:$0xff]  ;;  %v4345_v1 = vrot.slane %v4338_v58, %v7073_v10  ;;  %v4684_v58 = vcombine.low %v11503_v38, %v9044_v51  ;;  %v11508_v38 = vld [vmem:[#allocation155_spill] sm:$0xff] }
 0x1b9   : > { %v9909_v27 = vadd.f32 %v2974_v15, %v2314_v63  ;;  %v6494_v9 = vpop.f32.mrb[51].mxu0  ;;  %6810 = vmatmul.mubr.msk.f32.gmra.mrb[156].mxu0 %vm1473_vm9, %v4681_v35  ;;  %6741 = vmatprep.mubr.msk.f32.mxu1 %vm7017_vm3, %v11016_v18  ;;  %v233_v59 = vmax.f32 %v201_v45, 0.0 }
 0x1ba   : > { %6812 = vmatprep.mubr.msk.f32.mxu0 %vm7017_vm3, %v11016_v18  ;;  %v4346_v15 = vcombine.low %v9044_v51, %v4345_v1  ;;  %v234_v51 = vmax.f32 %v202_v47, 0.0 }
 0x1bb   : > { %v2328_v48 = vpop.f32.mrb[54].mxu1  ;;  %v4631_v26 = vcombine.high %v233_v59, %v233_v59  ;;  %v9950_v9 = vrot.slane %v233_v59, %v7073_v10  ;;  %v11509_v59 = vld [vmem:[#allocation231_spill] sm:$0xff] }
 0x1bc   : > { %v2979_v43 = vpop.f32.mrb[52].mxu0  ;;  %v2329_v11 = vadd.f32 %v2328_v48, %v9195_v32  ;;  %6742 = vmatmul.mubr.msk.f32.gmra.mrb[160].mxu1 %vm1473_vm9, %v11502_v41  ;;  %v6426_v63 = vpop.f32.mrb[55].mxu1 }
 0x1bd   : > { %v9924_v50 = vadd.f32 %v2979_v43, %v2319_v33  ;;  %v6497_v53 = vpop.f32.mrb[53].mxu0  ;;  %6813 = vmatmul.mubr.msk.f32.gmra.mrb[158].mxu0 %vm1473_vm9, %v4682_v14  ;;  %6744 = vmatprep.mubr.msk.f32.mxu1 %vm7017_vm3, %v11016_v18  ;;  %v9955_v48 = vrot.slane %v4631_v26, %v7073_v10  ;;  %v11507_v63 = vld [vmem:[#allocation172_spill] sm:$0xff]  ;;  %v4696_v54 = vcombine.low %v9565_v44, %v9950_v9 }
 0x1be   : > { %6815 = vmatprep.mubr.msk.f32.mxu0 %vm7017_vm3, %v11016_v18  ;;  %v4355_v53 = vcombine.low %v11509_v59, %v4354_v29 }
 0x1bf   : > { %v2333_v32 = vpop.f32.mrb[56].mxu1  ;;  %v4703_v29 = vrot.slane %v4696_v54, %v7073_v10 }
 0x1c0   : > { %v2984_v35 = vpop.f32.mrb[54].mxu0  ;;  %v2334_v33 = vadd.f32 %v2333_v32, %v9254_v23  ;;  %6745 = vmatmul.mubr.msk.f32.gmra.mrb[162].mxu1 %vm1473_vm9, %v4337_v52  ;;  %v6429_v7 = vpop.f32.mrb[57].mxu1  ;;  %v4685_v52 = vcombine.low %v11508_v38, %v11507_v63  ;;  %v11511_v32 = vld [vmem:[#allocation230_spill] sm:$0xff] }
 0x1c1   : > { %v9938_v24 = vadd.f32 %v2984_v35, %v2324_v17  ;;  %v6500_v60 = vpop.f32.mrb[55].mxu0  ;;  %6816 = vmatmul.mubr.msk.f32.gmra.mrb[160].mxu0 %vm1473_vm9, %v4683_v62  ;;  %6747 = vmatprep.mubr.msk.f32.mxu1 %vm7017_vm3, %v11016_v18  ;;  %v9974_v35 = vcombine.high %v9950_v9, %v9950_v9  ;;  %v9978_v7 = vcombine.high %v9955_v48, %v9955_v48 }
 0x1c2   : > { %6818 = vmatprep.mubr.msk.f32.mxu0 %vm7017_vm3, %v11016_v18 }
 0x1c3   : > { %v2338_v23 = vpop.f32.mrb[58].mxu1  ;;  %v4705_v63 = vcombine.low %v9974_v35, %v9955_v48  ;;  %v5394_v31 = vcombine.low %v9955_v48, %v9978_v7 }
 0x1c4   : > { %v2989_v17 = vpop.f32.mrb[56].mxu0  ;;  %v2339_v14 = vadd.f32 %v2338_v23, %v11506_v8  ;;  %6748 = vmatmul.mubr.msk.f32.gmra.mrb[164].mxu1 %vm1473_vm9, %v4346_v15  ;;  %v6432_v45 = vpop.f32.mrb[59].mxu1  ;;  %v9981_v15 = vrot.slane %v234_v51, %v7073_v10  ;;  %v11513_v8 = vld [vmem:[#allocation43_spill] sm:$0xff] }
 0x1c5   : > { %v9957_v43 = vadd.f32 %v2989_v17, %v2329_v11  ;;  %v6503_v41 = vpop.f32.mrb[57].mxu0  ;;  %6819 = vmatmul.mubr.msk.f32.gmra.mrb[162].mxu0 %vm1473_vm9, %v4684_v58  ;;  %6750 = vmatprep.mubr.msk.f32.mxu1 %vm7017_vm3, %v11016_v18  ;;  %v11512_v58 = vld [vmem:[#allocation173_spill] sm:$0xff] }
 0x1c6   : > { %6821 = vmatprep.mubr.msk.f32.mxu0 %vm7017_vm3, %v11016_v18  ;;  %v4686_v47 = vcombine.low %v11512_v58, %v11509_v59  ;;  %v4373_v41 = vcombine.low %v9565_v44, %v9611_v4  ;;  %v4706_v38 = vcombine.low %v9978_v7, %v9981_v15  ;;  %v4648_v59 = vcombine.high %v234_v51, %v234_v51  ;;  %v11514_v4 = vld [vmem:[#allocation61_spill] sm:$0xff] }
 0x1c7   : > { %v2343_v1 = vpop.f32.mrb[60].mxu1  ;;  %v4704_v54 = vcombine.low %v11514_v4, %v4703_v29 }
 0x1c8   : > { %v2994_v11 = vpop.f32.mrb[58].mxu0  ;;  %v2344_v62 = vadd.f32 %v2343_v1, %v11510_v46  ;;  %6751 = vmatmul.mubr.msk.f32.gmra.mrb[166].mxu1 %vm1473_vm9, %v11511_v32  ;;  %v6435_v6 = vpop.f32.mrb[61].mxu1  ;;  %v11515_v46 = vld [vmem:[#allocation59_spill] sm:$0xff]  ;;  %v4380_v58 = vrot.slane %v4373_v41, %v7073_v10  ;;  %v4720_v51 = vrot.slane %v4706_v38, %v7073_v10  ;;  %v10030_v41 = vcombine.high %v9981_v15, %v9981_v15  ;;  %v11520_v38 = vld [vmem:[#allocation74_spill] sm:$0xff] }
 0x1c9   : > { %v9983_v26 = vadd.f32 %v2994_v11, %v2334_v33  ;;  %v6506_v60 = vpop.f32.mrb[59].mxu0  ;;  %6822 = vmatmul.mubr.msk.f32.gmra.mrb[164].mxu0 %vm1473_vm9, %v4685_v52  ;;  %6753 = vmatprep.mubr.msk.f32.mxu1 %vm7017_vm3, %v11016_v18  ;;  %v11516_v6 = vld [vmem:[#allocation55_spill] sm:$0xff] }
 0x1ca   : > { %6824 = vmatprep.mubr.msk.f32.mxu0 %vm7017_vm3, %v11016_v18 }
 0x1cb   : > { %v2348_v23 = vpop.f32.mrb[62].mxu1 }
 0x1cc   : > { %v2999_v17 = vpop.f32.mrb[60].mxu0  ;;  %v2349_v45 = vadd.f32 %v2348_v23, %v11513_v8  ;;  %6754 = vmatmul.mubr.msk.f32.gmra.mrb[168].mxu1 %vm1473_vm9, %v4355_v53  ;;  %v6438_v33 = vpop.f32.mrb[63].mxu1  ;;  %v11518_v8 = vld [vmem:[#allocation48_spill] sm:$0xff] }
 0x1cd   : > { %v10001_v52 = vadd.f32 %v2999_v17, %v2339_v14  ;;  %v6509_v1 = vpop.f32.mrb[61].mxu0  ;;  %6825 = vmatmul.mubr.msk.f32.gmra.mrb[166].mxu0 %vm1473_vm9, %v4686_v47  ;;  %6756 = vmatprep.mubr.msk.f32.mxu1 %vm7017_vm3, %v11016_v18  ;;  %v11517_v14 = vcombine.low %v11516_v6, %v11514_v4  ;;  %v4713_v47 = vrot.slane %v4705_v63, %v7073_v10 }
 0x1ce   : > { %6827 = vmatprep.mubr.msk.f32.mxu0 %vm7017_vm3, %v11016_v18  ;;  %v11519_v29 = vcombine.low %v11518_v8, %v11516_v6  ;;  %v10026_v33 = vrot.slane %v4648_v59, %v7073_v10 }
 0x1cf   : > { %v2353_v53 = vpop.f32.mrb[64].mxu1  ;;  %v4721_v59 = vcombine.low %v4713_v47, %v4720_v51  ;;  %v11524_v47 = vld [vmem:[#allocation82_spill] sm:$0xff]  ;;  %v11525_v51 = vld [vmem:[#allocation68_spill] sm:$0xff] }
 0x1d0   : > { %v3004_v11 = vpop.f32.mrb[62].mxu0  ;;  %v2354_v32 = vadd.f32 %v2353_v53, %v11515_v46  ;;  %6757 = vmatmul.mubr.msk.f32.gmra.mrb[170].mxu1 %vm1473_vm9, %v11517_v14  ;;  %v6441_v60 = vpop.f32.mrb[65].mxu1  ;;  %v4722_v46 = vcombine.low %v10030_v41, %v10026_v33  ;;  %v5024_v8 = vcombine.low %v11525_v51, %v11524_v47  ;;  %v11529_v47 = vld [vmem:[#allocation103_spill] sm:$0xff] }
 0x1d1   : > { %v10017_v23 = vadd.f32 %v3004_v11, %v2344_v62  ;;  %v6512_v17 = vpop.f32.mrb[63].mxu0  ;;  %6828 = vmatmul.mubr.msk.f32.gmra.mrb[168].mxu0 %vm1473_vm9, %v11519_v29  ;;  %6759 = vmatprep.mubr.msk.f32.mxu1 %vm7017_vm3, %v11016_v18 }
 0x1d2   : > { %6830 = vmatprep.mubr.msk.f32.mxu0 %vm7017_vm3, %v11016_v18 }
 0x1d3   : > { %v2358_v62 = vpop.f32.mrb[66].mxu1 }
 0x1d4   : > { %v3009_v63 = vpop.f32.mrb[64].mxu0  ;;  %v2359_v1 = vadd.f32 %v2358_v62, %v11520_v38  ;;  %6760 = vmatmul.mubr.msk.f32.gmra.mrb[172].mxu1 %vm1473_vm9, %v4380_v58  ;;  %v6444_v53 = vpop.f32.mrb[67].mxu1  ;;  %v11521_v58 = vld [vmem:[#allocation50_spill] sm:$0xff] }
 0x1d5   : > { %v10036_v4 = vadd.f32 %v3009_v63, %v2349_v45  ;;  %v6515_v11 = vpop.f32.mrb[65].mxu0  ;;  %6831 = vmatmul.mubr.msk.f32.gmra.mrb[170].mxu0 %vm1473_vm9, %v4704_v54  ;;  %6841 = vmatprep.mubr.msk.f32.mxu1 %vm7017_vm3, %v11016_v18  ;;  %v11522_v45 = vld [vmem:[#allocation64_spill] sm:$0xff]  ;;  %v4729_v63 = vrot.slane %v4722_v46, %v7073_v10 }
 0x1d6   : > { %6833 = vmatprep.mubr.msk.f32.mxu0 %vm7017_vm3, %v11016_v18  ;;  %v11523_v17 = vcombine.low %v11521_v58, %v11522_v45 }
 0x1d7   : > { %v2363_v6 = vpop.f32.mrb[68].mxu1 }
 0x1d8   : > { %v3014_v14 = vpop.f32.mrb[66].mxu0  ;;  %v2364_v60 = vadd.f32 %v2363_v6, %v9628_v12  ;;  %6842 = vmatmul.mubr.msk.f32.vlgmr.msra.gmra.mrb[174].mxu1 %vm1473_vm9, %v11523_v17  ;;  %v6447_v54 = vpop.f32.mrb[69].mxu1  ;;  %v11527_v6 = vld [vmem:[#allocation84_spill] sm:$0xff] }
 0x1d9   : > { %v10052_v29 = vadd.f32 %v3014_v14, %v2354_v32  ;;  %v6518_v62 = vpop.f32.mrb[67].mxu0  ;;  %6834 = vmatmul.mubr.msk.f32.gmra.mrb[172].mxu0 %vm1473_vm9, %v4721_v59  ;;  %6844 = vmatprep.mubr.msk.f32.mxu1 %vm7017_vm3, %v11016_v18  ;;  %v11526_v32 = vld [vmem:[#allocation100_spill] sm:$0xff]  ;;  %v11528_v54 = vld [vmem:[#allocation119_spill] sm:$0xff] }
 0x1da   : > { %6836 = vmatprep.mubr.msk.f32.mxu0 %vm7017_vm3, %v11016_v18  ;;  %v5025_v14 = vcombine.low %v11527_v6, %v11526_v32  ;;  %v11530_v62 = vld [vmem:[#allocation65_spill] sm:$0xff]  ;;  %v11533_v6 = vld [vmem:[#allocation134_spill] sm:$0xff] }
 0x1db   : > { %v2368_v12 = vpop.f32.mrb[70].mxu1 }
 0x1dc   : > { %v3019_v38 = vpop.f32.mrb[68].mxu0  ;;  %v2369_v53 = vadd.f32 %v2368_v12, %v9678_v30  ;;  %6845 = vmatmul.mubr.msk.f32.gmra.mrb[176].mxu1 %vm1473_vm9, %v5024_v8  ;;  %v6450_v11 = vpop.f32.mrb[71].mxu1  ;;  %v11532_v12 = vld [vmem:[#allocation214_spill] sm:$0xff] }
 0x1dd   : > { %v10064_v58 = vadd.f32 %v3019_v38, %v2359_v1  ;;  %v6521_v59 = vpop.f32.mrb[69].mxu0  ;;  %6837 = vmatmul.mubr.msk.f32.gmra.mrb[174].mxu0 %vm1473_vm9, %v4729_v63  ;;  %6847 = vmatprep.mubr.msk.f32.mxu1 %vm7017_vm3, %v11016_v18  ;;  %v5026_v1 = vcombine.low %v11529_v47, %v11528_v54  ;;  %v11531_v63 = vld [vmem:[#allocation142_spill] sm:$0xff] }
 0x1de   : > { %6918 = vmatprep.mubr.msk.f32.mxu0 %vm7017_vm3, %v11016_v18  ;;  %v5373_v38 = vcombine.low %v11532_v12, %v11531_v63  ;;  %v11537_v12 = vld [vmem:[#allocation89_spill] sm:$0xff] }
 0x1df   : > { %v2373_v46 = vpop.f32.mrb[72].mxu1 }
 0x1e0   : > { %v3024_v45 = vpop.f32.mrb[70].mxu0  ;;  %v2374_v30 = vadd.f32 %v2373_v46, %v9694_v25  ;;  %6848 = vmatmul.mubr.msk.f32.gmra.mrb[178].mxu1 %vm1473_vm9, %v5025_v14  ;;  %v6453_v17 = vpop.f32.mrb[73].mxu1  ;;  %v11534_v14 = vld [vmem:[#allocation125_spill] sm:$0xff] }
 0x1e1   : > { %v10075_v51 = vadd.f32 %v3024_v45, %v2364_v60  ;;  %v6524_v8 = vpop.f32.mrb[71].mxu0  ;;  %6919 = vmatmul.mubr.msk.f32.vlgmr.msra.gmra.mrb[176].mxu0 %vm1473_vm9, %v11530_v62  ;;  %6850 = vmatprep.mubr.msk.f32.mxu1 %vm7017_vm3, %v11016_v18  ;;  %v5027_v59 = vcombine.low %v11534_v14, %v11533_v6  ;;  %v11540_v14 = vld [vmem:[#allocation177_spill] sm:$0xff] }
 0x1e2   : > { %6921 = vmatprep.mubr.msk.f32.mxu0 %vm7017_vm3, %v11016_v18  ;;  %v11536_v8 = vld [vmem:[#allocation136_spill] sm:$0xff] }
 0x1e3   : > { %v3379_v25 = vpop.f32.mrb[74].mxu1 }
 0x1e4   : > { %v3029_v11 = vpop.f32.mrb[72].mxu0  ;;  %v3503_v32 = vadd.f32 %v3379_v25, %v9745_v16  ;;  %6851 = vmatmul.mubr.msk.f32.gmra.mrb[180].mxu1 %vm1473_vm9, %v5026_v1  ;;  %v6535_v60 = vpop.f32.mrb[75].mxu1  ;;  %v11535_v1 = vld [vmem:[#allocation158_spill] sm:$0xff]  ;;  %v11539_v25 = vld [vmem:[#allocation120_spill] sm:$0xff] }
 0x1e5   : > { %v10089_v46 = vadd.f32 %v3029_v11, %v2369_v53  ;;  %v6527_v45 = vpop.f32.mrb[73].mxu0  ;;  %6922 = vmatmul.mubr.msk.f32.gmra.mrb[178].mxu0 %vm1473_vm9, %v5373_v38  ;;  %6853 = vmatprep.mubr.msk.f32.mxu1 %vm7017_vm3, %v11016_v18  ;;  %v5028_v53 = vcombine.low %v11536_v8, %v11535_v1  ;;  %v11538_v38 = vld [vmem:[#allocation216_spill] sm:$0xff] }
 0x1e6   : > { %6924 = vmatprep.mubr.msk.f32.mxu0 %vm7017_vm3, %v11016_v18  ;;  %v5374_v11 = vcombine.low %v11539_v25, %v11538_v38  ;;  %v11544_v25 = vld [vmem:[#allocation112_spill] sm:$0xff] }
 0x1e7   : > { %v3384_v17 = vpop.f32.mrb[76].mxu1 }
 0x1e8   : > { %v3034_v54 = vpop.f32.mrb[74].mxu0  ;;  %v3504_v16 = vadd.f32 %v3384_v17, %v9757_v13  ;;  %6854 = vmatmul.mubr.msk.f32.gmra.mrb[182].mxu1 %vm1473_vm9, %v5027_v59  ;;  %v6538_v47 = vpop.f32.mrb[77].mxu1  ;;  %v11541_v59 = vld [vmem:[#allocation160_spill] sm:$0xff] }
 0x1e9   : > { %v10100_v62 = vadd.f32 %v3034_v54, %v2374_v30  ;;  %v6530_v63 = vpop.f32.mrb[75].mxu0  ;;  %6925 = vmatmul.mubr.msk.f32.gmra.mrb[180].mxu0 %vm1473_vm9, %v11537_v12  ;;  %6856 = vmatprep.mubr.msk.f32.mxu1 %vm7017_vm3, %v11016_v18  ;;  %v5029_v45 = vcombine.low %v11541_v59, %v11540_v14  ;;  %v11547_v59 = vld [vmem:[#allocation202_spill] sm:$0xff] }
 0x1ea   : > { %6927 = vmatprep.mubr.msk.f32.mxu0 %vm7017_vm3, %v11016_v18  ;;  %v11543_v63 = vld [vmem:[#allocation182_spill] sm:$0xff] }
 0x1eb   : > { %v3389_v13 = vpop.f32.mrb[78].mxu1 }
 0x1ec   : > { %v4088_v60 = vpop.f32.mrb[76].mxu0  ;;  %v3505_v6 = vadd.f32 %v3389_v13, %v9772_v2  ;;  %6857 = vmatmul.mubr.msk.f32.gmra.mrb[184].mxu1 %vm1473_vm9, %v5028_v53  ;;  %v6541_v30 = vpop.f32.mrb[79].mxu1  ;;  %v11542_v53 = vld [vmem:[#allocation195_spill] sm:$0xff]  ;;  %v11546_v13 = vld [vmem:[#allocation181_spill] sm:$0xff] }
 0x1ed   : > { %v10114_v17 = vadd.f32 %v4088_v60, %v3503_v32  ;;  %v6612_v54 = vpop.f32.mrb[77].mxu0  ;;  %6928 = vmatmul.mubr.msk.f32.gmra.mrb[182].mxu0 %vm1473_vm9, %v5374_v11  ;;  %6859 = vmatprep.mubr.msk.f32.mxu1 %vm7017_vm3, %v11016_v18  ;;  %v5030_v32 = vcombine.low %v11543_v63, %v11542_v53  ;;  %v11545_v11 = vld [vmem:[#allocation219_spill] sm:$0xff]  ;;  %v11550_v53 = vld [vmem:[#allocation220_spill] sm:$0xff] }
 0x1ee   : > { %6930 = vmatprep.mubr.msk.f32.mxu0 %vm7017_vm3, %v11016_v18  ;;  %v5375_v60 = vcombine.low %v11546_v13, %v11545_v11  ;;  %v11552_v11 = vld [vmem:[#allocation203_spill] sm:$0xff] }
 0x1ef   : > { %v3394_v47 = vpop.f32.mrb[80].mxu1 }
 0x1f0   : > { %v4093_v1 = vpop.f32.mrb[78].mxu0  ;;  %v3506_v2 = vadd.f32 %v3394_v47, %v9784_v40  ;;  %6860 = vmatmul.mubr.msk.f32.gmra.mrb[186].mxu1 %vm1473_vm9, %v5029_v45  ;;  %v6544_v8 = vpop.f32.mrb[81].mxu1  ;;  %v11548_v45 = vld [vmem:[#allocation197_spill] sm:$0xff] }
 0x1f1   : > { %v10125_v12 = vadd.f32 %v4093_v1, %v3504_v16  ;;  %v6615_v38 = vpop.f32.mrb[79].mxu0  ;;  %6931 = vmatmul.mubr.msk.f32.gmra.mrb[184].mxu0 %vm1473_vm9, %v11544_v25  ;;  %6862 = vmatprep.mubr.msk.f32.mxu1 %vm7017_vm3, %v11016_v18  ;;  %v5031_v54 = vcombine.low %v11548_v45, %v11547_v59  ;;  %v11549_v8 = vld [vmem:[#allocation225_spill] sm:$0xff]  ;;  %v11551_v25 = vld [vmem:[#allocation11_spill] sm:$0xff] }
 0x1f2   : > { %6933 = vmatprep.mubr.msk.f32.mxu0 %vm7017_vm3, %v11016_v18  ;;  %v5376_v63 = vcombine.low %v11550_v53, %v11549_v8  ;;  %v5032_v13 = vcombine.low %v11552_v11, %v11551_v25  ;;  %v11553_v45 = vld [vmem:[#allocation25_spill] sm:$0xff]  ;;  %v11555_v53 = vld [vmem:[#allocation150_spill] sm:$0xff] }
 0x1f3   : > { %v3399_v40 = vpop.f32.mrb[82].mxu1  ;;  %v11558_v11 = vld [vmem:[#allocation38_spill] sm:$0xff] }
 0x1f4   : > { %v4098_v30 = vpop.f32.mrb[80].mxu0  ;;  %v3507_v14 = vadd.f32 %v3399_v40, %v9799_v39  ;;  %6863 = vmatmul.mubr.msk.f32.gmra.mrb[188].mxu1 %vm1473_vm9, %v5030_v32  ;;  %v6547_v16 = vpop.f32.mrb[83].mxu1 }
 0x1f5   : > { %v10139_v47 = vadd.f32 %v4098_v30, %v3505_v6  ;;  %v6618_v1 = vpop.f32.mrb[81].mxu0  ;;  %6934 = vmatmul.mubr.msk.f32.gmra.mrb[186].mxu0 %vm1473_vm9, %v5375_v60  ;;  %6865 = vmatprep.mubr.msk.f32.mxu1 %vm7017_vm3, %v11016_v18 }
 0x1f6   : > { %6936 = vmatprep.mubr.msk.f32.mxu0 %vm7017_vm3, %v11016_v18 }
 0x1f7   : > { %v3404_v39 = vpop.f32.mrb[84].mxu1 }
 0x1f8   : > { %v4103_v32 = vpop.f32.mrb[82].mxu0  ;;  %v3508_v38 = vadd.f32 %v3404_v39, %v9813_v42  ;;  %6866 = vmatmul.mubr.msk.f32.gmra.mrb[190].mxu1 %vm1473_vm9, %v5031_v54  ;;  %v6550_v6 = vpop.f32.mrb[85].mxu1  ;;  %v11554_v54 = vld [vmem:[#allocation12_spill] sm:$0xff] }
 0x1f9   : > { %v10152_v60 = vadd.f32 %v4103_v32, %v3506_v2  ;;  %v6621_v40 = vpop.f32.mrb[83].mxu0  ;;  %6937 = vmatmul.mubr.msk.f32.gmra.mrb[188].mxu0 %vm1473_vm9, %v5376_v63  ;;  %6868 = vmatprep.mubr.msk.f32.mxu1 %vm7017_vm3, %v11016_v18  ;;  %v5033_v2 = vcombine.low %v11554_v54, %v11553_v45  ;;  %v11556_v63 = vld [vmem:[#allocation18_spill] sm:$0xff]  ;;  %v11557_v39 = vld [vmem:[#allocation16_spill] sm:$0xff] }
 0x1fa   : > { %6939 = vmatprep.mubr.msk.f32.mxu0 %vm7017_vm3, %v11016_v18  ;;  %v5377_v32 = vcombine.low %v11557_v39, %v11556_v63  ;;  %v11562_v39 = vld [vmem:[#allocation135_spill] sm:$0xff] }
 0x1fb   : > { %v3409_v30 = vpop.f32.mrb[86].mxu1 }
 0x1fc   : > { %v4108_v16 = vpop.f32.mrb[84].mxu0  ;;  %v3509_v42 = vadd.f32 %v3409_v30, %v9827_v5  ;;  %6869 = vmatmul.mubr.msk.f32.gmra.mrb[192].mxu1 %vm1473_vm9, %v5032_v13  ;;  %v6553_v59 = vpop.f32.mrb[87].mxu1  ;;  %v11559_v13 = vld [vmem:[#allocation31_spill] sm:$0xff] }
 0x1fd   : > { %v10163_v1 = vadd.f32 %v4108_v16, %v3507_v14  ;;  %v6624_v8 = vpop.f32.mrb[85].mxu0  ;;  %6940 = vmatmul.mubr.msk.f32.gmra.mrb[190].mxu0 %vm1473_vm9, %v11555_v53  ;;  %6871 = vmatprep.mubr.msk.f32.mxu1 %vm7017_vm3, %v11016_v18  ;;  %v5034_v40 = vcombine.low %v11559_v13, %v11558_v11  ;;  %v11565_v13 = vld [vmem:[#allocation72_spill] sm:$0xff] }
 0x1fe   : > { %6942 = vmatprep.mubr.msk.f32.mxu0 %vm7017_vm3, %v11016_v18  ;;  %v11561_v8 = vld [vmem:[#allocation39_spill] sm:$0xff] }
 0x1ff   : > { %v3414_v5 = vpop.f32.mrb[88].mxu1 }
 0x200   : > { %v4113_v6 = vpop.f32.mrb[86].mxu0  ;;  %v3510_v25 = vadd.f32 %v3414_v5, %v9841_v21  ;;  %6872 = vmatmul.mubr.msk.f32.gmra.mrb[194].mxu1 %vm1473_vm9, %v5033_v2  ;;  %v6556_v14 = vpop.f32.mrb[89].mxu1  ;;  %v11560_v2 = vld [vmem:[#allocation56_spill] sm:$0xff]  ;;  %v11564_v5 = vld [vmem:[#allocation41_spill] sm:$0xff] }
 0x201   : > { %v10177_v30 = vadd.f32 %v4113_v6, %v3508_v38  ;;  %v6627_v16 = vpop.f32.mrb[87].mxu0  ;;  %6943 = vmatmul.mubr.msk.f32.gmra.mrb[192].mxu0 %vm1473_vm9, %v5377_v32  ;;  %6874 = vmatprep.mubr.msk.f32.mxu1 %vm7017_vm3, %v11016_v18  ;;  %v5035_v38 = vcombine.low %v11561_v8, %v11560_v2  ;;  %v11563_v32 = vld [vmem:[#allocation47_spill] sm:$0xff] }
 0x202   : > { %6945 = vmatprep.mubr.msk.f32.mxu0 %vm7017_vm3, %v11016_v18  ;;  %v5378_v6 = vcombine.low %v11564_v5, %v11563_v32  ;;  %v11569_v5 = vld [vmem:[#allocation159_spill] sm:$0xff] }
 0x203   : > { %v3419_v59 = vpop.f32.mrb[90].mxu1 }
 0x204   : > { %v4118_v45 = vpop.f32.mrb[88].mxu0  ;;  %v3511_v21 = vadd.f32 %v3419_v59, %v9853_v0  ;;  %6875 = vmatmul.mubr.msk.f32.gmra.mrb[196].mxu1 %vm1473_vm9, %v5034_v40  ;;  %v6559_v54 = vpop.f32.mrb[91].mxu1  ;;  %v11566_v40 = vld [vmem:[#allocation57_spill] sm:$0xff] }
 0x205   : > { %v10188_v53 = vadd.f32 %v4118_v45, %v3509_v42  ;;  %v6630_v63 = vpop.f32.mrb[89].mxu0  ;;  %6946 = vmatmul.mubr.msk.f32.gmra.mrb[194].mxu0 %vm1473_vm9, %v11562_v39  ;;  %6877 = vmatprep.mubr.msk.f32.mxu1 %vm7017_vm3, %v11016_v18  ;;  %v5036_v16 = vcombine.low %v11566_v40, %v11565_v13  ;;  %v11572_v40 = vld [vmem:[#allocation105_spill] sm:$0xff] }
 0x206   : > { %6948 = vmatprep.mubr.msk.f32.mxu0 %vm7017_vm3, %v11016_v18  ;;  %v11568_v63 = vld [vmem:[#allocation76_spill] sm:$0xff] }
 0x207   : > { %v3424_v0 = vpop.f32.mrb[92].mxu1 }
 0x208   : > { %v4123_v14 = vpop.f32.mrb[90].mxu0  ;;  %v3512_v11 = vadd.f32 %v3424_v0, %v9868_v36  ;;  %6878 = vmatmul.mubr.msk.f32.gmra.mrb[198].mxu1 %vm1473_vm9, %v5035_v38  ;;  %v6562_v42 = vpop.f32.mrb[93].mxu1  ;;  %v11567_v38 = vld [vmem:[#allocation90_spill] sm:$0xff] }
 0x209   : > { %v10202_v59 = vadd.f32 %v4123_v14, %v3510_v25  ;;  %v6633_v45 = vpop.f32.mrb[91].mxu0  ;;  %6949 = vmatmul.mubr.msk.f32.gmra.mrb[196].mxu0 %vm1473_vm9, %v5378_v6  ;;  %6880 = vmatprep.mubr.msk.f32.mxu1 %vm7017_vm3, %v11016_v18  ;;  %v5037_v25 = vcombine.low %v11568_v63, %v11567_v38  ;;  %v11570_v6 = vld [vmem:[#allocation33_spill] sm:$0xff]  ;;  %v11571_v0 = vld [vmem:[#allocation66_spill] sm:$0xff]  ;;  %v11575_v38 = vld [vmem:[#allocation75_spill] sm:$0xff] }
 0x20a   : > { %6951 = vmatprep.mubr.msk.f32.mxu0 %vm7017_vm3, %v11016_v18  ;;  %v5379_v14 = vcombine.low %v11571_v0, %v11570_v6  ;;  %v11577_v6 = vld [vmem:[#allocation108_spill] sm:$0xff] }
 0x20b   : > { %v3429_v54 = vpop.f32.mrb[94].mxu1 }
 0x20c   : > { %v4128_v2 = vpop.f32.mrb[92].mxu0  ;;  %v3513_v36 = vadd.f32 %v3429_v54, %v9880_v55  ;;  %6881 = vmatmul.mubr.msk.f32.gmra.mrb[200].mxu1 %vm1473_vm9, %v5036_v16  ;;  %v6565_v8 = vpop.f32.mrb[95].mxu1  ;;  %v11573_v16 = vld [vmem:[#allocation91_spill] sm:$0xff] }
 0x20d   : > { %v10213_v39 = vadd.f32 %v4128_v2, %v3511_v21  ;;  %v6636_v32 = vpop.f32.mrb[93].mxu0  ;;  %6952 = vmatmul.mubr.msk.f32.gmra.mrb[198].mxu0 %vm1473_vm9, %v11569_v5  ;;  %6883 = vmatprep.mubr.msk.f32.mxu1 %vm7017_vm3, %v11016_v18  ;;  %v5038_v45 = vcombine.low %v11573_v16, %v11572_v40  ;;  %v11574_v8 = vld [vmem:[#allocation95_spill] sm:$0xff] }
 0x20e   : > { %6954 = vmatprep.mubr.msk.f32.mxu0 %vm7017_vm3, %v11016_v18  ;;  %v5380_v63 = vcombine.low %v11575_v38, %v11574_v8  ;;  %v11576_v5 = vld [vmem:[#allocation127_spill] sm:$0xff]  ;;  %v11580_v38 = vld [vmem:[#allocation176_spill] sm:$0xff] }
 0x20f   : > { %v3434_v55 = vpop.f32.mrb[96].mxu1  ;;  %v5039_v0 = vcombine.low %v11577_v6, %v11576_v5  ;;  %v11578_v16 = vld [vmem:[#allocation151_spill] sm:$0xff]  ;;  %v6006_v5 = vrot.slane %v9950_v9, 9 }
 0x210   : > { %v4133_v42 = vpop.f32.mrb[94].mxu0  ;;  %v3514_v13 = vadd.f32 %v3434_v55, %v9895_v56  ;;  %6884 = vmatmul.mubr.msk.f32.gmra.mrb[202].mxu1 %vm1473_vm9, %v5037_v25  ;;  %v6568_v21 = vpop.f32.mrb[97].mxu1 }
 0x211   : > { %v10227_v54 = vadd.f32 %v4133_v42, %v3512_v11  ;;  %v6639_v2 = vpop.f32.mrb[95].mxu0  ;;  %6955 = vmatmul.mubr.msk.f32.gmra.mrb[200].mxu0 %vm1473_vm9, %v5379_v14  ;;  %6886 = vmatprep.mubr.msk.f32.mxu1 %vm7017_vm3, %v11016_v18 }
 0x212   : > { %6957 = vmatprep.mubr.msk.f32.mxu0 %vm7017_vm3, %v11016_v18 }
 0x213   : > { %v3439_v56 = vpop.f32.mrb[98].mxu1 }
 0x214   : > { %v4138_v25 = vpop.f32.mrb[96].mxu0  ;;  %v3515_v32 = vadd.f32 %v3439_v56, %v9909_v27  ;;  %6887 = vmatmul.mubr.msk.f32.gmra.mrb[204].mxu1 %vm1473_vm9, %v5038_v45  ;;  %v6571_v11 = vpop.f32.mrb[99].mxu1  ;;  %v11579_v45 = vld [vmem:[#allocation129_spill] sm:$0xff]  ;;  %v11582_v56 = vld [vmem:[#allocation110_spill] sm:$0xff] }
 0x215   : > { %v10240_v14 = vadd.f32 %v4138_v25, %v3513_v36  ;;  %v6642_v55 = vpop.f32.mrb[97].mxu0  ;;  %6958 = vmatmul.mubr.msk.f32.gmra.mrb[202].mxu0 %vm1473_vm9, %v5380_v63  ;;  %6889 = vmatprep.mubr.msk.f32.mxu1 %vm7017_vm3, %v11016_v18  ;;  %v5040_v36 = vcombine.low %v11579_v45, %v11578_v16  ;;  %v11581_v63 = vld [vmem:[#allocation229_spill] sm:$0xff]  ;;  %v5007_v16 = vrot.slane %v9978_v7, 7  ;;  %v5402_v7 = vrot.slane %v5394_v31, %v7073_v10 }
 0x216   : > { %6960 = vmatprep.mubr.msk.f32.mxu0 %vm7017_vm3, %v11016_v18  ;;  %v5381_v25 = vcombine.low %v11582_v56, %v11581_v63  ;;  %v11583_v55 = vld [vmem:[#allocation167_spill] sm:$0xff]  ;;  %v5044_v56 = vcombine.low %v9573_v22, %v9593_v34  ;;  %v11590_v22 = vld [vmem:[#allocation170_spill] sm:$0xff]  ;;  %v11591_v34 = vld [vmem:[#allocation113_spill] sm:$0xff] }
 0x217   : > { %v3444_v42 = vpop.f32.mrb[100].mxu1 }
 0x218   : > { %v4143_v21 = vpop.f32.mrb[98].mxu0  ;;  %v3516_v27 = vadd.f32 %v3444_v42, %v9924_v50  ;;  %6890 = vmatmul.mubr.msk.f32.gmra.mrb[206].mxu1 %vm1473_vm9, %v5039_v0  ;;  %v6574_v40 = vpop.f32.mrb[101].mxu1  ;;  %v5001_v50 = vrot.slane %v9974_v35, 7  ;;  %v11584_v42 = vld [vmem:[#allocation157_spill] sm:$0xff] }
 0x219   : > { %v10251_v2 = vadd.f32 %v4143_v21, %v3514_v13  ;;  %v6645_v8 = vpop.f32.mrb[99].mxu0  ;;  %6961 = vmatmul.mubr.msk.f32.gmra.mrb[204].mxu0 %vm1473_vm9, %v11580_v38  ;;  %6892 = vmatprep.mubr.msk.f32.mxu1 %vm7017_vm3, %v11016_v18  ;;  %v5041_v21 = vcombine.low %v11584_v42, %v11583_v55  ;;  %v5004_v40 = vrot.slane %v9955_v48, 7  ;;  %v11587_v38 = vld [vmem:[#allocation168_spill] sm:$0xff] }
 0x21a   : > { %6963 = vmatprep.mubr.msk.f32.mxu0 %vm7017_vm3, %v11016_v18  ;;  %v5003_v55 = vrot.slane %v5001_v50, 2 }
 0x21b   : > { %v3449_v11 = vpop.f32.mrb[102].mxu1  ;;  %v5006_v42 = vrot.slane %v5004_v40, 2 }
 0x21c   : > { %v4148_v13 = vpop.f32.mrb[100].mxu0  ;;  %v3517_v6 = vadd.f32 %v3449_v11, %v9938_v24  ;;  %6893 = vmatmul.mubr.msk.f32.gmra.mrb[208].mxu1 %vm1473_vm9, %v5040_v36  ;;  %v6577_v0 = vpop.f32.mrb[103].mxu1  ;;  %v5010_v24 = vrot.slane %v9981_v15, 7  ;;  %v11586_v36 = vld [vmem:[#allocation186_spill] sm:$0xff] }
 0x21d   : > { %v10269_v45 = vadd.f32 %v4148_v13, %v3515_v32  ;;  %v6648_v8 = vpop.f32.mrb[101].mxu0  ;;  %6964 = vmatmul.mubr.msk.f32.gmra.mrb[206].mxu0 %vm1473_vm9, %v5381_v25  ;;  %6895 = vmatprep.mubr.msk.f32.mxu1 %vm7017_vm3, %v11016_v18  ;;  %v5042_v63 = vcombine.low %v11587_v38, %v11586_v36  ;;  %v5045_v32 = vcombine.low %v9597_v49, %v9603_v28  ;;  %v11589_v38 = vld [vmem:[#allocation232_spill] sm:$0xff] }
 0x21e   : > { %6966 = vmatprep.mubr.msk.f32.mxu0 %vm7017_vm3, %v11016_v18  ;;  %v5002_v25 = vsel %vm7113_vm8, %v6006_v5, %v5001_v50  ;;  %v5009_v8 = vrot.slane %v5007_v16, 2  ;;  %v5382_v49 = vcombine.low %v11591_v34, %v11590_v22  ;;  %v5012_v28 = vrot.slane %v5010_v24, 2  ;;  %v11592_v50 = vld [vmem:[#allocation198_spill] sm:$0xff]  ;;  %v11593_v5 = vld [vmem:[#allocation188_spill] sm:$0xff] }
 0x21f   : > { %11585 = vst [vmem:[#allocation62_spill] sm:$0xff] %v10269_v45  ;;  %v3454_v35 = vpop.f32.mrb[104].mxu1 }
 0x220   : > { %v4153_v11 = vpop.f32.mrb[102].mxu0  ;;  %v3518_v13 = vadd.f32 %v3454_v35, %v9957_v43  ;;  %6896 = vmatmul.mubr.msk.f32.gmra.mrb[210].mxu1 %vm1473_vm9, %v5041_v21  ;;  %v6580_v0 = vpop.f32.mrb[105].mxu1  ;;  %v5013_v43 = vrot.slane %v10030_v41, 7  ;;  %v5052_v35 = vrot.slane %v5044_v56, %v7073_v10  ;;  %v5011_v56 = vsel %vm7113_vm8, %v5009_v8, %v5010_v24 }
 0x221   : > { %v10287_v45 = vadd.f32 %v4153_v11, %v3516_v27  ;;  %v6651_v36 = vpop.f32.mrb[103].mxu0  ;;  %6967 = vmatmul.mubr.msk.f32.gmra.mrb[208].mxu0 %vm1473_vm9, %v11589_v38  ;;  %6898 = vmatprep.mubr.msk.f32.mxu1 %vm7017_vm3, %v11016_v18  ;;  %v5043_v27 = vcombine.low %v11593_v5, %v11592_v50  ;;  %v5059_v11 = vrot.slane %v5045_v32, %v7073_v10 }
 0x222   : > { %6969 = vmatprep.mubr.msk.f32.mxu0 %vm7017_vm3, %v11016_v18  ;;  %v5061_v0 = vcombine.low %v9607_v3, %v9649_v61  ;;  %v5062_v36 = vcombine.low %v9653_v37, %v5002_v25  ;;  %v5008_v50 = vsel %vm7113_vm8, %v5006_v42, %v5007_v16  ;;  %v5014_v61 = vsel %vm7113_vm8, %v5012_v28, %v5013_v43  ;;  %v11595_v16 = vld [vmem:[#allocation174_spill] sm:$0xff] }
 0x223   : > { %11588 = vst [vmem:[#allocation80_spill] sm:$0xff] %v10287_v45  ;;  %v3459_v21 = vpop.f32.mrb[106].mxu1  ;;  %v5005_v45 = vsel %vm7113_vm8, %v5003_v55, %v5004_v40  ;;  %v10322_v37 = vcombine.high %v10026_v33, %v10026_v33  ;;  %v11594_v40 = vld [vmem:[#allocation233_spill] sm:$0xff]  ;;  %v5079_v5 = vcombine.low %v5011_v56, %v5014_v61  ;;  %v6035_v61 = vcombine.high %v9565_v44, %v9950_v9 }
 0x224   : > { %v4158_v38 = vpop.f32.mrb[104].mxu0  ;;  %v3519_v22 = vadd.f32 %v3459_v21, %v9983_v26  ;;  %6899 = vmatmul.mubr.msk.f32.gmra.mrb[212].mxu1 %vm1473_vm9, %v5042_v63  ;;  %v6583_v34 = vpop.f32.mrb[107].mxu1  ;;  %v5016_v26 = vrot.slane %v10026_v33, 7  ;;  %v5383_v24 = vcombine.low %v11595_v16, %v11594_v40  ;;  %v5069_v63 = vrot.slane %v5061_v0, %v7073_v10 }
 0x225   : > { %v10313_v32 = vadd.f32 %v4158_v38, %v3517_v6  ;;  %v6654_v3 = vpop.f32.mrb[105].mxu0  ;;  %6970 = vmatmul.mubr.msk.f32.gmra.mrb[210].mxu0 %vm1473_vm9, %v5382_v49  ;;  %6901 = vmatprep.mubr.msk.f32.mxu1 %vm7017_vm3, %v11016_v18  ;;  %v5076_v25 = vrot.slane %v5062_v36, %v7073_v10  ;;  %v5060_v49 = vcombine.low %v5052_v35, %v5059_v11  ;;  %v11596_v34 = vld [vmem:[#allocation187_spill] sm:$0xff]  ;;  %v5015_v0 = vrot.slane %v5013_v43, 2 }
 0x226   : > { %6972 = vmatprep.mubr.msk.f32.mxu0 %vm7017_vm3, %v11016_v18  ;;  %v5078_v28 = vcombine.low %v5005_v45, %v5008_v50  ;;  %v5018_v36 = vrot.slane %v5016_v26, 2  ;;  %v5019_v3 = vrot.slane %v10322_v37, 7  ;;  %v5093_v43 = vrot.slane %v5079_v5, %v7073_v10 }
 0x227   : > { %v3464_v6 = vpop.f32.mrb[108].mxu1 }
 0x228   : > { %v4163_v55 = vpop.f32.mrb[106].mxu0  ;;  %v3520_v42 = vadd.f32 %v3464_v6, %v10001_v52  ;;  %6902 = vmatmul.mubr.msk.f32.gmra.mrb[214].mxu1 %vm1473_vm9, %v5043_v27  ;;  %v6586_v8 = vpop.f32.mrb[109].mxu1  ;;  %v11597_v27 = vld [vmem:[#allocation40_spill] sm:$0xff]  ;;  %v5086_v56 = vrot.slane %v5078_v28, %v7073_v10 }
 0x229   : > { %v10333_v21 = vadd.f32 %v4163_v55, %v3518_v13  ;;  %v6657_v38 = vpop.f32.mrb[107].mxu0  ;;  %6973 = vmatmul.mubr.msk.f32.gmra.mrb[212].mxu0 %vm1473_vm9, %v11596_v34  ;;  %6904 = vmatprep.mubr.msk.f32.mxu1 %vm7017_vm3, %v11016_v18  ;;  %v5384_v45 = vcombine.low %v9139_v20, %v11597_v27  ;;  %v5077_v13 = vcombine.low %v5069_v63, %v5076_v25 }
 0x22a   : > { %6975 = vmatprep.mubr.msk.f32.mxu0 %vm7017_vm3, %v11016_v18  ;;  %v5017_v20 = vsel %vm7113_vm8, %v5015_v0, %v5016_v26 }
 0x22b   : > { %v3469_v52 = vpop.f32.mrb[110].mxu1 }
 0x22c   : > { %v4168_v35 = vpop.f32.mrb[108].mxu0  ;;  %v3521_v11 = vadd.f32 %v3469_v52, %v10017_v23  ;;  %6905 = vmatmul.mubr.msk.f32.gmra.mrb[216].mxu1 %vm1473_vm9, %v5060_v49  ;;  %v6589_v50 = vpop.f32.mrb[111].mxu1  ;;  %v5020_v23 = vsel %vm7113_vm8, %v5018_v36, %v5019_v3  ;;  %v5411_v52 = vcombine.low %v10026_v33, %v10322_v37 }
 0x22d   : > { %v10350_v6 = vadd.f32 %v4168_v35, %v3519_v22  ;;  %v6660_v40 = vpop.f32.mrb[109].mxu0  ;;  %6976 = vmatmul.mubr.msk.f32.gmra.mrb[214].mxu0 %vm1473_vm9, %v5383_v24  ;;  %6907 = vmatprep.mubr.msk.f32.mxu1 %vm7017_vm3, %v11016_v18  ;;  %v5094_v22 = vcombine.low %v5086_v56, %v5093_v43  ;;  %v5392_v24 = vrot.slane %v6035_v61, %v7073_v10 }
 0x22e   : > { %6978 = vmatprep.mubr.msk.f32.mxu0 %vm7017_vm3, %v11016_v18  ;;  %v5095_v25 = vcombine.low %v5017_v20, %v5020_v23  ;;  %v5418_v50 = vrot.slane %v5411_v52, %v7073_v10 }
 0x22f   : > { %v3474_v16 = vpop.f32.mrb[112].mxu1  ;;  %v5393_v28 = vcombine.low %v9636_v19, %v5392_v24 }
 0x230   : > { %v4173_v63 = vpop.f32.mrb[110].mxu0  ;;  %v3522_v44 = vadd.f32 %v3474_v16, %v10036_v4  ;;  %6908 = vmatmul.mubr.msk.f32.gmra.mrb[218].mxu1 %vm1473_vm9, %v5077_v13  ;;  %v6592_v9 = vpop.f32.mrb[113].mxu1  ;;  %v5395_v4 = vcombine.low %v9981_v15, %v10030_v41  ;;  %v5102_v38 = vrot.slane %v5095_v25, %v7073_v10 }
 0x231   : > { %v10364_v55 = vadd.f32 %v4173_v63, %v3520_v42  ;;  %v6663_v26 = vpop.f32.mrb[111].mxu0  ;;  %6979 = vmatmul.mubr.msk.f32.gmra.mrb[216].mxu0 %vm1473_vm9, %v5384_v45  ;;  %6910 = vmatprep.mubr.msk.f32.mxu1 %vm7017_vm3, %v11016_v18 }
 0x232   : > { %6981 = vmatprep.mubr.msk.f32.mxu0 %vm7017_vm3, %v11016_v18  ;;  %v5409_v15 = vrot.slane %v5395_v4, %v7073_v10 }
 0x233   : > { %v3479_v8 = vpop.f32.mrb[114].mxu1 }
 0x234   : > { %v4178_v49 = vpop.f32.mrb[112].mxu0  ;;  %v3523_v42 = vadd.f32 %v3479_v8, %v10052_v29  ;;  %6911 = vmatmul.mubr.msk.f32.gmra.mrb[220].mxu1 %vm1473_vm9, %v5094_v22  ;;  %v6595_v5 = vpop.f32.mrb[115].mxu1  ;;  %v5410_v3 = vcombine.low %v5402_v7, %v5409_v15 }
 0x235   : > { %v10379_v34 = vadd.f32 %v4178_v49, %v3521_v11  ;;  %v6666_v48 = vpop.f32.mrb[113].mxu0  ;;  %6982 = vmatmul.mubr.msk.f32.gmra.mrb[218].mxu0 %vm1473_vm9, %v9615_v57  ;;  %6913 = vmatprep.mubr.msk.f32.mxu1 %vm7017_vm3, %v11016_v18 }
 0x236   : > { %6984 = vmatprep.mubr.msk.f32.mxu0 %vm7017_vm3, %v11016_v18 }
 0x237   : > { %v3484_v19 = vpop.f32.mrb[116].mxu1 }
 0x238   : > { %v4183_v41 = vpop.f32.mrb[114].mxu0  ;;  %v3524_v29 = vadd.f32 %v3484_v19, %v10064_v58  ;;  %6914 = vmatmul.mubr.msk.f32.gmra.mrb[222].mxu1 %vm1473_vm9, %v5102_v38  ;;  %v6598_v0 = vpop.f32.mrb[117].mxu1 }
 0x239   : > { %v10391_v36 = vadd.f32 %v4183_v41, %v3522_v44  ;;  %v6669_v57 = vpop.f32.mrb[115].mxu0  ;;  %6985 = vmatmul.mubr.msk.f32.gmra.mrb[220].mxu0 %vm1473_vm9, %v5393_v28 }
 0x23a   : > { %6987 = vmatprep.mubr.msk.f32.mxu0 %vm7017_vm3, %v11016_v18 }
 0x23b   : > { %v3489_v27 = vpop.f32.mrb[118].mxu1 }
 0x23c   : > { %v4188_v45 = vpop.f32.mrb[116].mxu0  ;;  %v3525_v13 = vadd.f32 %v3489_v27, %v10075_v51  ;;  %v6601_v58 = vpop.f32.mrb[119].mxu1 }
 0x23d   : > { %v10399_v35 = vadd.f32 %v4188_v45, %v3523_v42  ;;  %v6672_v11 = vpop.f32.mrb[117].mxu0  ;;  %6988 = vmatmul.mubr.msk.f32.gmra.mrb[222].mxu0 %vm1473_vm9, %v5410_v3 }
 0x23e   : > { %6990 = vmatprep.mubr.msk.f32.mxu0 %vm7017_vm3, %v11016_v18 }
 0x23f   : > { %v3494_v56 = vpop.f32.mrb[120].mxu1 }
 0x240   : > { %v4193_v33 = vpop.f32.mrb[118].mxu0  ;;  %v3526_v37 = vadd.f32 %v3494_v56, %v10089_v46  ;;  %v6604_v43 = vpop.f32.mrb[121].mxu1 }
 0x241   : > { %v10406_v61 = vadd.f32 %v4193_v33, %v3524_v29  ;;  %v6675_v40 = vpop.f32.mrb[119].mxu0  ;;  %6991 = vmatmul.mubr.msk.f32.gmra.mrb[224].mxu0 %vm1473_vm9, %v5418_v50 }
 0x243   : > { %v3499_v51 = vpop.f32.mrb[122].mxu1 }
 0x244   : > { %v4198_v20 = vpop.f32.mrb[120].mxu0  ;;  %v3527_v23 = vadd.f32 %v3499_v51, %v10100_v62  ;;  %v6607_v16 = vpop.f32.mrb[123].mxu1 }
 0x245   : > { %v10410_v63 = vadd.f32 %v4198_v20, %v3525_v13  ;;  %v6678_v10 = vpop.f32.mrb[121].mxu0 }
 0x247   : > { %v4480_v44 = vpop.f32.mrb[124].mxu1 }
 0x248   : > { %v4203_v18 = vpop.f32.mrb[122].mxu0  ;;  %v4604_v9 = vadd.f32 %v4480_v44, %v10114_v17  ;;  %v6689_v22 = vpop.f32.mrb[125].mxu1 }
 0x249   : > { %v10413_v46 = vadd.f32 %v4203_v18, %v3526_v37  ;;  %v6681_v24 = vpop.f32.mrb[123].mxu0 }
 0x24b   : > { %v4485_v25 = vpop.f32.mrb[126].mxu1 }
 0x24c   : > { %v4208_v26 = vpop.f32.mrb[124].mxu0  ;;  %v4605_v31 = vadd.f32 %v4485_v25, %v10125_v12  ;;  %v6692_v4 = vpop.f32.mrb[127].mxu1 }
 0x24d   : > { %v10416_v8 = vadd.f32 %v4208_v26, %v3527_v23  ;;  %v6684_v62 = vpop.f32.mrb[125].mxu0 }
 0x24f   : > { %v4490_v49 = vpop.f32.mrb[128].mxu1 }
 0x250   : > { %v4849_v42 = vpop.f32.mrb[126].mxu0  ;;  %v4606_v28 = vadd.f32 %v4490_v49, %v10139_v47  ;;  %v6695_v5 = vpop.f32.mrb[129].mxu1 }
 0x251   : > { %v10419_v38 = vadd.f32 %v4849_v42, %v4604_v9  ;;  %v6766_v17 = vpop.f32.mrb[127].mxu0 }
 0x253   : > { %v4495_v48 = vpop.f32.mrb[130].mxu1 }
 0x254   : > { %v4854_v7 = vpop.f32.mrb[128].mxu0  ;;  %v4607_v15 = vadd.f32 %v4495_v48, %v10152_v60  ;;  %v6698_v19 = vpop.f32.mrb[131].mxu1 }
 0x255   : > { %v10422_v41 = vadd.f32 %v4854_v7, %v4605_v31  ;;  %v6769_v12 = vpop.f32.mrb[129].mxu0 }
 0x257   : > { %v4500_v29 = vpop.f32.mrb[132].mxu1 }
 0x258   : > { %v4859_v0 = vpop.f32.mrb[130].mxu0  ;;  %v4608_v57 = vadd.f32 %v4500_v29, %v10163_v1  ;;  %v6701_v3 = vpop.f32.mrb[133].mxu1 }
 0x259   : > { %v10425_v52 = vadd.f32 %v4859_v0, %v4606_v28  ;;  %v6772_v47 = vpop.f32.mrb[131].mxu0  ;;  %v11598_v0 = vld [vmem:[#allocation62_spill] sm:$0xff] }
 0x25b   : > { %v4505_v27 = vpop.f32.mrb[134].mxu1 }
 0x25c   : > { %v4864_v45 = vpop.f32.mrb[132].mxu0  ;;  %v4609_v13 = vadd.f32 %v4505_v27, %v10177_v30  ;;  %v6704_v58 = vpop.f32.mrb[135].mxu1 }
 0x25d   : > { %v10428_v11 = vadd.f32 %v4864_v45, %v4607_v15  ;;  %v6775_v60 = vpop.f32.mrb[133].mxu0 }
 0x25f   : > { %v4510_v50 = vpop.f32.mrb[136].mxu1 }
 0x260   : > { %v4869_v56 = vpop.f32.mrb[134].mxu0  ;;  %v4610_v33 = vadd.f32 %v4510_v50, %v10188_v53  ;;  %v6707_v37 = vpop.f32.mrb[137].mxu1 }
 0x261   : > { %v10431_v43 = vadd.f32 %v4869_v56, %v4608_v57  ;;  %v6778_v1 = vpop.f32.mrb[135].mxu0 }
 0x263   : > { %v4515_v40 = vpop.f32.mrb[138].mxu1 }
 0x264   : > { %v4874_v51 = vpop.f32.mrb[136].mxu0  ;;  %v4611_v20 = vadd.f32 %v4515_v40, %v10202_v59  ;;  %v6710_v23 = vpop.f32.mrb[139].mxu1 }
 0x265   : > { %v10434_v16 = vadd.f32 %v4874_v51, %v4609_v13  ;;  %v6781_v30 = vpop.f32.mrb[137].mxu0  ;;  %v11599_v13 = vld [vmem:[#allocation80_spill] sm:$0xff] }
 0x267   : > { %v4520_v10 = vpop.f32.mrb[140].mxu1 }
 0x268   : > { %v4879_v44 = vpop.f32.mrb[138].mxu0  ;;  %v4612_v18 = vadd.f32 %v4520_v10, %v10213_v39  ;;  %v6713_v9 = vpop.f32.mrb[141].mxu1 }
 0x269   : > { %v10437_v22 = vadd.f32 %v4879_v44, %v4610_v33  ;;  %v6784_v53 = vpop.f32.mrb[139].mxu0 }
 0x26b   : > { %v4525_v24 = vpop.f32.mrb[142].mxu1 }
 0x26c   : > { %v4884_v25 = vpop.f32.mrb[140].mxu0  ;;  %v4613_v26 = vadd.f32 %v4525_v24, %v10227_v54  ;;  %v6716_v31 = vpop.f32.mrb[143].mxu1 }
 0x26d   : > { %v10440_v4 = vadd.f32 %v4884_v25, %v4611_v20  ;;  %v6787_v59 = vpop.f32.mrb[141].mxu0 }
 0x26f   : > { %v4530_v62 = vpop.f32.mrb[144].mxu1 }
 0x270   : > { %v4889_v49 = vpop.f32.mrb[142].mxu0  ;;  %v4614_v42 = vadd.f32 %v4530_v62, %v10240_v14  ;;  %v6719_v28 = vpop.f32.mrb[145].mxu1 }
 0x271   : > { %v10443_v5 = vadd.f32 %v4889_v49, %v4612_v18  ;;  %v6790_v39 = vpop.f32.mrb[143].mxu0 }
 0x273   : > { %v4535_v17 = vpop.f32.mrb[146].mxu1 }
 0x274   : > { %v4894_v48 = vpop.f32.mrb[144].mxu0  ;;  %v4615_v7 = vadd.f32 %v4535_v17, %v10251_v2  ;;  %v6722_v15 = vpop.f32.mrb[147].mxu1 }
 0x275   : > { %v10446_v19 = vadd.f32 %v4894_v48, %v4613_v26  ;;  %v6793_v54 = vpop.f32.mrb[145].mxu0 }
 0x277   : > { %v4540_v12 = vpop.f32.mrb[148].mxu1 }
 0x278   : > { %v4899_v29 = vpop.f32.mrb[146].mxu0  ;;  %v4616_v57 = vadd.f32 %v4540_v12, %v11598_v0  ;;  %v6725_v3 = vpop.f32.mrb[149].mxu1 }
 0x279   : > { %v10449_v47 = vadd.f32 %v4899_v29, %v4614_v42  ;;  %v6796_v14 = vpop.f32.mrb[147].mxu0 }
 0x27b   : > { %v4545_v27 = vpop.f32.mrb[150].mxu1 }
 0x27c   : > { %v4904_v45 = vpop.f32.mrb[148].mxu0  ;;  %v4617_v58 = vadd.f32 %v4545_v27, %v11599_v13  ;;  %v6728_v60 = vpop.f32.mrb[151].mxu1 }
 0x27d   : > { %v10452_v50 = vadd.f32 %v4904_v45, %v4615_v7  ;;  %v6799_v2 = vpop.f32.mrb[149].mxu0 }
 0x27f   : > { %v4550_v56 = vpop.f32.mrb[152].mxu1 }
 0x280   : > { %v4909_v33 = vpop.f32.mrb[150].mxu0  ;;  %v4618_v37 = vadd.f32 %v4550_v56, %v10313_v32  ;;  %v6731_v1 = vpop.f32.mrb[153].mxu1 }
 0x281   : > { %v10455_v40 = vadd.f32 %v4909_v33, %v4616_v57  ;;  %v6802_v51 = vpop.f32.mrb[151].mxu0 }
 0x283   : > { %v4555_v20 = vpop.f32.mrb[154].mxu1 }
 0x284   : > { %v4914_v23 = vpop.f32.mrb[152].mxu0  ;;  %v4619_v30 = vadd.f32 %v4555_v20, %v10333_v21  ;;  %v6734_v10 = vpop.f32.mrb[155].mxu1 }
 0x285   : > { %v10458_v44 = vadd.f32 %v4914_v23, %v4617_v58  ;;  %v6805_v18 = vpop.f32.mrb[153].mxu0 }
 0x287   : > { %v4560_v9 = vpop.f32.mrb[156].mxu1 }
 0x288   : > { %v4919_v53 = vpop.f32.mrb[154].mxu0  ;;  %v4620_v24 = vadd.f32 %v4560_v9, %v10350_v6  ;;  %v6737_v25 = vpop.f32.mrb[157].mxu1 }
 0x289   : > { %v10461_v26 = vadd.f32 %v4919_v53, %v4618_v37  ;;  %v6808_v32 = vpop.f32.mrb[155].mxu0 }
 0x28b   : > { %v4565_v31 = vpop.f32.mrb[158].mxu1 }
 0x28c   : > { %v4924_v59 = vpop.f32.mrb[156].mxu0  ;;  %v4621_v62 = vadd.f32 %v4565_v31, %v10364_v55  ;;  %v6740_v49 = vpop.f32.mrb[159].mxu1 }
 0x28d   : > { %v10464_v42 = vadd.f32 %v4924_v59, %v4619_v30  ;;  %v6811_v21 = vpop.f32.mrb[157].mxu0 }
 0x28f   : > { %v4570_v28 = vpop.f32.mrb[160].mxu1 }
 0x290   : > { %v4929_v39 = vpop.f32.mrb[158].mxu0  ;;  %v4622_v17 = vadd.f32 %v4570_v28, %v10379_v34  ;;  %v6743_v48 = vpop.f32.mrb[161].mxu1 }
 0x291   : > { %v10467_v7 = vadd.f32 %v4929_v39, %v4620_v24  ;;  %v6814_v6 = vpop.f32.mrb[159].mxu0 }
 0x293   : > { %v4575_v15 = vpop.f32.mrb[162].mxu1 }
 0x294   : > { %v4934_v54 = vpop.f32.mrb[160].mxu0  ;;  %v4623_v12 = vadd.f32 %v4575_v15, %v10391_v36  ;;  %v6746_v29 = vpop.f32.mrb[163].mxu1 }
 0x295   : > { %v10470_v0 = vadd.f32 %v4934_v54, %v4621_v62  ;;  %v6817_v55 = vpop.f32.mrb[161].mxu0  ;;  %v10497_v29 = vld [vmem:[%s10606_s2] ss:$0 sm:$0xff] }
 0x297   : > { %v4580_v57 = vpop.f32.mrb[164].mxu1 }
 0x298   : > { %v4939_v3 = vpop.f32.mrb[162].mxu0  ;;  %v4624_v14 = vadd.f32 %v4580_v57, %v10399_v35  ;;  %v6749_v27 = vpop.f32.mrb[165].mxu1 }
 0x299   : > { %v10473_v45 = vadd.f32 %v4939_v3, %v4622_v17  ;;  %v6820_v34 = vpop.f32.mrb[163].mxu0 }
 0x29b   : > { %v4585_v13 = vpop.f32.mrb[166].mxu1 }
 0x29c   : > { %v4944_v58 = vpop.f32.mrb[164].mxu0  ;;  %v4625_v60 = vadd.f32 %v4585_v13, %v10406_v61  ;;  %v6752_v2 = vpop.f32.mrb[167].mxu1 }
 0x29d   : > { %v10476_v56 = vadd.f32 %v4944_v58, %v4623_v12  ;;  %v6823_v36 = vpop.f32.mrb[165].mxu0 }
 0x29f   : > { %v4590_v33 = vpop.f32.mrb[168].mxu1 }
 0x2a0   : > { %v4949_v37 = vpop.f32.mrb[166].mxu0  ;;  %v4626_v1 = vadd.f32 %v4590_v33, %v10410_v63  ;;  %v6755_v51 = vpop.f32.mrb[169].mxu1 }
 0x2a1   : > { %v10479_v20 = vadd.f32 %v4949_v37, %v4624_v14  ;;  %v6826_v35 = vpop.f32.mrb[167].mxu0 }
 0x2a3   : > { %v4595_v23 = vpop.f32.mrb[170].mxu1 }
 0x2a4   : > { %v4954_v30 = vpop.f32.mrb[168].mxu0  ;;  %v4627_v10 = vadd.f32 %v4595_v23, %v10413_v46  ;;  %v6758_v18 = vpop.f32.mrb[171].mxu1 }
 0x2a5   : > { %v10482_v9 = vadd.f32 %v4954_v30, %v4625_v60  ;;  %v6829_v61 = vpop.f32.mrb[169].mxu0 }
 0x2a7   : > { %v4600_v53 = vpop.f32.mrb[172].mxu1 }
 0x2a8   : > { %v4959_v24 = vpop.f32.mrb[170].mxu0  ;;  %v4628_v25 = vadd.f32 %v4600_v53, %v10416_v8  ;;  %v6761_v32 = vpop.f32.mrb[173].mxu1 }
 0x2a9   : > { %v10485_v31 = vadd.f32 %v4959_v24, %v4626_v1  ;;  %v6832_v63 = vpop.f32.mrb[171].mxu0 }
 0x2ab   : > { %v5222_v59 = vpop.f32.mrb[174].mxu1 }
 0x2ac   : > { %v4964_v62 = vpop.f32.mrb[172].mxu0  ;;  %v5346_v49 = vadd.f32 %v5222_v59, %v10419_v38  ;;  %v6843_v21 = vpop.f32.mrb[175].mxu1 }
 0x2ad   : > { %v10488_v28 = vadd.f32 %v4964_v62, %v4627_v10  ;;  %v6835_v46 = vpop.f32.mrb[173].mxu0 }
 0x2af   : > { %v5227_v39 = vpop.f32.mrb[176].mxu1 }
 0x2b0   : > { %v4969_v17 = vpop.f32.mrb[174].mxu0  ;;  %v5347_v48 = vadd.f32 %v5227_v39, %v10422_v41  ;;  %v6846_v6 = vpop.f32.mrb[177].mxu1 }
 0x2b1   : > { %v10491_v15 = vadd.f32 %v4969_v17, %v4628_v25  ;;  %v6838_v8 = vpop.f32.mrb[175].mxu0 }
 0x2b3   : > { %v5232_v54 = vpop.f32.mrb[178].mxu1 }
 0x2b4   : > { %v5518_v12 = vpop.f32.mrb[176].mxu0  ;;  %v5348_v38 = vadd.f32 %v5232_v54, %v10425_v52  ;;  %v6849_v55 = vpop.f32.mrb[179].mxu1 }
 0x2b5   : > { %v5642_v57 = vadd.f32 %v5518_v12, %v5346_v49  ;;  %v6920_v3 = vpop.f32.mrb[177].mxu0 }
 0x2b7   : > { %v5674_v41 = vadd.f32 %v10497_v29, %v5642_v57  ;;  %v5237_v14 = vpop.f32.mrb[180].mxu1 }
 0x2b8   : > { %v5523_v27 = vpop.f32.mrb[178].mxu0  ;;  %v5349_v34 = vadd.f32 %v5237_v14, %v10428_v11  ;;  %v6852_v13 = vpop.f32.mrb[181].mxu1 }
 0x2b9   : > { %5700 = vst.msk [vmem:[%s10503_s16] sm:$0xff] %vm5699_vm10, %v5674_v41  ;;  %v5643_v52 = vadd.f32 %v5523_v27, %v5347_v48  ;;  %v6923_v58 = vpop.f32.mrb[179].mxu0 }
 0x2bb   : > { %v5675_v60 = vadd.f32 %v10497_v29, %v5643_v52  ;;  %v5242_v2 = vpop.f32.mrb[182].mxu1 }
 0x2bc   : > { %v5528_v36 = vpop.f32.mrb[180].mxu0  ;;  %v5350_v33 = vadd.f32 %v5242_v2, %v10431_v43  ;;  %v6855_v37 = vpop.f32.mrb[183].mxu1 }
 0x2bd   : > { %5701 = vst.msk [vmem:[%s10503_s16 + $0x8] sm:$0xff] %vm5699_vm10, %v5675_v60  ;;  %v5644_v1 = vadd.f32 %v5528_v36, %v5348_v38  ;;  %v6926_v51 = vpop.f32.mrb[181].mxu0 }
 0x2bf   : > { %v5676_v11 = vadd.f32 %v10497_v29, %v5644_v1  ;;  %v5247_v35 = vpop.f32.mrb[184].mxu1 }
 0x2c0   : > { %v5533_v23 = vpop.f32.mrb[182].mxu0  ;;  %v5351_v30 = vadd.f32 %v5247_v35, %v10434_v16  ;;  %v6858_v10 = vpop.f32.mrb[185].mxu1 }
 0x2c1   : > { %5702 = vst.msk [vmem:[%s10503_s16 + $0x10] sm:$0xff] %vm5699_vm10, %v5676_v11  ;;  %v5645_v18 = vadd.f32 %v5533_v23, %v5349_v34  ;;  %v6929_v61 = vpop.f32.mrb[183].mxu0 }
 0x2c3   : > { %v5677_v43 = vadd.f32 %v10497_v29, %v5645_v18  ;;  %v5252_v53 = vpop.f32.mrb[186].mxu1 }
 0x2c4   : > { %v5538_v24 = vpop.f32.mrb[184].mxu0  ;;  %v5352_v25 = vadd.f32 %v5252_v53, %v10437_v22  ;;  %v6861_v32 = vpop.f32.mrb[187].mxu1 }
 0x2c5   : > { %5703 = vst.msk [vmem:[%s10503_s16 + $0x18] sm:$0xff] %vm5699_vm10, %v5677_v43  ;;  %v5646_v63 = vadd.f32 %v5538_v24, %v5350_v33  ;;  %v6932_v59 = vpop.f32.mrb[185].mxu0 }
 0x2c7   : > { %v5678_v16 = vadd.f32 %v10497_v29, %v5646_v63  ;;  %v5257_v62 = vpop.f32.mrb[188].mxu1 }
 0x2c8   : > { %v5543_v49 = vpop.f32.mrb[186].mxu0  ;;  %v5353_v21 = vadd.f32 %v5257_v62, %v10440_v4  ;;  %v6864_v46 = vpop.f32.mrb[189].mxu1 }
 0x2c9   : > { %5704 = vst.msk [vmem:[%s10503_s16 + $0x20] sm:$0xff] %vm5699_vm10, %v5678_v16  ;;  %v5647_v39 = vadd.f32 %v5543_v49, %v5351_v30  ;;  %v6935_v17 = vpop.f32.mrb[187].mxu0 }
 0x2cb   : > { %v5679_v22 = vadd.f32 %v10497_v29, %v5647_v39  ;;  %v5262_v48 = vpop.f32.mrb[190].mxu1 }
 0x2cc   : > { %v5548_v6 = vpop.f32.mrb[188].mxu0  ;;  %v5354_v8 = vadd.f32 %v5262_v48, %v10443_v5  ;;  %v6867_v54 = vpop.f32.mrb[191].mxu1 }
 0x2cd   : > { %5705 = vst.msk [vmem:[%s10503_s16 + $0x28] sm:$0xff] %vm5699_vm10, %v5679_v22  ;;  %v5648_v12 = vadd.f32 %v5548_v6, %v5352_v25  ;;  %v6938_v38 = vpop.f32.mrb[189].mxu0 }
 0x2cf   : > { %v5680_v4 = vadd.f32 %v10497_v29, %v5648_v12  ;;  %v5267_v55 = vpop.f32.mrb[192].mxu1 }
 0x2d0   : > { %v5553_v57 = vpop.f32.mrb[190].mxu0  ;;  %v5355_v3 = vadd.f32 %v5267_v55, %v10446_v19  ;;  %v6870_v41 = vpop.f32.mrb[193].mxu1 }
 0x2d1   : > { %5706 = vst.msk [vmem:[%s10503_s16 + $0x30] sm:$0xff] %vm5699_vm10, %v5680_v4  ;;  %v5649_v14 = vadd.f32 %v5553_v57, %v5353_v21  ;;  %v6941_v27 = vpop.f32.mrb[191].mxu0 }
 0x2d3   : > { %v5681_v5 = vadd.f32 %v10497_v29, %v5649_v14  ;;  %v5272_v34 = vpop.f32.mrb[194].mxu1 }
 0x2d4   : > { %v5558_v13 = vpop.f32.mrb[192].mxu0  ;;  %v5356_v52 = vadd.f32 %v5272_v34, %v10449_v47  ;;  %v6873_v58 = vpop.f32.mrb[195].mxu1 }
 0x2d5   : > { %5707 = vst.msk [vmem:[%s10503_s16 + $0x38] sm:$0xff] %vm5699_vm10, %v5681_v5  ;;  %v5650_v60 = vadd.f32 %v5558_v13, %v5354_v8  ;;  %v6944_v2 = vpop.f32.mrb[193].mxu0 }
 0x2d7   : > { %v5682_v19 = vadd.f32 %v10497_v29, %v5650_v60  ;;  %v5277_v36 = vpop.f32.mrb[196].mxu1 }
 0x2d8   : > { %v5563_v33 = vpop.f32.mrb[194].mxu0  ;;  %v5357_v37 = vadd.f32 %v5277_v36, %v10452_v50  ;;  %v6876_v1 = vpop.f32.mrb[197].mxu1 }
 0x2d9   : > { %5708 = vst.msk [vmem:[%s10503_s16 + $0x40] sm:$0xff] %vm5699_vm10, %v5682_v19  ;;  %v5651_v51 = vadd.f32 %v5563_v33, %v5355_v3  ;;  %v6947_v11 = vpop.f32.mrb[195].mxu0 }
 0x2db   : > { %v5683_v47 = vadd.f32 %v10497_v29, %v5651_v51  ;;  %v5282_v35 = vpop.f32.mrb[198].mxu1 }
 0x2dc   : > { %v5568_v23 = vpop.f32.mrb[196].mxu0  ;;  %v5358_v30 = vadd.f32 %v5282_v35, %v10455_v40  ;;  %v6879_v10 = vpop.f32.mrb[199].mxu1 }
 0x2dd   : > { %5709 = vst.msk [vmem:[%s10503_s16 + $0x48] sm:$0xff] %vm5699_vm10, %v5683_v47  ;;  %v5652_v18 = vadd.f32 %v5568_v23, %v5356_v52  ;;  %v6950_v61 = vpop.f32.mrb[197].mxu0 }
 0x2df   : > { %v5684_v50 = vadd.f32 %v10497_v29, %v5652_v18  ;;  %v5287_v43 = vpop.f32.mrb[200].mxu1 }
 0x2e0   : > { %v5573_v53 = vpop.f32.mrb[198].mxu0  ;;  %v5359_v24 = vadd.f32 %v5287_v43, %v10458_v44  ;;  %v6882_v25 = vpop.f32.mrb[201].mxu1 }
 0x2e1   : > { %5710 = vst.msk [vmem:[%s10503_s16 + $0x50] sm:$0xff] %vm5699_vm10, %v5684_v50  ;;  %v5653_v32 = vadd.f32 %v5573_v53, %v5357_v37  ;;  %v6953_v63 = vpop.f32.mrb[199].mxu0 }
 0x2e3   : > { %v5685_v40 = vadd.f32 %v10497_v29, %v5653_v32  ;;  %v5292_v59 = vpop.f32.mrb[202].mxu1 }
 0x2e4   : > { %v5578_v16 = vpop.f32.mrb[200].mxu0  ;;  %v5360_v62 = vadd.f32 %v5292_v59, %v10461_v26  ;;  %v6885_v49 = vpop.f32.mrb[203].mxu1 }
 0x2e5   : > { %5711 = vst.msk [vmem:[%s10503_s16 + $0x58] sm:$0xff] %vm5699_vm10, %v5685_v40  ;;  %v5654_v21 = vadd.f32 %v5578_v16, %v5358_v30  ;;  %v6956_v46 = vpop.f32.mrb[201].mxu0 }
 0x2e7   : > { %v5686_v44 = vadd.f32 %v10497_v29, %v5654_v21  ;;  %v5297_v39 = vpop.f32.mrb[204].mxu1 }
 0x2e8   : > { %v5583_v17 = vpop.f32.mrb[202].mxu0  ;;  %v5361_v22 = vadd.f32 %v5297_v39, %v10464_v42  ;;  %v6888_v48 = vpop.f32.mrb[205].mxu1 }
 0x2e9   : > { %5712 = vst.msk [vmem:[%s10503_s16 + $0x60] sm:$0xff] %vm5699_vm10, %v5686_v44  ;;  %v5655_v6 = vadd.f32 %v5583_v17, %v5359_v24  ;;  %v6959_v8 = vpop.f32.mrb[203].mxu0 }
 0x2eb   : > { %v5687_v26 = vadd.f32 %v10497_v29, %v5655_v6  ;;  %v5302_v54 = vpop.f32.mrb[206].mxu1 }
 0x2ec   : > { %v5588_v12 = vpop.f32.mrb[204].mxu0  ;;  %v5362_v38 = vadd.f32 %v5302_v54, %v10467_v7  ;;  %v6891_v4 = vpop.f32.mrb[207].mxu1 }
 0x2ed   : > { %5713 = vst.msk [vmem:[%s10503_s16 + $0x68] sm:$0xff] %vm5699_vm10, %v5687_v26  ;;  %v5656_v55 = vadd.f32 %v5588_v12, %v5360_v62  ;;  %v6962_v57 = vpop.f32.mrb[205].mxu0 }
 0x2ef   : > { %v5688_v42 = vadd.f32 %v10497_v29, %v5656_v55  ;;  %v5307_v3 = vpop.f32.mrb[208].mxu1 }
 0x2f0   : > { %v5593_v41 = vpop.f32.mrb[206].mxu0  ;;  %v5363_v14 = vadd.f32 %v5307_v3, %v10470_v0  ;;  %v6894_v27 = vpop.f32.mrb[209].mxu1 }
 0x2f1   : > { %5714 = vst.msk [vmem:[%s10503_s16 + $0x70] sm:$0xff] %vm5699_vm10, %v5688_v42  ;;  %v5657_v5 = vadd.f32 %v5593_v41, %v5361_v22  ;;  %v6965_v34 = vpop.f32.mrb[207].mxu0 }
 0x2f3   : > { %v5689_v7 = vadd.f32 %v10497_v29, %v5657_v5  ;;  %v5312_v13 = vpop.f32.mrb[210].mxu1 }
 0x2f4   : > { %v5598_v52 = vpop.f32.mrb[208].mxu0  ;;  %v5364_v58 = vadd.f32 %v5312_v13, %v10473_v45  ;;  %v6897_v60 = vpop.f32.mrb[211].mxu1 }
 0x2f5   : > { %5715 = vst.msk [vmem:[%s10503_s16 + $0x78] sm:$0xff] %vm5699_vm10, %v5689_v7  ;;  %v5658_v2 = vadd.f32 %v5598_v52, %v5362_v38  ;;  %v6968_v19 = vpop.f32.mrb[209].mxu0 }
 0x2f7   : > { %v5690_v0 = vadd.f32 %v10497_v29, %v5658_v2  ;;  %v5317_v36 = vpop.f32.mrb[212].mxu1 }
 0x2f8   : > { %v5603_v33 = vpop.f32.mrb[210].mxu0  ;;  %v5365_v37 = vadd.f32 %v5317_v36, %v10476_v56  ;;  %v6900_v1 = vpop.f32.mrb[213].mxu1 }
 0x2f9   : > { %5716 = vst.msk [vmem:[%s10503_s16 + $0x80] sm:$0xff] %vm5699_vm10, %v5690_v0  ;;  %v5659_v51 = vadd.f32 %v5603_v33, %v5363_v14  ;;  %v6971_v11 = vpop.f32.mrb[211].mxu0 }
 0x2fb   : > { %v5691_v45 = vadd.f32 %v10497_v29, %v5659_v51  ;;  %v5322_v47 = vpop.f32.mrb[214].mxu1 }
 0x2fc   : > { %v5608_v35 = vpop.f32.mrb[212].mxu0  ;;  %v5366_v23 = vadd.f32 %v5322_v47, %v10479_v20  ;;  %v6903_v30 = vpop.f32.mrb[215].mxu1 }
 0x2fd   : > { %5717 = vst.msk [vmem:[%s10503_s16 + $0x88] sm:$0xff] %vm5699_vm10, %v5691_v45  ;;  %v5660_v10 = vadd.f32 %v5608_v35, %v5364_v58  ;;  %v6974_v18 = vpop.f32.mrb[213].mxu0 }
 0x2ff   : > { %v5692_v56 = vadd.f32 %v10497_v29, %v5660_v10  ;;  %v5327_v61 = vpop.f32.mrb[216].mxu1 }
 0x300   : > { %v5613_v50 = vpop.f32.mrb[214].mxu0  ;;  %v5367_v43 = vadd.f32 %v5327_v61, %v10482_v9  ;;  %v6906_v53 = vpop.f32.mrb[217].mxu1 }
 0x301   : > { %5718 = vst.msk [vmem:[%s10503_s16 + $0x90] sm:$0xff] %vm5699_vm10, %v5692_v56  ;;  %v5661_v24 = vadd.f32 %v5613_v50, %v5365_v37  ;;  %v6977_v25 = vpop.f32.mrb[215].mxu0 }
 0x303   : > { %v5693_v20 = vadd.f32 %v10497_v29, %v5661_v24  ;;  %v5332_v32 = vpop.f32.mrb[218].mxu1 }
 0x304   : > { %v5618_v63 = vpop.f32.mrb[216].mxu0  ;;  %v5368_v40 = vadd.f32 %v5332_v32, %v10485_v31  ;;  %v6909_v59 = vpop.f32.mrb[219].mxu1 }
 0x305   : > { %5719 = vst.msk [vmem:[%s10503_s16 + $0x98] sm:$0xff] %vm5699_vm10, %v5693_v20  ;;  %v5662_v16 = vadd.f32 %v5618_v63, %v5366_v23  ;;  %v6980_v62 = vpop.f32.mrb[217].mxu0 }
 0x307   : > { %v5694_v9 = vadd.f32 %v10497_v29, %v5662_v16  ;;  %v5337_v49 = vpop.f32.mrb[220].mxu1 }
 0x308   : > { %v5623_v21 = vpop.f32.mrb[218].mxu0  ;;  %v5369_v46 = vadd.f32 %v5337_v49, %v10488_v28  ;;  %v6912_v44 = vpop.f32.mrb[221].mxu1 }
 0x309   : > { %5720 = vst.msk [vmem:[%s10503_s16 + $0xa0] sm:$0xff] %vm5699_vm10, %v5694_v9  ;;  %v5663_v39 = vadd.f32 %v5623_v21, %v5367_v43  ;;  %v6983_v17 = vpop.f32.mrb[219].mxu0 }
 0x30b   : > { %v5695_v31 = vadd.f32 %v10497_v29, %v5663_v39  ;;  %v5342_v22 = vpop.f32.mrb[222].mxu1 }
 0x30c   : > { %v5628_v48 = vpop.f32.mrb[220].mxu0  ;;  %v5370_v6 = vadd.f32 %v5342_v22, %v10491_v15  ;;  %v6915_v8 = vpop.f32.mrb[223].mxu1 }
 0x30d   : > { %5721 = vst.msk [vmem:[%s10503_s16 + $0xa8] sm:$0xff] %vm5699_vm10, %v5695_v31  ;;  %v5664_v26 = vadd.f32 %v5628_v48, %v5368_v40  ;;  %v6986_v54 = vpop.f32.mrb[221].mxu0 }
 0x30f   : > { %v5696_v28 = vadd.f32 %v10497_v29, %v5664_v26 }
 0x310   : > { %v5633_v12 = vpop.f32.mrb[222].mxu0 }
 0x311   : > { %5722 = vst.msk [vmem:[%s10503_s16 + $0xb0] sm:$0xff] %vm5699_vm10, %v5696_v28  ;;  %v5665_v38 = vadd.f32 %v5633_v12, %v5369_v46  ;;  %v6989_v4 = vpop.f32.mrb[223].mxu0 }
 0x313   : > { %v5697_v55 = vadd.f32 %v10497_v29, %v5665_v38 }
 0x314   : > { %v5638_v57 = vpop.f32.mrb[224].mxu0 }
 0x315   : > { %5723 = vst.msk [vmem:[%s10503_s16 + $0xb8] sm:$0xff] %vm5699_vm10, %v5697_v55  ;;  %v5666_v42 = vadd.f32 %v5638_v57, %v5370_v6  ;;  %v6992_v15 = vpop.f32.mrb[225].mxu0 }
 0x317   : > { %v5698_v3 = vadd.f32 %v10497_v29, %v5666_v42 }
 0x319   : > { %5725 = vst.msk [vmem:[%s10503_s16 + $0xc0] sm:$0xf] %vm5724_vm11, %v5698_v3 }
 0x31a PF: > { %s13_s12 = sadd.s32 1, %s7013_s12  }
 0x31b   : > { %p10_p4 = scmp.ge.s32.totalorder %s13_s12, 4  }
 0x31d   :  { %12 = sbr.rel (!%p10_p4) target bundleno = 1 (0x1), region = 70 }

</bundles_post_ra>
